<compile_context>
chip_gen: v7x
topology: tpu7x:2x2x1
jax: 0.10.0
libtpu: 0.0.40
codegen_flags: <defaults>
</compile_context>

<pallas_src>
import jax
import jax.numpy as jnp
from jax.experimental import pallas as pl
from jax.experimental.pallas import tpu as pltpu


# ---------------------------------------------------------------------------
# helpers
# ---------------------------------------------------------------------------
def _round_up(x, m):
    return (x + m - 1) // m * m


def _choose_time_chunk(T, max_chunk=16):
    for c in range(min(T, max_chunk), 0, -1):
        if T % c == 0:
            return c
    return 1


# ---------------------------------------------------------------------------
# Tiled Linear kernel:  y = x @ w_t + bias   (hoisted layer-1 input
# projection and the decoder)
# ---------------------------------------------------------------------------
def _linear_kernel(x_ref, w_ref, b_ref, o_ref):
    o_ref[...] = (jnp.dot(x_ref[...], w_ref[...],
                          preferred_element_type=jnp.float32)
                  + b_ref[...]).astype(o_ref.dtype)


def tiled_linear(x2d, w_t, bias, bm=256, bn=512):
    """x2d: (M, K), w_t: (K, N), bias: (N,) or (1, N).  Tiled over (M, N);
    K is kept whole (fits VMEM at these sizes).  M is padded to a sublane
    multiple, N to a lane multiple; padding is sliced off on return."""
    M, K = x2d.shape
    Kw, N = w_t.shape
    assert K == Kw
    bias = bias.reshape(1, -1)

    bm = min(bm, _round_up(M, 8))       # multiple of 8 (sublanes)
    bn = min(bn, _round_up(N, 128))     # multiple of 128 (lanes)
    Mp = _round_up(M, bm)
    Np = _round_up(N, bn)

    x_p = jnp.pad(x2d, ((0, Mp - M), (0, 0)))
    w_p = jnp.pad(w_t, ((0, 0), (0, Np - N)))
    b_p = jnp.pad(bias, ((0, 0), (0, Np - N)))

    out = pl.pallas_call(
        _linear_kernel,
        out_shape=jax.ShapeDtypeStruct((Mp, Np), x2d.dtype),
        grid_spec=pltpu.PrefetchScalarGridSpec(
            num_scalar_prefetch=0,
            grid=(Mp // bm, Np // bn),
            in_specs=[
                pl.BlockSpec((bm, K), lambda i, j: (i, 0)),
                pl.BlockSpec((K, bn), lambda i, j: (0, j)),
                pl.BlockSpec((1, bn), lambda i, j: (0, j)),
            ],
            out_specs=pl.BlockSpec((bm, bn), lambda i, j: (i, j)),
        ),
        compiler_params=pltpu.CompilerParams(
            dimension_semantics=("parallel", "parallel")),
    )(x_p, w_p, b_p)
    return out[:M, :N]


# ---------------------------------------------------------------------------
# Fused 2-layer LSTM recurrence kernel.
#   Layer 1: gates1 = g_pre1[t] + h1 @ Whh1^T           (input proj hoisted)
#   Layer 2: gates2 = b2 + h1_new @ Wih2^T + h2 @ Whh2^T (h1_new from VMEM)
# Gate layout is (B, 4*Hp) with each gate on its own 128-lane-aligned block;
# padding lanes are zero and stay zero through the recurrence.
# PyTorch gate order: i, f, g, o.  Initial h = c = 0.
# ---------------------------------------------------------------------------
def _lstm2_rec_kernel(g1_ref, whh1_ref, wih2_ref, whh2_ref, b2_ref,
                      y_ref, h1N_ref, c1N_ref, h2N_ref, c2N_ref,
                      h1_scr, c1_scr, h2_scr, c2_scr):
    chunk = pl.program_id(0)

    @pl.when(chunk == 0)
    def _():
        h1_scr[...] = jnp.zeros_like(h1_scr)
        c1_scr[...] = jnp.zeros_like(c1_scr)
        h2_scr[...] = jnp.zeros_like(h2_scr)
        c2_scr[...] = jnp.zeros_like(c2_scr)

    Tc = g1_ref.shape[0]
    Hp1 = h1_scr.shape[-1]
    Hp2 = h2_scr.shape[-1]

    # Hoist weight reads out of the step loop (resident vregs / VMEM views).
    whh1 = whh1_ref[...]                     # (Hp1, 4*Hp1)
    wih2 = wih2_ref[...]                     # (Hp1, 4*Hp2)
    whh2 = whh2_ref[...]                     # (Hp2, 4*Hp2)
    b2 = b2_ref[...]                         # (1, 4*Hp2)

    def gate_math(gates, c, Hp):
        i_g = jax.nn.sigmoid(gates[:, 0 * Hp:1 * Hp])
        f_g = jax.nn.sigmoid(gates[:, 1 * Hp:2 * Hp])
        g_g = jnp.tanh(gates[:, 2 * Hp:3 * Hp])
        o_g = jax.nn.sigmoid(gates[:, 3 * Hp:4 * Hp])
        c_new = f_g * c + i_g * g_g
        h_new = o_g * jnp.tanh(c_new)
        return h_new, c_new

    def step(t, carry):
        # ---- layer 1 ----
        h1 = h1_scr[...]
        c1 = c1_scr[...]
        gates1 = g1_ref[t] + jnp.dot(h1, whh1,
                                     preferred_element_type=jnp.float32)
        h1_new, c1_new = gate_math(gates1, c1, Hp1)
        h1_scr[...] = h1_new
        c1_scr[...] = c1_new

        # ---- layer 2 (consumes h1_new straight from VMEM) ----
        h2 = h2_scr[...]
        c2 = c2_scr[...]
        gates2 = (b2
                  + jnp.dot(h1_new, wih2, preferred_element_type=jnp.float32)
                  + jnp.dot(h2, whh2, preferred_element_type=jnp.float32))
        h2_new, c2_new = gate_math(gates2, c2, Hp2)
        h2_scr[...] = h2_new
        c2_scr[...] = c2_new

        y_ref[t] = h2_new.astype(y_ref.dtype)
        return carry

    jax.lax.fori_loop(0, Tc, step, None, unroll=True)

    @pl.when(chunk == pl.num_programs(0) - 1)
    def _():
        h1N_ref[...] = h1_scr[...].astype(h1N_ref.dtype)
        c1N_ref[...] = c1_scr[...].astype(c1N_ref.dtype)
        h2N_ref[...] = h2_scr[...].astype(h2N_ref.dtype)
        c2N_ref[...] = c2_scr[...].astype(c2N_ref.dtype)


def lstm2_recurrence(g_pre1, whh1_t, wih2_t, whh2_t, b2):
    """g_pre1: (T, Bp, 4*Hp1) layer-1 pre-activations,
    whh1_t: (Hp1, 4*Hp1), wih2_t: (Hp1, 4*Hp2), whh2_t: (Hp2, 4*Hp2),
    b2: (1, 4*Hp2)."""
    T, Bp, fourHp1 = g_pre1.shape
    Hp1 = fourHp1 // 4
    Hp2 = whh2_t.shape[0]
    fourHp2 = 4 * Hp2
    Tc = _choose_time_chunk(T)

    return pl.pallas_call(
        _lstm2_rec_kernel,
        out_shape=(jax.ShapeDtypeStruct((T, Bp, Hp2), g_pre1.dtype),
                   jax.ShapeDtypeStruct((Bp, Hp1), g_pre1.dtype),
                   jax.ShapeDtypeStruct((Bp, Hp1), g_pre1.dtype),
                   jax.ShapeDtypeStruct((Bp, Hp2), g_pre1.dtype),
                   jax.ShapeDtypeStruct((Bp, Hp2), g_pre1.dtype)),
        grid_spec=pltpu.PrefetchScalarGridSpec(
            num_scalar_prefetch=0,
            grid=(T // Tc,),
            in_specs=[
                pl.BlockSpec((Tc, Bp, fourHp1), lambda c: (c, 0, 0)),
                pl.BlockSpec((Hp1, fourHp1), lambda c: (0, 0)),
                pl.BlockSpec((Hp1, fourHp2), lambda c: (0, 0)),
                pl.BlockSpec((Hp2, fourHp2), lambda c: (0, 0)),
                pl.BlockSpec((1, fourHp2), lambda c: (0, 0)),
            ],
            out_specs=(
                pl.BlockSpec((Tc, Bp, Hp2), lambda c: (c, 0, 0)),
                pl.BlockSpec((Bp, Hp1), lambda c: (0, 0)),
                pl.BlockSpec((Bp, Hp1), lambda c: (0, 0)),
                pl.BlockSpec((Bp, Hp2), lambda c: (0, 0)),
                pl.BlockSpec((Bp, Hp2), lambda c: (0, 0)),
            ),
            scratch_shapes=[pltpu.VMEM((Bp, Hp1), jnp.float32),
                            pltpu.VMEM((Bp, Hp1), jnp.float32),
                            pltpu.VMEM((Bp, Hp2), jnp.float32),
                            pltpu.VMEM((Bp, Hp2), jnp.float32)],
        ),
        compiler_params=pltpu.CompilerParams(
            dimension_semantics=("arbitrary",)),
    )(g_pre1, whh1_t, wih2_t, whh2_t, b2)


# ---------------------------------------------------------------------------
# Padded weight prep: gate-aligned (per-gate lanes padded to multiples of 128)
# ---------------------------------------------------------------------------
def _prep_lstm_params(w_ih, w_hh, b_ih, b_hh, din):
    """din: feature dim of the (possibly lane-padded) activations fed to this
    layer (>= true input dim).  Extra rows/lanes are zero-padded."""
    fourH, d_real = w_ih.shape
    H = w_hh.shape[1]
    Hp = _round_up(H, 128)

    wih_t = w_ih.T.reshape(d_real, 4, H)
    wih_t = jnp.pad(wih_t, ((0, din - d_real), (0, 0), (0, Hp - H)))
    wih_t = wih_t.reshape(din, 4 * Hp)

    whh_t = w_hh.T.reshape(H, 4, H)
    whh_t = jnp.pad(whh_t, ((0, Hp - H), (0, 0), (0, Hp - H)))
    whh_t = whh_t.reshape(Hp, 4 * Hp)

    bias = (b_ih + b_hh).reshape(4, H)
    bias = jnp.pad(bias, ((0, 0), (0, Hp - H))).reshape(1, 4 * Hp)
    return wih_t, whh_t, bias, H, Hp


# ---------------------------------------------------------------------------
# Parameter init (deterministic, PyTorch-style ranges)
# ---------------------------------------------------------------------------
def init_params(key, ntoken, nwe, nz, nhid, nout, nlayers):
    layers = []
    for l in range(nlayers):
        in_sz = (nwe + nz) if l == 0 else nhid               # cond_fusion == 'cat'
        hid_sz = nhid if l != nlayers - 1 else nout
        k = 1.0 / float(hid_sz) ** 0.5
        key, k1, k2, k3, k4 = jax.random.split(key, 5)
        layers.append(dict(
            w_ih=jax.random.uniform(k1, (4 * hid_sz, in_sz), jnp.float32, -k, k),
            w_hh=jax.random.uniform(k2, (4 * hid_sz, hid_sz), jnp.float32, -k, k),
            b_ih=jax.random.uniform(k3, (4 * hid_sz,), jnp.float32, -k, k),
            b_hh=jax.random.uniform(k4, (4 * hid_sz,), jnp.float32, -k, k),
        ))
    key, kd = jax.random.split(key)
    dec_w = jax.random.uniform(kd, (ntoken, nout), jnp.float32, -0.1, 0.1)
    dec_b = jnp.zeros((ntoken,), jnp.float32)
    return dict(rnn=layers, decoder_w=dec_w, decoder_b=dec_b)


# ---------------------------------------------------------------------------
# Forward pass (RNNLanguageModel.forward with hidden=None, all dropouts = 0)
# ---------------------------------------------------------------------------
def rnn_lm_forward(params, z, emb):
    # _get_inputs (cond_fusion == 'cat'):
    #   z_ex = z.unsqueeze(0).expand(T, B, nz); inputs = cat([emb, z_ex], 2)
    T, B, nwe = emb.shape
    nz = z.shape[-1]
    Bp = _round_up(B, 8)                       # sublane-pad the batch

    layers = params["rnn"]
    assert len(layers) == 2, "fused kernel implements the nlayers=2 config"

    z_ex = jnp.broadcast_to(z[None], (T, B, nz))
    inputs = jnp.concatenate([emb, z_ex], axis=2)             # (T, B, ninp)
    inputs = jnp.pad(inputs, ((0, 0), (0, Bp - B), (0, 0)))   # (T, Bp, ninp)
    din1 = inputs.shape[2]

    l1, l2 = layers
    wih1_t, whh1_t, bias1, H1, Hp1 = _prep_lstm_params(
        l1["w_ih"], l1["w_hh"], l1["b_ih"], l1["b_hh"], din1)
    wih2_t, whh2_t, bias2, H2, Hp2 = _prep_lstm_params(
        l2["w_ih"], l2["w_hh"], l2["b_ih"], l2["b_hh"], Hp1)

    # Hoisted layer-1 input projection: one big MXU matmul over the sequence.
    g_pre1 = tiled_linear(inputs.reshape(T * Bp, din1), wih1_t, bias1)
    g_pre1 = g_pre1.reshape(T, Bp, 4 * Hp1)

    # Fused 2-layer serial recurrence (layer-1 output stays in VMEM).
    y2, h1_last, c1_last, h2_last, c2_last = lstm2_recurrence(
        g_pre1, whh1_t, wih2_t, whh2_t, bias2)

    h_n = [h1_last[:B, :H1][None], h2_last[:B, :H2][None]]   # each (1, B, H)
    c_n = [c1_last[:B, :H1][None], c2_last[:B, :H2][None]]

    # decode (do_downproj is False since nlayers > 1): decoder Linear only.
    ntoken, nout = params["decoder_w"].shape
    out2d = y2[:, :B, :].reshape(T * B, Hp2)
    dec_w_t = jnp.pad(params["decoder_w"].T, ((0, Hp2 - nout), (0, 0)))
    logits = tiled_linear(out2d, dec_w_t, params["decoder_b"])
    logits = logits.reshape(T, B, ntoken)
    return logits, (h_n, c_n)


# ---------------------------------------------------------------------------
# Pure-JAX reference (for correctness check)
# ---------------------------------------------------------------------------
def _lstm_layer_ref(x, w_ih, w_hh, b_ih, b_hh):
    H = w_hh.shape[1]
    B = x.shape[1]

    def step(carry, x_t):
        h, c = carry
        gates = (jnp.dot(x_t, w_ih.T, precision=jax.lax.Precision.HIGHEST) + b_ih
                 + jnp.dot(h, w_hh.T, precision=jax.lax.Precision.HIGHEST) + b_hh)
        i = jax.nn.sigmoid(gates[:, :H])
        f = jax.nn.sigmoid(gates[:, H:2 * H])
        g = jnp.tanh(gates[:, 2 * H:3 * H])
        o = jax.nn.sigmoid(gates[:, 3 * H:])
        c_new = f * c + i * g
        h_new = o * jnp.tanh(c_new)
        return (h_new, c_new), h_new

    init = (jnp.zeros((B, H), x.dtype), jnp.zeros((B, H), x.dtype))
    (hT, cT), ys = jax.lax.scan(step, init, x)
    return ys, hT[None], cT[None]


def rnn_lm_forward_ref(params, z, emb):
    T, B, _ = emb.shape
    inputs = jnp.concatenate(
        [emb, jnp.broadcast_to(z[None], (T,) + z.shape)], axis=2)
    output = inputs
    for layer in params["rnn"]:
        output, _, _ = _lstm_layer_ref(output, layer["w_ih"], layer["w_hh"],
                                       layer["b_ih"], layer["b_hh"])
    logits = (jnp.einsum("tbd,vd->tbv", output, params["decoder_w"],
                         precision=jax.lax.Precision.HIGHEST)
              + params["decoder_b"])
    return logits


# ---------------------------------------------------------------------------
if __name__ == "__main__":
    # Config consistent with RNNLanguageModel(ntoken, nwe, nz, 'cat', nhid, nout,
    #   nlayers=2, cell='LSTM', dropouti=0, dropoutl=0, dropoutw=0, dropouto=0)
    ntoken, nwe, nz, nhid, nout, nlayers = 64, 32, 16, 32, 32, 2
    T, B = 8, 2

    key = jax.random.PRNGKey(0)
    kp, kz, ke = jax.random.split(key, 3)
    params = init_params(kp, ntoken, nwe, nz, nhid, nout, nlayers)
    z = jax.random.normal(kz, (B, nz), jnp.float32)        # conditioning vector
    emb = jax.random.normal(ke, (T, B, nwe), jnp.float32)  # word embeddings

    logits, (h_n, c_n) = jax.jit(rnn_lm_forward)(params, z, emb)
    jax.block_until_ready(logits)

    assert logits.shape == (T, B, ntoken)
    assert len(h_n) == nlayers and len(c_n) == nlayers
    assert h_n[0].shape == (1, B, nhid) and c_n[-1].shape == (1, B, nout)

    ref = rnn_lm_forward_ref(params, z, emb)
    if not jnp.allclose(logits, ref, atol=2e-3, rtol=2e-3):
        raise AssertionError("Pallas output does not match JAX reference")

    print("KERNEL_OK")
</pallas_src>

<mosaic_0001>
module attributes {stable_mosaic.version = 11 : i64} {
  func.func @_linear_kernel(%arg0: i32, %arg1: i32, %arg2: memref<64x48xf32, #tpu.memory_space<vmem>>, %arg3: memref<48x512xf32, #tpu.memory_space<vmem>>, %arg4: memref<1x512xf32, #tpu.memory_space<vmem>>, %arg5: memref<64x512xf32, #tpu.memory_space<vmem>>) attributes {dimension_semantics = [#tpu.dimension_semantics<parallel>, #tpu.dimension_semantics<parallel>], iteration_bounds = array<i64: 1, 1>, scalar_prefetch = 0 : i64, scratch_operands = 0 : i64, tpu.core_type = #tpu.core_type<tc>, window_params = [{transform_indices = @transform_0, window_bounds = array<i64: 64, 48>}, {transform_indices = @transform_1, window_bounds = array<i64: 48, 512>}, {transform_indices = @transform_2, window_bounds = array<i64: 1, 512>}, {transform_indices = @transform_3, window_bounds = array<i64: 64, 512>}]} {
    %c0 = arith.constant 0 : index
    %c0_0 = arith.constant 0 : index
    %0 = vector.load %arg2[%c0, %c0_0] : memref<64x48xf32, #tpu.memory_space<vmem>>, vector<64x48xf32>
    %c0_1 = arith.constant 0 : index
    %c0_2 = arith.constant 0 : index
    %1 = vector.load %arg3[%c0_1, %c0_2] : memref<48x512xf32, #tpu.memory_space<vmem>>, vector<48x512xf32>
    %cst = arith.constant dense<0.000000e+00> : vector<64x512xf32>
    %2 = tpu.matmul %0, %1, %cst {dimension_numbers = #tpu.dot_dimension_numbers<[1], [0], [0], [1], [0, 0, 1, 1], [], []>} : vector<64x48xf32>, vector<48x512xf32>, vector<64x512xf32> -> vector<64x512xf32>
    %c0_3 = arith.constant 0 : index
    %c0_4 = arith.constant 0 : index
    %3 = vector.load %arg4[%c0_3, %c0_4] : memref<1x512xf32, #tpu.memory_space<vmem>>, vector<1x512xf32>
    %4 = vector.broadcast %3 : vector<1x512xf32> to vector<64x512xf32>
    %5 = arith.addf %2, %4 : vector<64x512xf32>
    %c0_5 = arith.constant 0 : index
    %c0_6 = arith.constant 0 : index
    %6 = vector.load %arg5[%c0_5, %c0_6] : memref<64x512xf32, #tpu.memory_space<vmem>>, vector<64x512xf32>
    tpu.vector_store %arg5[%c0_5, %c0_6], %5 {strides = array<i32>} : memref<64x512xf32, #tpu.memory_space<vmem>>, vector<64x512xf32>,
    return
  }
  func.func @transform_0(%arg0: i32, %arg1: i32) -> (i32, i32) {
    %c0_i32 = arith.constant 0 : i32
    %c0_i32_0 = arith.constant 0 : i32
    return %arg0, %c0_i32 : i32, i32
  }
  func.func @transform_1(%arg0: i32, %arg1: i32) -> (i32, i32) {
    %c0_i32 = arith.constant 0 : i32
    %c0_i32_0 = arith.constant 0 : i32
    return %c0_i32, %arg1 : i32, i32
  }
  func.func @transform_2(%arg0: i32, %arg1: i32) -> (i32, i32) {
    %c0_i32 = arith.constant 0 : i32
    %c0_i32_0 = arith.constant 0 : i32
    return %c0_i32, %arg1 : i32, i32
  }
  func.func @transform_3(%arg0: i32, %arg1: i32) -> (i32, i32) {
    %c0_i32 = arith.constant 0 : i32
    return %arg0, %arg1 : i32, i32
  }
}

module attributes {stable_mosaic.version = 11 : i64} {
  func.func @_linear_kernel(%arg0: i32, %arg1: i32, %arg2: memref<16x128xf32, #tpu.memory_space<vmem>>, %arg3: memref<128x128xf32, #tpu.memory_space<vmem>>, %arg4: memref<1x128xf32, #tpu.memory_space<vmem>>, %arg5: memref<16x128xf32, #tpu.memory_space<vmem>>) attributes {dimension_semantics = [#tpu.dimension_semantics<parallel>, #tpu.dimension_semantics<parallel>], iteration_bounds = array<i64: 1, 1>, scalar_prefetch = 0 : i64, scratch_operands = 0 : i64, tpu.core_type = #tpu.core_type<tc>, window_params = [{transform_indices = @transform_0, window_bounds = array<i64: 16, 128>}, {transform_indices = @transform_1, window_bounds = array<i64: 128, 128>}, {transform_indices = @transform_2, window_bounds = array<i64: 1, 128>}, {transform_indices = @transform_3, window_bounds = array<i64: 16, 128>}]} {
    %c0 = arith.constant 0 : index
    %c0_0 = arith.constant 0 : index
    %0 = vector.load %arg2[%c0, %c0_0] : memref<16x128xf32, #tpu.memory_space<vmem>>, vector<16x128xf32>
    %c0_1 = arith.constant 0 : index
    %c0_2 = arith.constant 0 : index
    %1 = vector.load %arg3[%c0_1, %c0_2] : memref<128x128xf32, #tpu.memory_space<vmem>>, vector<128x128xf32>
    %cst = arith.constant dense<0.000000e+00> : vector<16x128xf32>
    %2 = tpu.matmul %0, %1, %cst {dimension_numbers = #tpu.dot_dimension_numbers<[1], [0], [0], [1], [0, 0, 1, 1], [], []>} : vector<16x128xf32>, vector<128x128xf32>, vector<16x128xf32> -> vector<16x128xf32>
    %c0_3 = arith.constant 0 : index
    %c0_4 = arith.constant 0 : index
    %3 = vector.load %arg4[%c0_3, %c0_4] : memref<1x128xf32, #tpu.memory_space<vmem>>, vector<1x128xf32>
    %4 = vector.broadcast %3 : vector<1x128xf32> to vector<16x128xf32>
    %5 = arith.addf %2, %4 : vector<16x128xf32>
    %c0_5 = arith.constant 0 : index
    %c0_6 = arith.constant 0 : index
    %6 = vector.load %arg5[%c0_5, %c0_6] : memref<16x128xf32, #tpu.memory_space<vmem>>, vector<16x128xf32>
    tpu.vector_store %arg5[%c0_5, %c0_6], %5 {strides = array<i32>} : memref<16x128xf32, #tpu.memory_space<vmem>>, vector<16x128xf32>,
    return
  }
  func.func @transform_0(%arg0: i32, %arg1: i32) -> (i32, i32) {
    %c0_i32 = arith.constant 0 : i32
    %c0_i32_0 = arith.constant 0 : i32
    return %arg0, %c0_i32 : i32, i32
  }
  func.func @transform_1(%arg0: i32, %arg1: i32) -> (i32, i32) {
    %c0_i32 = arith.constant 0 : i32
    %c0_i32_0 = arith.constant 0 : i32
    return %c0_i32, %arg1 : i32, i32
  }
  func.func @transform_2(%arg0: i32, %arg1: i32) -> (i32, i32) {
    %c0_i32 = arith.constant 0 : i32
    %c0_i32_0 = arith.constant 0 : i32
    return %c0_i32, %arg1 : i32, i32
  }
  func.func @transform_3(%arg0: i32, %arg1: i32) -> (i32, i32) {
    %c0_i32 = arith.constant 0 : i32
    return %arg0, %arg1 : i32, i32
  }
}

module attributes {stable_mosaic.version = 11 : i64} {
  func.func @_lstm2_rec_kernel(%arg0: i32, %arg1: memref<8x8x512xf32, #tpu.memory_space<vmem>>, %arg2: memref<128x512xf32, #tpu.memory_space<vmem>>, %arg3: memref<128x512xf32, #tpu.memory_space<vmem>>, %arg4: memref<128x512xf32, #tpu.memory_space<vmem>>, %arg5: memref<1x512xf32, #tpu.memory_space<vmem>>, %arg6: memref<8x8x128xf32, #tpu.memory_space<vmem>>, %arg7: memref<8x128xf32, #tpu.memory_space<vmem>>, %arg8: memref<8x128xf32, #tpu.memory_space<vmem>>, %arg9: memref<8x128xf32, #tpu.memory_space<vmem>>, %arg10: memref<8x128xf32, #tpu.memory_space<vmem>>, %arg11: memref<8x128xf32, #tpu.memory_space<vmem>>, %arg12: memref<8x128xf32, #tpu.memory_space<vmem>>, %arg13: memref<8x128xf32, #tpu.memory_space<vmem>>, %arg14: memref<8x128xf32, #tpu.memory_space<vmem>>) attributes {dimension_semantics = [#tpu.dimension_semantics<arbitrary>], iteration_bounds = array<i64: 1>, scalar_prefetch = 0 : i64, scratch_operands = 4 : i64, tpu.core_type = #tpu.core_type<tc>, window_params = [{transform_indices = @transform_0, window_bounds = array<i64: 8, 8, 512>}, {pipeline_mode = #tpu.pipeline_mode<synchronous>, transform_indices = @transform_1, window_bounds = array<i64: 128, 512>}, {pipeline_mode = #tpu.pipeline_mode<synchronous>, transform_indices = @transform_2, window_bounds = array<i64: 128, 512>}, {pipeline_mode = #tpu.pipeline_mode<synchronous>, transform_indices = @transform_3, window_bounds = array<i64: 128, 512>}, {pipeline_mode = #tpu.pipeline_mode<synchronous>, transform_indices = @transform_4, window_bounds = array<i64: 1, 512>}, {transform_indices = @transform_5, window_bounds = array<i64: 8, 8, 128>}, {pipeline_mode = #tpu.pipeline_mode<synchronous>, transform_indices = @transform_6, window_bounds = array<i64: 8, 128>}, {pipeline_mode = #tpu.pipeline_mode<synchronous>, transform_indices = @transform_7, window_bounds = array<i64: 8, 128>}, {pipeline_mode = #tpu.pipeline_mode<synchronous>, transform_indices = @transform_8, window_bounds = array<i64: 8, 128>}, {pipeline_mode = #tpu.pipeline_mode<synchronous>, transform_indices = @transform_9, window_bounds = array<i64: 8, 128>}]} {
    %c0_i32 = arith.constant 0 : i32
    %0 = arith.cmpi eq, %arg0, %c0_i32 : i32
    %1 = arith.extui %0 : i1 to i32
    %c0_i32_0 = arith.constant 0 : i32
    %2 = arith.cmpi ne, %1, %c0_i32_0 : i32
    scf.if %2 {
      %cst_242 = arith.constant 0.000000e+00 : f32
      %586 = vector.broadcast %cst_242 : f32 to vector<8x128xf32>
      %c0_243 = arith.constant 0 : index
      %c0_244 = arith.constant 0 : index
      %587 = vector.load %arg11[%c0_243, %c0_244] : memref<8x128xf32, #tpu.memory_space<vmem>>, vector<8x128xf32>
      tpu.vector_store %arg11[%c0_243, %c0_244], %586 {strides = array<i32>} : memref<8x128xf32, #tpu.memory_space<vmem>>, vector<8x128xf32>,
      %cst_245 = arith.constant 0.000000e+00 : f32
      %588 = vector.broadcast %cst_245 : f32 to vector<8x128xf32>
      %c0_246 = arith.constant 0 : index
      %c0_247 = arith.constant 0 : index
      %589 = vector.load %arg12[%c0_246, %c0_247] : memref<8x128xf32, #tpu.memory_space<vmem>>, vector<8x128xf32>
      tpu.vector_store %arg12[%c0_246, %c0_247], %588 {strides = array<i32>} : memref<8x128xf32, #tpu.memory_space<vmem>>, vector<8x128xf32>,
      %cst_248 = arith.constant 0.000000e+00 : f32
      %590 = vector.broadcast %cst_248 : f32 to vector<8x128xf32>
      %c0_249 = arith.constant 0 : index
      %c0_250 = arith.constant 0 : index
      %591 = vector.load %arg13[%c0_249, %c0_250] : memref<8x128xf32, #tpu.memory_space<vmem>>, vector<8x128xf32>
      tpu.vector_store %arg13[%c0_249, %c0_250], %590 {strides = array<i32>} : memref<8x128xf32, #tpu.memory_space<vmem>>, vector<8x128xf32>,
      %cst_251 = arith.constant 0.000000e+00 : f32
      %592 = vector.broadcast %cst_251 : f32 to vector<8x128xf32>
      %c0_252 = arith.constant 0 : index
      %c0_253 = arith.constant 0 : index
      %593 = vector.load %arg14[%c0_252, %c0_253] : memref<8x128xf32, #tpu.memory_space<vmem>>, vector<8x128xf32>
      tpu.vector_store %arg14[%c0_252, %c0_253], %592 {strides = array<i32>} : memref<8x128xf32, #tpu.memory_space<vmem>>, vector<8x128xf32>,
    } else {
    }
    %c0 = arith.constant 0 : index
    %c0_1 = arith.constant 0 : index
    %3 = vector.load %arg2[%c0, %c0_1] : memref<128x512xf32, #tpu.memory_space<vmem>>, vector<128x512xf32>
    %c0_2 = arith.constant 0 : index
    %c0_3 = arith.constant 0 : index
    %4 = vector.load %arg3[%c0_2, %c0_3] : memref<128x512xf32, #tpu.memory_space<vmem>>, vector<128x512xf32>
    %c0_4 = arith.constant 0 : index
    %c0_5 = arith.constant 0 : index
    %5 = vector.load %arg4[%c0_4, %c0_5] : memref<128x512xf32, #tpu.memory_space<vmem>>, vector<128x512xf32>
    %c0_6 = arith.constant 0 : index
    %c0_7 = arith.constant 0 : index
    %6 = vector.load %arg5[%c0_6, %c0_7] : memref<1x512xf32, #tpu.memory_space<vmem>>, vector<1x512xf32>
    %c0_i32_8 = arith.constant 0 : i32
    %c0_9 = arith.constant 0 : index
    %c0_10 = arith.constant 0 : index
    %7 = vector.load %arg11[%c0_9, %c0_10] : memref<8x128xf32, #tpu.memory_space<vmem>>, vector<8x128xf32>
    %c0_11 = arith.constant 0 : index
    %c0_12 = arith.constant 0 : index
    %8 = vector.load %arg12[%c0_11, %c0_12] : memref<8x128xf32, #tpu.memory_space<vmem>>, vector<8x128xf32>
    %9 = arith.index_cast %c0_i32_8 : i32 to index
    %c0_13 = arith.constant 0 : index
    %c0_14 = arith.constant 0 : index
    %10 = vector.load %arg1[%9, %c0_13, %c0_14] : memref<8x8x512xf32, #tpu.memory_space<vmem>>, vector<1x8x512xf32>
    %11 = vector.shape_cast %10 : vector<1x8x512xf32> to vector<8x512xf32>
    %cst = arith.constant dense<0.000000e+00> : vector<8x512xf32>
    %12 = tpu.matmul %7, %3, %cst {dimension_numbers = #tpu.dot_dimension_numbers<[1], [0], [0], [1], [0, 0, 1, 1], [], []>} : vector<8x128xf32>, vector<128x512xf32>, vector<8x512xf32> -> vector<8x512xf32>
    %13 = arith.addf %11, %12 : vector<8x512xf32>
    %14 = vector.extract_strided_slice %13 {offsets = [0, 0], sizes = [8, 128], strides = [1, 1]} : vector<8x512xf32> to vector<8x128xf32>
    %15 = arith.negf %14 : vector<8x128xf32>
    %16 = math.exp %15 : vector<8x128xf32>
    %cst_15 = arith.constant 1.000000e+00 : f32
    %17 = vector.broadcast %cst_15 : f32 to vector<8x128xf32>
    %18 = arith.addf %17, %16 : vector<8x128xf32>
    %19 = arith.divf %17, %18 : vector<8x128xf32>
    %20 = vector.extract_strided_slice %13 {offsets = [0, 128], sizes = [8, 128], strides = [1, 1]} : vector<8x512xf32> to vector<8x128xf32>
    %21 = arith.negf %20 : vector<8x128xf32>
    %22 = math.exp %21 : vector<8x128xf32>
    %cst_16 = arith.constant 1.000000e+00 : f32
    %23 = vector.broadcast %cst_16 : f32 to vector<8x128xf32>
    %24 = arith.addf %23, %22 : vector<8x128xf32>
    %25 = arith.divf %23, %24 : vector<8x128xf32>
    %26 = vector.extract_strided_slice %13 {offsets = [0, 256], sizes = [8, 128], strides = [1, 1]} : vector<8x512xf32> to vector<8x128xf32>
    %27 = math.tanh %26 : vector<8x128xf32>
    %28 = vector.extract_strided_slice %13 {offsets = [0, 384], sizes = [8, 128], strides = [1, 1]} : vector<8x512xf32> to vector<8x128xf32>
    %29 = arith.negf %28 : vector<8x128xf32>
    %30 = math.exp %29 : vector<8x128xf32>
    %cst_17 = arith.constant 1.000000e+00 : f32
    %31 = vector.broadcast %cst_17 : f32 to vector<8x128xf32>
    %32 = arith.addf %31, %30 : vector<8x128xf32>
    %33 = arith.divf %31, %32 : vector<8x128xf32>
    %34 = arith.mulf %25, %8 : vector<8x128xf32>
    %35 = arith.mulf %19, %27 : vector<8x128xf32>
    %36 = arith.addf %34, %35 : vector<8x128xf32>
    %37 = math.tanh %36 : vector<8x128xf32>
    %38 = arith.mulf %33, %37 : vector<8x128xf32>
    %c0_18 = arith.constant 0 : index
    %c0_19 = arith.constant 0 : index
    %39 = vector.load %arg11[%c0_18, %c0_19] : memref<8x128xf32, #tpu.memory_space<vmem>>, vector<8x128xf32>
    tpu.vector_store %arg11[%c0_18, %c0_19], %38 {strides = array<i32>} : memref<8x128xf32, #tpu.memory_space<vmem>>, vector<8x128xf32>,
    %c0_20 = arith.constant 0 : index
    %c0_21 = arith.constant 0 : index
    %40 = vector.load %arg12[%c0_20, %c0_21] : memref<8x128xf32, #tpu.memory_space<vmem>>, vector<8x128xf32>
    tpu.vector_store %arg12[%c0_20, %c0_21], %36 {strides = array<i32>} : memref<8x128xf32, #tpu.memory_space<vmem>>, vector<8x128xf32>,
    %c0_22 = arith.constant 0 : index
    %c0_23 = arith.constant 0 : index
    %41 = vector.load %arg13[%c0_22, %c0_23] : memref<8x128xf32, #tpu.memory_space<vmem>>, vector<8x128xf32>
    %c0_24 = arith.constant 0 : index
    %c0_25 = arith.constant 0 : index
    %42 = vector.load %arg14[%c0_24, %c0_25] : memref<8x128xf32, #tpu.memory_space<vmem>>, vector<8x128xf32>
    %cst_26 = arith.constant dense<0.000000e+00> : vector<8x512xf32>
    %43 = tpu.matmul %38, %4, %cst_26 {dimension_numbers = #tpu.dot_dimension_numbers<[1], [0], [0], [1], [0, 0, 1, 1], [], []>} : vector<8x128xf32>, vector<128x512xf32>, vector<8x512xf32> -> vector<8x512xf32>
    %44 = vector.broadcast %6 : vector<1x512xf32> to vector<8x512xf32>
    %45 = arith.addf %44, %43 : vector<8x512xf32>
    %cst_27 = arith.constant dense<0.000000e+00> : vector<8x512xf32>
    %46 = tpu.matmul %41, %5, %cst_27 {dimension_numbers = #tpu.dot_dimension_numbers<[1], [0], [0], [1], [0, 0, 1, 1], [], []>} : vector<8x128xf32>, vector<128x512xf32>, vector<8x512xf32> -> vector<8x512xf32>
    %47 = arith.addf %45, %46 : vector<8x512xf32>
    %48 = vector.extract_strided_slice %47 {offsets = [0, 0], sizes = [8, 128], strides = [1, 1]} : vector<8x512xf32> to vector<8x128xf32>
    %49 = arith.negf %48 : vector<8x128xf32>
    %50 = math.exp %49 : vector<8x128xf32>
    %cst_28 = arith.constant 1.000000e+00 : f32
    %51 = vector.broadcast %cst_28 : f32 to vector<8x128xf32>
    %52 = arith.addf %51, %50 : vector<8x128xf32>
    %53 = arith.divf %51, %52 : vector<8x128xf32>
    %54 = vector.extract_strided_slice %47 {offsets = [0, 128], sizes = [8, 128], strides = [1, 1]} : vector<8x512xf32> to vector<8x128xf32>
    %55 = arith.negf %54 : vector<8x128xf32>
    %56 = math.exp %55 : vector<8x128xf32>
    %cst_29 = arith.constant 1.000000e+00 : f32
    %57 = vector.broadcast %cst_29 : f32 to vector<8x128xf32>
    %58 = arith.addf %57, %56 : vector<8x128xf32>
    %59 = arith.divf %57, %58 : vector<8x128xf32>
    %60 = vector.extract_strided_slice %47 {offsets = [0, 256], sizes = [8, 128], strides = [1, 1]} : vector<8x512xf32> to vector<8x128xf32>
    %61 = math.tanh %60 : vector<8x128xf32>
    %62 = vector.extract_strided_slice %47 {offsets = [0, 384], sizes = [8, 128], strides = [1, 1]} : vector<8x512xf32> to vector<8x128xf32>
    %63 = arith.negf %62 : vector<8x128xf32>
    %64 = math.exp %63 : vector<8x128xf32>
    %cst_30 = arith.constant 1.000000e+00 : f32
    %65 = vector.broadcast %cst_30 : f32 to vector<8x128xf32>
    %66 = arith.addf %65, %64 : vector<8x128xf32>
    %67 = arith.divf %65, %66 : vector<8x128xf32>
    %68 = arith.mulf %59, %42 : vector<8x128xf32>
    %69 = arith.mulf %53, %61 : vector<8x128xf32>
    %70 = arith.addf %68, %69 : vector<8x128xf32>
    %71 = math.tanh %70 : vector<8x128xf32>
    %72 = arith.mulf %67, %71 : vector<8x128xf32>
    %c0_31 = arith.constant 0 : index
    %c0_32 = arith.constant 0 : index
    %73 = vector.load %arg13[%c0_31, %c0_32] : memref<8x128xf32, #tpu.memory_space<vmem>>, vector<8x128xf32>
    tpu.vector_store %arg13[%c0_31, %c0_32], %72 {strides = array<i32>} : memref<8x128xf32, #tpu.memory_space<vmem>>, vector<8x128xf32>,
    %c0_33 = arith.constant 0 : index
    %c0_34 = arith.constant 0 : index
    %74 = vector.load %arg14[%c0_33, %c0_34] : memref<8x128xf32, #tpu.memory_space<vmem>>, vector<8x128xf32>
    tpu.vector_store %arg14[%c0_33, %c0_34], %70 {strides = array<i32>} : memref<8x128xf32, #tpu.memory_space<vmem>>, vector<8x128xf32>,
    %75 = arith.index_cast %c0_i32_8 : i32 to index
    %c0_35 = arith.constant 0 : index
    %c0_36 = arith.constant 0 : index
    %76 = vector.load %arg6[%75, %c0_35, %c0_36] : memref<8x8x128xf32, #tpu.memory_space<vmem>>, vector<1x8x128xf32>
    %77 = vector.shape_cast %76 : vector<1x8x128xf32> to vector<8x128xf32>
    %78 = vector.shape_cast %72 : vector<8x128xf32> to vector<1x8x128xf32>
    tpu.vector_store %arg6[%75, %c0_35, %c0_36], %78 {strides = array<i32>} : memref<8x8x128xf32, #tpu.memory_space<vmem>>, vector<1x8x128xf32>,
    %c1_i32 = arith.constant 1 : i32
    %c0_37 = arith.constant 0 : index
    %c0_38 = arith.constant 0 : index
    %79 = vector.load %arg11[%c0_37, %c0_38] : memref<8x128xf32, #tpu.memory_space<vmem>>, vector<8x128xf32>
    %c0_39 = arith.constant 0 : index
    %c0_40 = arith.constant 0 : index
    %80 = vector.load %arg12[%c0_39, %c0_40] : memref<8x128xf32, #tpu.memory_space<vmem>>, vector<8x128xf32>
    %81 = arith.index_cast %c1_i32 : i32 to index
    %c0_41 = arith.constant 0 : index
    %c0_42 = arith.constant 0 : index
    %82 = vector.load %arg1[%81, %c0_41, %c0_42] : memref<8x8x512xf32, #tpu.memory_space<vmem>>, vector<1x8x512xf32>
    %83 = vector.shape_cast %82 : vector<1x8x512xf32> to vector<8x512xf32>
    %cst_43 = arith.constant dense<0.000000e+00> : vector<8x512xf32>
    %84 = tpu.matmul %79, %3, %cst_43 {dimension_numbers = #tpu.dot_dimension_numbers<[1], [0], [0], [1], [0, 0, 1, 1], [], []>} : vector<8x128xf32>, vector<128x512xf32>, vector<8x512xf32> -> vector<8x512xf32>
    %85 = arith.addf %83, %84 : vector<8x512xf32>
    %86 = vector.extract_strided_slice %85 {offsets = [0, 0], sizes = [8, 128], strides = [1, 1]} : vector<8x512xf32> to vector<8x128xf32>
    %87 = arith.negf %86 : vector<8x128xf32>
    %88 = math.exp %87 : vector<8x128xf32>
    %cst_44 = arith.constant 1.000000e+00 : f32
    %89 = vector.broadcast %cst_44 : f32 to vector<8x128xf32>
    %90 = arith.addf %89, %88 : vector<8x128xf32>
    %91 = arith.divf %89, %90 : vector<8x128xf32>
    %92 = vector.extract_strided_slice %85 {offsets = [0, 128], sizes = [8, 128], strides = [1, 1]} : vector<8x512xf32> to vector<8x128xf32>
    %93 = arith.negf %92 : vector<8x128xf32>
    %94 = math.exp %93 : vector<8x128xf32>
    %cst_45 = arith.constant 1.000000e+00 : f32
    %95 = vector.broadcast %cst_45 : f32 to vector<8x128xf32>
    %96 = arith.addf %95, %94 : vector<8x128xf32>
    %97 = arith.divf %95, %96 : vector<8x128xf32>
    %98 = vector.extract_strided_slice %85 {offsets = [0, 256], sizes = [8, 128], strides = [1, 1]} : vector<8x512xf32> to vector<8x128xf32>
    %99 = math.tanh %98 : vector<8x128xf32>
    %100 = vector.extract_strided_slice %85 {offsets = [0, 384], sizes = [8, 128], strides = [1, 1]} : vector<8x512xf32> to vector<8x128xf32>
    %101 = arith.negf %100 : vector<8x128xf32>
    %102 = math.exp %101 : vector<8x128xf32>
    %cst_46 = arith.constant 1.000000e+00 : f32
    %103 = vector.broadcast %cst_46 : f32 to vector<8x128xf32>
    %104 = arith.addf %103, %102 : vector<8x128xf32>
    %105 = arith.divf %103, %104 : vector<8x128xf32>
    %106 = arith.mulf %97, %80 : vector<8x128xf32>
    %107 = arith.mulf %91, %99 : vector<8x128xf32>
    %108 = arith.addf %106, %107 : vector<8x128xf32>
    %109 = math.tanh %108 : vector<8x128xf32>
    %110 = arith.mulf %105, %109 : vector<8x128xf32>
    %c0_47 = arith.constant 0 : index
    %c0_48 = arith.constant 0 : index
    %111 = vector.load %arg11[%c0_47, %c0_48] : memref<8x128xf32, #tpu.memory_space<vmem>>, vector<8x128xf32>
    tpu.vector_store %arg11[%c0_47, %c0_48], %110 {strides = array<i32>} : memref<8x128xf32, #tpu.memory_space<vmem>>, vector<8x128xf32>,
    %c0_49 = arith.constant 0 : index
    %c0_50 = arith.constant 0 : index
    %112 = vector.load %arg12[%c0_49, %c0_50] : memref<8x128xf32, #tpu.memory_space<vmem>>, vector<8x128xf32>
    tpu.vector_store %arg12[%c0_49, %c0_50], %108 {strides = array<i32>} : memref<8x128xf32, #tpu.memory_space<vmem>>, vector<8x128xf32>,
    %c0_51 = arith.constant 0 : index
    %c0_52 = arith.constant 0 : index
    %113 = vector.load %arg13[%c0_51, %c0_52] : memref<8x128xf32, #tpu.memory_space<vmem>>, vector<8x128xf32>
    %c0_53 = arith.constant 0 : index
    %c0_54 = arith.constant 0 : index
    %114 = vector.load %arg14[%c0_53, %c0_54] : memref<8x128xf32, #tpu.memory_space<vmem>>, vector<8x128xf32>
    %cst_55 = arith.constant dense<0.000000e+00> : vector<8x512xf32>
    %115 = tpu.matmul %110, %4, %cst_55 {dimension_numbers = #tpu.dot_dimension_numbers<[1], [0], [0], [1], [0, 0, 1, 1], [], []>} : vector<8x128xf32>, vector<128x512xf32>, vector<8x512xf32> -> vector<8x512xf32>
    %116 = vector.broadcast %6 : vector<1x512xf32> to vector<8x512xf32>
    %117 = arith.addf %116, %115 : vector<8x512xf32>
    %cst_56 = arith.constant dense<0.000000e+00> : vector<8x512xf32>
    %118 = tpu.matmul %113, %5, %cst_56 {dimension_numbers = #tpu.dot_dimension_numbers<[1], [0], [0], [1], [0, 0, 1, 1], [], []>} : vector<8x128xf32>, vector<128x512xf32>, vector<8x512xf32> -> vector<8x512xf32>
    %119 = arith.addf %117, %118 : vector<8x512xf32>
    %120 = vector.extract_strided_slice %119 {offsets = [0, 0], sizes = [8, 128], strides = [1, 1]} : vector<8x512xf32> to vector<8x128xf32>
    %121 = arith.negf %120 : vector<8x128xf32>
    %122 = math.exp %121 : vector<8x128xf32>
    %cst_57 = arith.constant 1.000000e+00 : f32
    %123 = vector.broadcast %cst_57 : f32 to vector<8x128xf32>
    %124 = arith.addf %123, %122 : vector<8x128xf32>
    %125 = arith.divf %123, %124 : vector<8x128xf32>
    %126 = vector.extract_strided_slice %119 {offsets = [0, 128], sizes = [8, 128], strides = [1, 1]} : vector<8x512xf32> to vector<8x128xf32>
    %127 = arith.negf %126 : vector<8x128xf32>
    %128 = math.exp %127 : vector<8x128xf32>
    %cst_58 = arith.constant 1.000000e+00 : f32
    %129 = vector.broadcast %cst_58 : f32 to vector<8x128xf32>
    %130 = arith.addf %129, %128 : vector<8x128xf32>
    %131 = arith.divf %129, %130 : vector<8x128xf32>
    %132 = vector.extract_strided_slice %119 {offsets = [0, 256], sizes = [8, 128], strides = [1, 1]} : vector<8x512xf32> to vector<8x128xf32>
    %133 = math.tanh %132 : vector<8x128xf32>
    %134 = vector.extract_strided_slice %119 {offsets = [0, 384], sizes = [8, 128], strides = [1, 1]} : vector<8x512xf32> to vector<8x128xf32>
    %135 = arith.negf %134 : vector<8x128xf32>
    %136 = math.exp %135 : vector<8x128xf32>
    %cst_59 = arith.constant 1.000000e+00 : f32
    %137 = vector.broadcast %cst_59 : f32 to vector<8x128xf32>
    %138 = arith.addf %137, %136 : vector<8x128xf32>
    %139 = arith.divf %137, %138 : vector<8x128xf32>
    %140 = arith.mulf %131, %114 : vector<8x128xf32>
    %141 = arith.mulf %125, %133 : vector<8x128xf32>
    %142 = arith.addf %140, %141 : vector<8x128xf32>
    %143 = math.tanh %142 : vector<8x128xf32>
    %144 = arith.mulf %139, %143 : vector<8x128xf32>
    %c0_60 = arith.constant 0 : index
    %c0_61 = arith.constant 0 : index
    %145 = vector.load %arg13[%c0_60, %c0_61] : memref<8x128xf32, #tpu.memory_space<vmem>>, vector<8x128xf32>
    tpu.vector_store %arg13[%c0_60, %c0_61], %144 {strides = array<i32>} : memref<8x128xf32, #tpu.memory_space<vmem>>, vector<8x128xf32>,
    %c0_62 = arith.constant 0 : index
    %c0_63 = arith.constant 0 : index
    %146 = vector.load %arg14[%c0_62, %c0_63] : memref<8x128xf32, #tpu.memory_space<vmem>>, vector<8x128xf32>
    tpu.vector_store %arg14[%c0_62, %c0_63], %142 {strides = array<i32>} : memref<8x128xf32, #tpu.memory_space<vmem>>, vector<8x128xf32>,
    %147 = arith.index_cast %c1_i32 : i32 to index
    %c0_64 = arith.constant 0 : index
    %c0_65 = arith.constant 0 : index
    %148 = vector.load %arg6[%147, %c0_64, %c0_65] : memref<8x8x128xf32, #tpu.memory_space<vmem>>, vector<1x8x128xf32>
    %149 = vector.shape_cast %148 : vector<1x8x128xf32> to vector<8x128xf32>
    %150 = vector.shape_cast %144 : vector<8x128xf32> to vector<1x8x128xf32>
    tpu.vector_store %arg6[%147, %c0_64, %c0_65], %150 {strides = array<i32>} : memref<8x8x128xf32, #tpu.memory_space<vmem>>, vector<1x8x128xf32>,
    %c2_i32 = arith.constant 2 : i32
    %c0_66 = arith.constant 0 : index
    %c0_67 = arith.constant 0 : index
    %151 = vector.load %arg11[%c0_66, %c0_67] : memref<8x128xf32, #tpu.memory_space<vmem>>, vector<8x128xf32>
    %c0_68 = arith.constant 0 : index
    %c0_69 = arith.constant 0 : index
    %152 = vector.load %arg12[%c0_68, %c0_69] : memref<8x128xf32, #tpu.memory_space<vmem>>, vector<8x128xf32>
    %153 = arith.index_cast %c2_i32 : i32 to index
    %c0_70 = arith.constant 0 : index
    %c0_71 = arith.constant 0 : index
    %154 = vector.load %arg1[%153, %c0_70, %c0_71] : memref<8x8x512xf32, #tpu.memory_space<vmem>>, vector<1x8x512xf32>
    %155 = vector.shape_cast %154 : vector<1x8x512xf32> to vector<8x512xf32>
    %cst_72 = arith.constant dense<0.000000e+00> : vector<8x512xf32>
    %156 = tpu.matmul %151, %3, %cst_72 {dimension_numbers = #tpu.dot_dimension_numbers<[1], [0], [0], [1], [0, 0, 1, 1], [], []>} : vector<8x128xf32>, vector<128x512xf32>, vector<8x512xf32> -> vector<8x512xf32>
    %157 = arith.addf %155, %156 : vector<8x512xf32>
    %158 = vector.extract_strided_slice %157 {offsets = [0, 0], sizes = [8, 128], strides = [1, 1]} : vector<8x512xf32> to vector<8x128xf32>
    %159 = arith.negf %158 : vector<8x128xf32>
    %160 = math.exp %159 : vector<8x128xf32>
    %cst_73 = arith.constant 1.000000e+00 : f32
    %161 = vector.broadcast %cst_73 : f32 to vector<8x128xf32>
    %162 = arith.addf %161, %160 : vector<8x128xf32>
    %163 = arith.divf %161, %162 : vector<8x128xf32>
    %164 = vector.extract_strided_slice %157 {offsets = [0, 128], sizes = [8, 128], strides = [1, 1]} : vector<8x512xf32> to vector<8x128xf32>
    %165 = arith.negf %164 : vector<8x128xf32>
    %166 = math.exp %165 : vector<8x128xf32>
    %cst_74 = arith.constant 1.000000e+00 : f32
    %167 = vector.broadcast %cst_74 : f32 to vector<8x128xf32>
    %168 = arith.addf %167, %166 : vector<8x128xf32>
    %169 = arith.divf %167, %168 : vector<8x128xf32>
    %170 = vector.extract_strided_slice %157 {offsets = [0, 256], sizes = [8, 128], strides = [1, 1]} : vector<8x512xf32> to vector<8x128xf32>
    %171 = math.tanh %170 : vector<8x128xf32>
    %172 = vector.extract_strided_slice %157 {offsets = [0, 384], sizes = [8, 128], strides = [1, 1]} : vector<8x512xf32> to vector<8x128xf32>
    %173 = arith.negf %172 : vector<8x128xf32>
    %174 = math.exp %173 : vector<8x128xf32>
    %cst_75 = arith.constant 1.000000e+00 : f32
    %175 = vector.broadcast %cst_75 : f32 to vector<8x128xf32>
    %176 = arith.addf %175, %174 : vector<8x128xf32>
    %177 = arith.divf %175, %176 : vector<8x128xf32>
    %178 = arith.mulf %169, %152 : vector<8x128xf32>
    %179 = arith.mulf %163, %171 : vector<8x128xf32>
    %180 = arith.addf %178, %179 : vector<8x128xf32>
    %181 = math.tanh %180 : vector<8x128xf32>
    %182 = arith.mulf %177, %181 : vector<8x128xf32>
    %c0_76 = arith.constant 0 : index
    %c0_77 = arith.constant 0 : index
    %183 = vector.load %arg11[%c0_76, %c0_77] : memref<8x128xf32, #tpu.memory_space<vmem>>, vector<8x128xf32>
    tpu.vector_store %arg11[%c0_76, %c0_77], %182 {strides = array<i32>} : memref<8x128xf32, #tpu.memory_space<vmem>>, vector<8x128xf32>,
    %c0_78 = arith.constant 0 : index
    %c0_79 = arith.constant 0 : index
    %184 = vector.load %arg12[%c0_78, %c0_79] : memref<8x128xf32, #tpu.memory_space<vmem>>, vector<8x128xf32>
    tpu.vector_store %arg12[%c0_78, %c0_79], %180 {strides = array<i32>} : memref<8x128xf32, #tpu.memory_space<vmem>>, vector<8x128xf32>,
    %c0_80 = arith.constant 0 : index
    %c0_81 = arith.constant 0 : index
    %185 = vector.load %arg13[%c0_80, %c0_81] : memref<8x128xf32, #tpu.memory_space<vmem>>, vector<8x128xf32>
    %c0_82 = arith.constant 0 : index
    %c0_83 = arith.constant 0 : index
    %186 = vector.load %arg14[%c0_82, %c0_83] : memref<8x128xf32, #tpu.memory_space<vmem>>, vector<8x128xf32>
    %cst_84 = arith.constant dense<0.000000e+00> : vector<8x512xf32>
    %187 = tpu.matmul %182, %4, %cst_84 {dimension_numbers = #tpu.dot_dimension_numbers<[1], [0], [0], [1], [0, 0, 1, 1], [], []>} : vector<8x128xf32>, vector<128x512xf32>, vector<8x512xf32> -> vector<8x512xf32>
    %188 = vector.broadcast %6 : vector<1x512xf32> to vector<8x512xf32>
    %189 = arith.addf %188, %187 : vector<8x512xf32>
    %cst_85 = arith.constant dense<0.000000e+00> : vector<8x512xf32>
    %190 = tpu.matmul %185, %5, %cst_85 {dimension_numbers = #tpu.dot_dimension_numbers<[1], [0], [0], [1], [0, 0, 1, 1], [], []>} : vector<8x128xf32>, vector<128x512xf32>, vector<8x512xf32> -> vector<8x512xf32>
    %191 = arith.addf %189, %190 : vector<8x512xf32>
    %192 = vector.extract_strided_slice %191 {offsets = [0, 0], sizes = [8, 128], strides = [1, 1]} : vector<8x512xf32> to vector<8x128xf32>
    %193 = arith.negf %192 : vector<8x128xf32>
    %194 = math.exp %193 : vector<8x128xf32>
    %cst_86 = arith.constant 1.000000e+00 : f32
    %195 = vector.broadcast %cst_86 : f32 to vector<8x128xf32>
    %196 = arith.addf %195, %194 : vector<8x128xf32>
    %197 = arith.divf %195, %196 : vector<8x128xf32>
    %198 = vector.extract_strided_slice %191 {offsets = [0, 128], sizes = [8, 128], strides = [1, 1]} : vector<8x512xf32> to vector<8x128xf32>
    %199 = arith.negf %198 : vector<8x128xf32>
    %200 = math.exp %199 : vector<8x128xf32>
    %cst_87 = arith.constant 1.000000e+00 : f32
    %201 = vector.broadcast %cst_87 : f32 to vector<8x128xf32>
    %202 = arith.addf %201, %200 : vector<8x128xf32>
    %203 = arith.divf %201, %202 : vector<8x128xf32>
    %204 = vector.extract_strided_slice %191 {offsets = [0, 256], sizes = [8, 128], strides = [1, 1]} : vector<8x512xf32> to vector<8x128xf32>
    %205 = math.tanh %204 : vector<8x128xf32>
    %206 = vector.extract_strided_slice %191 {offsets = [0, 384], sizes = [8, 128], strides = [1, 1]} : vector<8x512xf32> to vector<8x128xf32>
    %207 = arith.negf %206 : vector<8x128xf32>
    %208 = math.exp %207 : vector<8x128xf32>
    %cst_88 = arith.constant 1.000000e+00 : f32
    %209 = vector.broadcast %cst_88 : f32 to vector<8x128xf32>
    %210 = arith.addf %209, %208 : vector<8x128xf32>
    %211 = arith.divf %209, %210 : vector<8x128xf32>
    %212 = arith.mulf %203, %186 : vector<8x128xf32>
    %213 = arith.mulf %197, %205 : vector<8x128xf32>
    %214 = arith.addf %212, %213 : vector<8x128xf32>
    %215 = math.tanh %214 : vector<8x128xf32>
    %216 = arith.mulf %211, %215 : vector<8x128xf32>
    %c0_89 = arith.constant 0 : index
    %c0_90 = arith.constant 0 : index
    %217 = vector.load %arg13[%c0_89, %c0_90] : memref<8x128xf32, #tpu.memory_space<vmem>>, vector<8x128xf32>
    tpu.vector_store %arg13[%c0_89, %c0_90], %216 {strides = array<i32>} : memref<8x128xf32, #tpu.memory_space<vmem>>, vector<8x128xf32>,
    %c0_91 = arith.constant 0 : index
    %c0_92 = arith.constant 0 : index
    %218 = vector.load %arg14[%c0_91, %c0_92] : memref<8x128xf32, #tpu.memory_space<vmem>>, vector<8x128xf32>
    tpu.vector_store %arg14[%c0_91, %c0_92], %214 {strides = array<i32>} : memref<8x128xf32, #tpu.memory_space<vmem>>, vector<8x128xf32>,
    %219 = arith.index_cast %c2_i32 : i32 to index
    %c0_93 = arith.constant 0 : index
    %c0_94 = arith.constant 0 : index
    %220 = vector.load %arg6[%219, %c0_93, %c0_94] : memref<8x8x128xf32, #tpu.memory_space<vmem>>, vector<1x8x128xf32>
    %221 = vector.shape_cast %220 : vector<1x8x128xf32> to vector<8x128xf32>
    %222 = vector.shape_cast %216 : vector<8x128xf32> to vector<1x8x128xf32>
    tpu.vector_store %arg6[%219, %c0_93, %c0_94], %222 {strides = array<i32>} : memref<8x8x128xf32, #tpu.memory_space<vmem>>, vector<1x8x128xf32>,
    %c3_i32 = arith.constant 3 : i32
    %c0_95 = arith.constant 0 : index
    %c0_96 = arith.constant 0 : index
    %223 = vector.load %arg11[%c0_95, %c0_96] : memref<8x128xf32, #tpu.memory_space<vmem>>, vector<8x128xf32>
    %c0_97 = arith.constant 0 : index
    %c0_98 = arith.constant 0 : index
    %224 = vector.load %arg12[%c0_97, %c0_98] : memref<8x128xf32, #tpu.memory_space<vmem>>, vector<8x128xf32>
    %225 = arith.index_cast %c3_i32 : i32 to index
    %c0_99 = arith.constant 0 : index
    %c0_100 = arith.constant 0 : index
    %226 = vector.load %arg1[%225, %c0_99, %c0_100] : memref<8x8x512xf32, #tpu.memory_space<vmem>>, vector<1x8x512xf32>
    %227 = vector.shape_cast %226 : vector<1x8x512xf32> to vector<8x512xf32>
    %cst_101 = arith.constant dense<0.000000e+00> : vector<8x512xf32>
    %228 = tpu.matmul %223, %3, %cst_101 {dimension_numbers = #tpu.dot_dimension_numbers<[1], [0], [0], [1], [0, 0, 1, 1], [], []>} : vector<8x128xf32>, vector<128x512xf32>, vector<8x512xf32> -> vector<8x512xf32>
    %229 = arith.addf %227, %228 : vector<8x512xf32>
    %230 = vector.extract_strided_slice %229 {offsets = [0, 0], sizes = [8, 128], strides = [1, 1]} : vector<8x512xf32> to vector<8x128xf32>
    %231 = arith.negf %230 : vector<8x128xf32>
    %232 = math.exp %231 : vector<8x128xf32>
    %cst_102 = arith.constant 1.000000e+00 : f32
    %233 = vector.broadcast %cst_102 : f32 to vector<8x128xf32>
    %234 = arith.addf %233, %232 : vector<8x128xf32>
    %235 = arith.divf %233, %234 : vector<8x128xf32>
    %236 = vector.extract_strided_slice %229 {offsets = [0, 128], sizes = [8, 128], strides = [1, 1]} : vector<8x512xf32> to vector<8x128xf32>
    %237 = arith.negf %236 : vector<8x128xf32>
    %238 = math.exp %237 : vector<8x128xf32>
    %cst_103 = arith.constant 1.000000e+00 : f32
    %239 = vector.broadcast %cst_103 : f32 to vector<8x128xf32>
    %240 = arith.addf %239, %238 : vector<8x128xf32>
    %241 = arith.divf %239, %240 : vector<8x128xf32>
    %242 = vector.extract_strided_slice %229 {offsets = [0, 256], sizes = [8, 128], strides = [1, 1]} : vector<8x512xf32> to vector<8x128xf32>
    %243 = math.tanh %242 : vector<8x128xf32>
    %244 = vector.extract_strided_slice %229 {offsets = [0, 384], sizes = [8, 128], strides = [1, 1]} : vector<8x512xf32> to vector<8x128xf32>
    %245 = arith.negf %244 : vector<8x128xf32>
    %246 = math.exp %245 : vector<8x128xf32>
    %cst_104 = arith.constant 1.000000e+00 : f32
    %247 = vector.broadcast %cst_104 : f32 to vector<8x128xf32>
    %248 = arith.addf %247, %246 : vector<8x128xf32>
    %249 = arith.divf %247, %248 : vector<8x128xf32>
    %250 = arith.mulf %241, %224 : vector<8x128xf32>
    %251 = arith.mulf %235, %243 : vector<8x128xf32>
    %252 = arith.addf %250, %251 : vector<8x128xf32>
    %253 = math.tanh %252 : vector<8x128xf32>
    %254 = arith.mulf %249, %253 : vector<8x128xf32>
    %c0_105 = arith.constant 0 : index
    %c0_106 = arith.constant 0 : index
    %255 = vector.load %arg11[%c0_105, %c0_106] : memref<8x128xf32, #tpu.memory_space<vmem>>, vector<8x128xf32>
    tpu.vector_store %arg11[%c0_105, %c0_106], %254 {strides = array<i32>} : memref<8x128xf32, #tpu.memory_space<vmem>>, vector<8x128xf32>,
    %c0_107 = arith.constant 0 : index
    %c0_108 = arith.constant 0 : index
    %256 = vector.load %arg12[%c0_107, %c0_108] : memref<8x128xf32, #tpu.memory_space<vmem>>, vector<8x128xf32>
    tpu.vector_store %arg12[%c0_107, %c0_108], %252 {strides = array<i32>} : memref<8x128xf32, #tpu.memory_space<vmem>>, vector<8x128xf32>,
    %c0_109 = arith.constant 0 : index
    %c0_110 = arith.constant 0 : index
    %257 = vector.load %arg13[%c0_109, %c0_110] : memref<8x128xf32, #tpu.memory_space<vmem>>, vector<8x128xf32>
    %c0_111 = arith.constant 0 : index
    %c0_112 = arith.constant 0 : index
    %258 = vector.load %arg14[%c0_111, %c0_112] : memref<8x128xf32, #tpu.memory_space<vmem>>, vector<8x128xf32>
    %cst_113 = arith.constant dense<0.000000e+00> : vector<8x512xf32>
    %259 = tpu.matmul %254, %4, %cst_113 {dimension_numbers = #tpu.dot_dimension_numbers<[1], [0], [0], [1], [0, 0, 1, 1], [], []>} : vector<8x128xf32>, vector<128x512xf32>, vector<8x512xf32> -> vector<8x512xf32>
    %260 = vector.broadcast %6 : vector<1x512xf32> to vector<8x512xf32>
    %261 = arith.addf %260, %259 : vector<8x512xf32>
    %cst_114 = arith.constant dense<0.000000e+00> : vector<8x512xf32>
    %262 = tpu.matmul %257, %5, %cst_114 {dimension_numbers = #tpu.dot_dimension_numbers<[1], [0], [0], [1], [0, 0, 1, 1], [], []>} : vector<8x128xf32>, vector<128x512xf32>, vector<8x512xf32> -> vector<8x512xf32>
    %263 = arith.addf %261, %262 : vector<8x512xf32>
    %264 = vector.extract_strided_slice %263 {offsets = [0, 0], sizes = [8, 128], strides = [1, 1]} : vector<8x512xf32> to vector<8x128xf32>
    %265 = arith.negf %264 : vector<8x128xf32>
    %266 = math.exp %265 : vector<8x128xf32>
    %cst_115 = arith.constant 1.000000e+00 : f32
    %267 = vector.broadcast %cst_115 : f32 to vector<8x128xf32>
    %268 = arith.addf %267, %266 : vector<8x128xf32>
    %269 = arith.divf %267, %268 : vector<8x128xf32>
    %270 = vector.extract_strided_slice %263 {offsets = [0, 128], sizes = [8, 128], strides = [1, 1]} : vector<8x512xf32> to vector<8x128xf32>
    %271 = arith.negf %270 : vector<8x128xf32>
    %272 = math.exp %271 : vector<8x128xf32>
    %cst_116 = arith.constant 1.000000e+00 : f32
    %273 = vector.broadcast %cst_116 : f32 to vector<8x128xf32>
    %274 = arith.addf %273, %272 : vector<8x128xf32>
    %275 = arith.divf %273, %274 : vector<8x128xf32>
    %276 = vector.extract_strided_slice %263 {offsets = [0, 256], sizes = [8, 128], strides = [1, 1]} : vector<8x512xf32> to vector<8x128xf32>
    %277 = math.tanh %276 : vector<8x128xf32>
    %278 = vector.extract_strided_slice %263 {offsets = [0, 384], sizes = [8, 128], strides = [1, 1]} : vector<8x512xf32> to vector<8x128xf32>
    %279 = arith.negf %278 : vector<8x128xf32>
    %280 = math.exp %279 : vector<8x128xf32>
    %cst_117 = arith.constant 1.000000e+00 : f32
    %281 = vector.broadcast %cst_117 : f32 to vector<8x128xf32>
    %282 = arith.addf %281, %280 : vector<8x128xf32>
    %283 = arith.divf %281, %282 : vector<8x128xf32>
    %284 = arith.mulf %275, %258 : vector<8x128xf32>
    %285 = arith.mulf %269, %277 : vector<8x128xf32>
    %286 = arith.addf %284, %285 : vector<8x128xf32>
    %287 = math.tanh %286 : vector<8x128xf32>
    %288 = arith.mulf %283, %287 : vector<8x128xf32>
    %c0_118 = arith.constant 0 : index
    %c0_119 = arith.constant 0 : index
    %289 = vector.load %arg13[%c0_118, %c0_119] : memref<8x128xf32, #tpu.memory_space<vmem>>, vector<8x128xf32>
    tpu.vector_store %arg13[%c0_118, %c0_119], %288 {strides = array<i32>} : memref<8x128xf32, #tpu.memory_space<vmem>>, vector<8x128xf32>,
    %c0_120 = arith.constant 0 : index
    %c0_121 = arith.constant 0 : index
    %290 = vector.load %arg14[%c0_120, %c0_121] : memref<8x128xf32, #tpu.memory_space<vmem>>, vector<8x128xf32>
    tpu.vector_store %arg14[%c0_120, %c0_121], %286 {strides = array<i32>} : memref<8x128xf32, #tpu.memory_space<vmem>>, vector<8x128xf32>,
    %291 = arith.index_cast %c3_i32 : i32 to index
    %c0_122 = arith.constant 0 : index
    %c0_123 = arith.constant 0 : index
    %292 = vector.load %arg6[%291, %c0_122, %c0_123] : memref<8x8x128xf32, #tpu.memory_space<vmem>>, vector<1x8x128xf32>
    %293 = vector.shape_cast %292 : vector<1x8x128xf32> to vector<8x128xf32>
    %294 = vector.shape_cast %288 : vector<8x128xf32> to vector<1x8x128xf32>
    tpu.vector_store %arg6[%291, %c0_122, %c0_123], %294 {strides = array<i32>} : memref<8x8x128xf32, #tpu.memory_space<vmem>>, vector<1x8x128xf32>,
    %c4_i32 = arith.constant 4 : i32
    %c0_124 = arith.constant 0 : index
    %c0_125 = arith.constant 0 : index
    %295 = vector.load %arg11[%c0_124, %c0_125] : memref<8x128xf32, #tpu.memory_space<vmem>>, vector<8x128xf32>
    %c0_126 = arith.constant 0 : index
    %c0_127 = arith.constant 0 : index
    %296 = vector.load %arg12[%c0_126, %c0_127] : memref<8x128xf32, #tpu.memory_space<vmem>>, vector<8x128xf32>
    %297 = arith.index_cast %c4_i32 : i32 to index
    %c0_128 = arith.constant 0 : index
    %c0_129 = arith.constant 0 : index
    %298 = vector.load %arg1[%297, %c0_128, %c0_129] : memref<8x8x512xf32, #tpu.memory_space<vmem>>, vector<1x8x512xf32>
    %299 = vector.shape_cast %298 : vector<1x8x512xf32> to vector<8x512xf32>
    %cst_130 = arith.constant dense<0.000000e+00> : vector<8x512xf32>
    %300 = tpu.matmul %295, %3, %cst_130 {dimension_numbers = #tpu.dot_dimension_numbers<[1], [0], [0], [1], [0, 0, 1, 1], [], []>} : vector<8x128xf32>, vector<128x512xf32>, vector<8x512xf32> -> vector<8x512xf32>
    %301 = arith.addf %299, %300 : vector<8x512xf32>
    %302 = vector.extract_strided_slice %301 {offsets = [0, 0], sizes = [8, 128], strides = [1, 1]} : vector<8x512xf32> to vector<8x128xf32>
    %303 = arith.negf %302 : vector<8x128xf32>
    %304 = math.exp %303 : vector<8x128xf32>
    %cst_131 = arith.constant 1.000000e+00 : f32
    %305 = vector.broadcast %cst_131 : f32 to vector<8x128xf32>
    %306 = arith.addf %305, %304 : vector<8x128xf32>
    %307 = arith.divf %305, %306 : vector<8x128xf32>
    %308 = vector.extract_strided_slice %301 {offsets = [0, 128], sizes = [8, 128], strides = [1, 1]} : vector<8x512xf32> to vector<8x128xf32>
    %309 = arith.negf %308 : vector<8x128xf32>
    %310 = math.exp %309 : vector<8x128xf32>
    %cst_132 = arith.constant 1.000000e+00 : f32
    %311 = vector.broadcast %cst_132 : f32 to vector<8x128xf32>
    %312 = arith.addf %311, %310 : vector<8x128xf32>
    %313 = arith.divf %311, %312 : vector<8x128xf32>
    %314 = vector.extract_strided_slice %301 {offsets = [0, 256], sizes = [8, 128], strides = [1, 1]} : vector<8x512xf32> to vector<8x128xf32>
    %315 = math.tanh %314 : vector<8x128xf32>
    %316 = vector.extract_strided_slice %301 {offsets = [0, 384], sizes = [8, 128], strides = [1, 1]} : vector<8x512xf32> to vector<8x128xf32>
    %317 = arith.negf %316 : vector<8x128xf32>
    %318 = math.exp %317 : vector<8x128xf32>
    %cst_133 = arith.constant 1.000000e+00 : f32
    %319 = vector.broadcast %cst_133 : f32 to vector<8x128xf32>
    %320 = arith.addf %319, %318 : vector<8x128xf32>
    %321 = arith.divf %319, %320 : vector<8x128xf32>
    %322 = arith.mulf %313, %296 : vector<8x128xf32>
    %323 = arith.mulf %307, %315 : vector<8x128xf32>
    %324 = arith.addf %322, %323 : vector<8x128xf32>
    %325 = math.tanh %324 : vector<8x128xf32>
    %326 = arith.mulf %321, %325 : vector<8x128xf32>
    %c0_134 = arith.constant 0 : index
    %c0_135 = arith.constant 0 : index
    %327 = vector.load %arg11[%c0_134, %c0_135] : memref<8x128xf32, #tpu.memory_space<vmem>>, vector<8x128xf32>
    tpu.vector_store %arg11[%c0_134, %c0_135], %326 {strides = array<i32>} : memref<8x128xf32, #tpu.memory_space<vmem>>, vector<8x128xf32>,
    %c0_136 = arith.constant 0 : index
    %c0_137 = arith.constant 0 : index
    %328 = vector.load %arg12[%c0_136, %c0_137] : memref<8x128xf32, #tpu.memory_space<vmem>>, vector<8x128xf32>
    tpu.vector_store %arg12[%c0_136, %c0_137], %324 {strides = array<i32>} : memref<8x128xf32, #tpu.memory_space<vmem>>, vector<8x128xf32>,
    %c0_138 = arith.constant 0 : index
    %c0_139 = arith.constant 0 : index
    %329 = vector.load %arg13[%c0_138, %c0_139] : memref<8x128xf32, #tpu.memory_space<vmem>>, vector<8x128xf32>
    %c0_140 = arith.constant 0 : index
    %c0_141 = arith.constant 0 : index
    %330 = vector.load %arg14[%c0_140, %c0_141] : memref<8x128xf32, #tpu.memory_space<vmem>>, vector<8x128xf32>
    %cst_142 = arith.constant dense<0.000000e+00> : vector<8x512xf32>
    %331 = tpu.matmul %326, %4, %cst_142 {dimension_numbers = #tpu.dot_dimension_numbers<[1], [0], [0], [1], [0, 0, 1, 1], [], []>} : vector<8x128xf32>, vector<128x512xf32>, vector<8x512xf32> -> vector<8x512xf32>
    %332 = vector.broadcast %6 : vector<1x512xf32> to vector<8x512xf32>
    %333 = arith.addf %332, %331 : vector<8x512xf32>
    %cst_143 = arith.constant dense<0.000000e+00> : vector<8x512xf32>
    %334 = tpu.matmul %329, %5, %cst_143 {dimension_numbers = #tpu.dot_dimension_numbers<[1], [0], [0], [1], [0, 0, 1, 1], [], []>} : vector<8x128xf32>, vector<128x512xf32>, vector<8x512xf32> -> vector<8x512xf32>
    %335 = arith.addf %333, %334 : vector<8x512xf32>
    %336 = vector.extract_strided_slice %335 {offsets = [0, 0], sizes = [8, 128], strides = [1, 1]} : vector<8x512xf32> to vector<8x128xf32>
    %337 = arith.negf %336 : vector<8x128xf32>
    %338 = math.exp %337 : vector<8x128xf32>
    %cst_144 = arith.constant 1.000000e+00 : f32
    %339 = vector.broadcast %cst_144 : f32 to vector<8x128xf32>
    %340 = arith.addf %339, %338 : vector<8x128xf32>
    %341 = arith.divf %339, %340 : vector<8x128xf32>
    %342 = vector.extract_strided_slice %335 {offsets = [0, 128], sizes = [8, 128], strides = [1, 1]} : vector<8x512xf32> to vector<8x128xf32>
    %343 = arith.negf %342 : vector<8x128xf32>
    %344 = math.exp %343 : vector<8x128xf32>
    %cst_145 = arith.constant 1.000000e+00 : f32
    %345 = vector.broadcast %cst_145 : f32 to vector<8x128xf32>
    %346 = arith.addf %345, %344 : vector<8x128xf32>
    %347 = arith.divf %345, %346 : vector<8x128xf32>
    %348 = vector.extract_strided_slice %335 {offsets = [0, 256], sizes = [8, 128], strides = [1, 1]} : vector<8x512xf32> to vector<8x128xf32>
    %349 = math.tanh %348 : vector<8x128xf32>
    %350 = vector.extract_strided_slice %335 {offsets = [0, 384], sizes = [8, 128], strides = [1, 1]} : vector<8x512xf32> to vector<8x128xf32>
    %351 = arith.negf %350 : vector<8x128xf32>
    %352 = math.exp %351 : vector<8x128xf32>
    %cst_146 = arith.constant 1.000000e+00 : f32
    %353 = vector.broadcast %cst_146 : f32 to vector<8x128xf32>
    %354 = arith.addf %353, %352 : vector<8x128xf32>
    %355 = arith.divf %353, %354 : vector<8x128xf32>
    %356 = arith.mulf %347, %330 : vector<8x128xf32>
    %357 = arith.mulf %341, %349 : vector<8x128xf32>
    %358 = arith.addf %356, %357 : vector<8x128xf32>
    %359 = math.tanh %358 : vector<8x128xf32>
    %360 = arith.mulf %355, %359 : vector<8x128xf32>
    %c0_147 = arith.constant 0 : index
    %c0_148 = arith.constant 0 : index
    %361 = vector.load %arg13[%c0_147, %c0_148] : memref<8x128xf32, #tpu.memory_space<vmem>>, vector<8x128xf32>
    tpu.vector_store %arg13[%c0_147, %c0_148], %360 {strides = array<i32>} : memref<8x128xf32, #tpu.memory_space<vmem>>, vector<8x128xf32>,
    %c0_149 = arith.constant 0 : index
    %c0_150 = arith.constant 0 : index
    %362 = vector.load %arg14[%c0_149, %c0_150] : memref<8x128xf32, #tpu.memory_space<vmem>>, vector<8x128xf32>
    tpu.vector_store %arg14[%c0_149, %c0_150], %358 {strides = array<i32>} : memref<8x128xf32, #tpu.memory_space<vmem>>, vector<8x128xf32>,
    %363 = arith.index_cast %c4_i32 : i32 to index
    %c0_151 = arith.constant 0 : index
    %c0_152 = arith.constant 0 : index
    %364 = vector.load %arg6[%363, %c0_151, %c0_152] : memref<8x8x128xf32, #tpu.memory_space<vmem>>, vector<1x8x128xf32>
    %365 = vector.shape_cast %364 : vector<1x8x128xf32> to vector<8x128xf32>
    %366 = vector.shape_cast %360 : vector<8x128xf32> to vector<1x8x128xf32>
    tpu.vector_store %arg6[%363, %c0_151, %c0_152], %366 {strides = array<i32>} : memref<8x8x128xf32, #tpu.memory_space<vmem>>, vector<1x8x128xf32>,
    %c5_i32 = arith.constant 5 : i32
    %c0_153 = arith.constant 0 : index
    %c0_154 = arith.constant 0 : index
    %367 = vector.load %arg11[%c0_153, %c0_154] : memref<8x128xf32, #tpu.memory_space<vmem>>, vector<8x128xf32>
    %c0_155 = arith.constant 0 : index
    %c0_156 = arith.constant 0 : index
    %368 = vector.load %arg12[%c0_155, %c0_156] : memref<8x128xf32, #tpu.memory_space<vmem>>, vector<8x128xf32>
    %369 = arith.index_cast %c5_i32 : i32 to index
    %c0_157 = arith.constant 0 : index
    %c0_158 = arith.constant 0 : index
    %370 = vector.load %arg1[%369, %c0_157, %c0_158] : memref<8x8x512xf32, #tpu.memory_space<vmem>>, vector<1x8x512xf32>
    %371 = vector.shape_cast %370 : vector<1x8x512xf32> to vector<8x512xf32>
    %cst_159 = arith.constant dense<0.000000e+00> : vector<8x512xf32>
    %372 = tpu.matmul %367, %3, %cst_159 {dimension_numbers = #tpu.dot_dimension_numbers<[1], [0], [0], [1], [0, 0, 1, 1], [], []>} : vector<8x128xf32>, vector<128x512xf32>, vector<8x512xf32> -> vector<8x512xf32>
    %373 = arith.addf %371, %372 : vector<8x512xf32>
    %374 = vector.extract_strided_slice %373 {offsets = [0, 0], sizes = [8, 128], strides = [1, 1]} : vector<8x512xf32> to vector<8x128xf32>
    %375 = arith.negf %374 : vector<8x128xf32>
    %376 = math.exp %375 : vector<8x128xf32>
    %cst_160 = arith.constant 1.000000e+00 : f32
    %377 = vector.broadcast %cst_160 : f32 to vector<8x128xf32>
    %378 = arith.addf %377, %376 : vector<8x128xf32>
    %379 = arith.divf %377, %378 : vector<8x128xf32>
    %380 = vector.extract_strided_slice %373 {offsets = [0, 128], sizes = [8, 128], strides = [1, 1]} : vector<8x512xf32> to vector<8x128xf32>
    %381 = arith.negf %380 : vector<8x128xf32>
    %382 = math.exp %381 : vector<8x128xf32>
    %cst_161 = arith.constant 1.000000e+00 : f32
    %383 = vector.broadcast %cst_161 : f32 to vector<8x128xf32>
    %384 = arith.addf %383, %382 : vector<8x128xf32>
    %385 = arith.divf %383, %384 : vector<8x128xf32>
    %386 = vector.extract_strided_slice %373 {offsets = [0, 256], sizes = [8, 128], strides = [1, 1]} : vector<8x512xf32> to vector<8x128xf32>
    %387 = math.tanh %386 : vector<8x128xf32>
    %388 = vector.extract_strided_slice %373 {offsets = [0, 384], sizes = [8, 128], strides = [1, 1]} : vector<8x512xf32> to vector<8x128xf32>
    %389 = arith.negf %388 : vector<8x128xf32>
    %390 = math.exp %389 : vector<8x128xf32>
    %cst_162 = arith.constant 1.000000e+00 : f32
    %391 = vector.broadcast %cst_162 : f32 to vector<8x128xf32>
    %392 = arith.addf %391, %390 : vector<8x128xf32>
    %393 = arith.divf %391, %392 : vector<8x128xf32>
    %394 = arith.mulf %385, %368 : vector<8x128xf32>
    %395 = arith.mulf %379, %387 : vector<8x128xf32>
    %396 = arith.addf %394, %395 : vector<8x128xf32>
    %397 = math.tanh %396 : vector<8x128xf32>
    %398 = arith.mulf %393, %397 : vector<8x128xf32>
    %c0_163 = arith.constant 0 : index
    %c0_164 = arith.constant 0 : index
    %399 = vector.load %arg11[%c0_163, %c0_164] : memref<8x128xf32, #tpu.memory_space<vmem>>, vector<8x128xf32>
    tpu.vector_store %arg11[%c0_163, %c0_164], %398 {strides = array<i32>} : memref<8x128xf32, #tpu.memory_space<vmem>>, vector<8x128xf32>,
    %c0_165 = arith.constant 0 : index
    %c0_166 = arith.constant 0 : index
    %400 = vector.load %arg12[%c0_165, %c0_166] : memref<8x128xf32, #tpu.memory_space<vmem>>, vector<8x128xf32>
    tpu.vector_store %arg12[%c0_165, %c0_166], %396 {strides = array<i32>} : memref<8x128xf32, #tpu.memory_space<vmem>>, vector<8x128xf32>,
    %c0_167 = arith.constant 0 : index
    %c0_168 = arith.constant 0 : index
    %401 = vector.load %arg13[%c0_167, %c0_168] : memref<8x128xf32, #tpu.memory_space<vmem>>, vector<8x128xf32>
    %c0_169 = arith.constant 0 : index
    %c0_170 = arith.constant 0 : index
    %402 = vector.load %arg14[%c0_169, %c0_170] : memref<8x128xf32, #tpu.memory_space<vmem>>, vector<8x128xf32>
    %cst_171 = arith.constant dense<0.000000e+00> : vector<8x512xf32>
    %403 = tpu.matmul %398, %4, %cst_171 {dimension_numbers = #tpu.dot_dimension_numbers<[1], [0], [0], [1], [0, 0, 1, 1], [], []>} : vector<8x128xf32>, vector<128x512xf32>, vector<8x512xf32> -> vector<8x512xf32>
    %404 = vector.broadcast %6 : vector<1x512xf32> to vector<8x512xf32>
    %405 = arith.addf %404, %403 : vector<8x512xf32>
    %cst_172 = arith.constant dense<0.000000e+00> : vector<8x512xf32>
    %406 = tpu.matmul %401, %5, %cst_172 {dimension_numbers = #tpu.dot_dimension_numbers<[1], [0], [0], [1], [0, 0, 1, 1], [], []>} : vector<8x128xf32>, vector<128x512xf32>, vector<8x512xf32> -> vector<8x512xf32>
    %407 = arith.addf %405, %406 : vector<8x512xf32>
    %408 = vector.extract_strided_slice %407 {offsets = [0, 0], sizes = [8, 128], strides = [1, 1]} : vector<8x512xf32> to vector<8x128xf32>
    %409 = arith.negf %408 : vector<8x128xf32>
    %410 = math.exp %409 : vector<8x128xf32>
    %cst_173 = arith.constant 1.000000e+00 : f32
    %411 = vector.broadcast %cst_173 : f32 to vector<8x128xf32>
    %412 = arith.addf %411, %410 : vector<8x128xf32>
    %413 = arith.divf %411, %412 : vector<8x128xf32>
    %414 = vector.extract_strided_slice %407 {offsets = [0, 128], sizes = [8, 128], strides = [1, 1]} : vector<8x512xf32> to vector<8x128xf32>
    %415 = arith.negf %414 : vector<8x128xf32>
    %416 = math.exp %415 : vector<8x128xf32>
    %cst_174 = arith.constant 1.000000e+00 : f32
    %417 = vector.broadcast %cst_174 : f32 to vector<8x128xf32>
    %418 = arith.addf %417, %416 : vector<8x128xf32>
    %419 = arith.divf %417, %418 : vector<8x128xf32>
    %420 = vector.extract_strided_slice %407 {offsets = [0, 256], sizes = [8, 128], strides = [1, 1]} : vector<8x512xf32> to vector<8x128xf32>
    %421 = math.tanh %420 : vector<8x128xf32>
    %422 = vector.extract_strided_slice %407 {offsets = [0, 384], sizes = [8, 128], strides = [1, 1]} : vector<8x512xf32> to vector<8x128xf32>
    %423 = arith.negf %422 : vector<8x128xf32>
    %424 = math.exp %423 : vector<8x128xf32>
    %cst_175 = arith.constant 1.000000e+00 : f32
    %425 = vector.broadcast %cst_175 : f32 to vector<8x128xf32>
    %426 = arith.addf %425, %424 : vector<8x128xf32>
    %427 = arith.divf %425, %426 : vector<8x128xf32>
    %428 = arith.mulf %419, %402 : vector<8x128xf32>
    %429 = arith.mulf %413, %421 : vector<8x128xf32>
    %430 = arith.addf %428, %429 : vector<8x128xf32>
    %431 = math.tanh %430 : vector<8x128xf32>
    %432 = arith.mulf %427, %431 : vector<8x128xf32>
    %c0_176 = arith.constant 0 : index
    %c0_177 = arith.constant 0 : index
    %433 = vector.load %arg13[%c0_176, %c0_177] : memref<8x128xf32, #tpu.memory_space<vmem>>, vector<8x128xf32>
    tpu.vector_store %arg13[%c0_176, %c0_177], %432 {strides = array<i32>} : memref<8x128xf32, #tpu.memory_space<vmem>>, vector<8x128xf32>,
    %c0_178 = arith.constant 0 : index
    %c0_179 = arith.constant 0 : index
    %434 = vector.load %arg14[%c0_178, %c0_179] : memref<8x128xf32, #tpu.memory_space<vmem>>, vector<8x128xf32>
    tpu.vector_store %arg14[%c0_178, %c0_179], %430 {strides = array<i32>} : memref<8x128xf32, #tpu.memory_space<vmem>>, vector<8x128xf32>,
    %435 = arith.index_cast %c5_i32 : i32 to index
    %c0_180 = arith.constant 0 : index
    %c0_181 = arith.constant 0 : index
    %436 = vector.load %arg6[%435, %c0_180, %c0_181] : memref<8x8x128xf32, #tpu.memory_space<vmem>>, vector<1x8x128xf32>
    %437 = vector.shape_cast %436 : vector<1x8x128xf32> to vector<8x128xf32>
    %438 = vector.shape_cast %432 : vector<8x128xf32> to vector<1x8x128xf32>
    tpu.vector_store %arg6[%435, %c0_180, %c0_181], %438 {strides = array<i32>} : memref<8x8x128xf32, #tpu.memory_space<vmem>>, vector<1x8x128xf32>,
    %c6_i32 = arith.constant 6 : i32
    %c0_182 = arith.constant 0 : index
    %c0_183 = arith.constant 0 : index
    %439 = vector.load %arg11[%c0_182, %c0_183] : memref<8x128xf32, #tpu.memory_space<vmem>>, vector<8x128xf32>
    %c0_184 = arith.constant 0 : index
    %c0_185 = arith.constant 0 : index
    %440 = vector.load %arg12[%c0_184, %c0_185] : memref<8x128xf32, #tpu.memory_space<vmem>>, vector<8x128xf32>
    %441 = arith.index_cast %c6_i32 : i32 to index
    %c0_186 = arith.constant 0 : index
    %c0_187 = arith.constant 0 : index
    %442 = vector.load %arg1[%441, %c0_186, %c0_187] : memref<8x8x512xf32, #tpu.memory_space<vmem>>, vector<1x8x512xf32>
    %443 = vector.shape_cast %442 : vector<1x8x512xf32> to vector<8x512xf32>
    %cst_188 = arith.constant dense<0.000000e+00> : vector<8x512xf32>
    %444 = tpu.matmul %439, %3, %cst_188 {dimension_numbers = #tpu.dot_dimension_numbers<[1], [0], [0], [1], [0, 0, 1, 1], [], []>} : vector<8x128xf32>, vector<128x512xf32>, vector<8x512xf32> -> vector<8x512xf32>
    %445 = arith.addf %443, %444 : vector<8x512xf32>
    %446 = vector.extract_strided_slice %445 {offsets = [0, 0], sizes = [8, 128], strides = [1, 1]} : vector<8x512xf32> to vector<8x128xf32>
    %447 = arith.negf %446 : vector<8x128xf32>
    %448 = math.exp %447 : vector<8x128xf32>
    %cst_189 = arith.constant 1.000000e+00 : f32
    %449 = vector.broadcast %cst_189 : f32 to vector<8x128xf32>
    %450 = arith.addf %449, %448 : vector<8x128xf32>
    %451 = arith.divf %449, %450 : vector<8x128xf32>
    %452 = vector.extract_strided_slice %445 {offsets = [0, 128], sizes = [8, 128], strides = [1, 1]} : vector<8x512xf32> to vector<8x128xf32>
    %453 = arith.negf %452 : vector<8x128xf32>
    %454 = math.exp %453 : vector<8x128xf32>
    %cst_190 = arith.constant 1.000000e+00 : f32
    %455 = vector.broadcast %cst_190 : f32 to vector<8x128xf32>
    %456 = arith.addf %455, %454 : vector<8x128xf32>
    %457 = arith.divf %455, %456 : vector<8x128xf32>
    %458 = vector.extract_strided_slice %445 {offsets = [0, 256], sizes = [8, 128], strides = [1, 1]} : vector<8x512xf32> to vector<8x128xf32>
    %459 = math.tanh %458 : vector<8x128xf32>
    %460 = vector.extract_strided_slice %445 {offsets = [0, 384], sizes = [8, 128], strides = [1, 1]} : vector<8x512xf32> to vector<8x128xf32>
    %461 = arith.negf %460 : vector<8x128xf32>
    %462 = math.exp %461 : vector<8x128xf32>
    %cst_191 = arith.constant 1.000000e+00 : f32
    %463 = vector.broadcast %cst_191 : f32 to vector<8x128xf32>
    %464 = arith.addf %463, %462 : vector<8x128xf32>
    %465 = arith.divf %463, %464 : vector<8x128xf32>
    %466 = arith.mulf %457, %440 : vector<8x128xf32>
    %467 = arith.mulf %451, %459 : vector<8x128xf32>
    %468 = arith.addf %466, %467 : vector<8x128xf32>
    %469 = math.tanh %468 : vector<8x128xf32>
    %470 = arith.mulf %465, %469 : vector<8x128xf32>
    %c0_192 = arith.constant 0 : index
    %c0_193 = arith.constant 0 : index
    %471 = vector.load %arg11[%c0_192, %c0_193] : memref<8x128xf32, #tpu.memory_space<vmem>>, vector<8x128xf32>
    tpu.vector_store %arg11[%c0_192, %c0_193], %470 {strides = array<i32>} : memref<8x128xf32, #tpu.memory_space<vmem>>, vector<8x128xf32>,
    %c0_194 = arith.constant 0 : index
    %c0_195 = arith.constant 0 : index
    %472 = vector.load %arg12[%c0_194, %c0_195] : memref<8x128xf32, #tpu.memory_space<vmem>>, vector<8x128xf32>
    tpu.vector_store %arg12[%c0_194, %c0_195], %468 {strides = array<i32>} : memref<8x128xf32, #tpu.memory_space<vmem>>, vector<8x128xf32>,
    %c0_196 = arith.constant 0 : index
    %c0_197 = arith.constant 0 : index
    %473 = vector.load %arg13[%c0_196, %c0_197] : memref<8x128xf32, #tpu.memory_space<vmem>>, vector<8x128xf32>
    %c0_198 = arith.constant 0 : index
    %c0_199 = arith.constant 0 : index
    %474 = vector.load %arg14[%c0_198, %c0_199] : memref<8x128xf32, #tpu.memory_space<vmem>>, vector<8x128xf32>
    %cst_200 = arith.constant dense<0.000000e+00> : vector<8x512xf32>
    %475 = tpu.matmul %470, %4, %cst_200 {dimension_numbers = #tpu.dot_dimension_numbers<[1], [0], [0], [1], [0, 0, 1, 1], [], []>} : vector<8x128xf32>, vector<128x512xf32>, vector<8x512xf32> -> vector<8x512xf32>
    %476 = vector.broadcast %6 : vector<1x512xf32> to vector<8x512xf32>
    %477 = arith.addf %476, %475 : vector<8x512xf32>
    %cst_201 = arith.constant dense<0.000000e+00> : vector<8x512xf32>
    %478 = tpu.matmul %473, %5, %cst_201 {dimension_numbers = #tpu.dot_dimension_numbers<[1], [0], [0], [1], [0, 0, 1, 1], [], []>} : vector<8x128xf32>, vector<128x512xf32>, vector<8x512xf32> -> vector<8x512xf32>
    %479 = arith.addf %477, %478 : vector<8x512xf32>
    %480 = vector.extract_strided_slice %479 {offsets = [0, 0], sizes = [8, 128], strides = [1, 1]} : vector<8x512xf32> to vector<8x128xf32>
    %481 = arith.negf %480 : vector<8x128xf32>
    %482 = math.exp %481 : vector<8x128xf32>
    %cst_202 = arith.constant 1.000000e+00 : f32
    %483 = vector.broadcast %cst_202 : f32 to vector<8x128xf32>
    %484 = arith.addf %483, %482 : vector<8x128xf32>
    %485 = arith.divf %483, %484 : vector<8x128xf32>
    %486 = vector.extract_strided_slice %479 {offsets = [0, 128], sizes = [8, 128], strides = [1, 1]} : vector<8x512xf32> to vector<8x128xf32>
    %487 = arith.negf %486 : vector<8x128xf32>
    %488 = math.exp %487 : vector<8x128xf32>
    %cst_203 = arith.constant 1.000000e+00 : f32
    %489 = vector.broadcast %cst_203 : f32 to vector<8x128xf32>
    %490 = arith.addf %489, %488 : vector<8x128xf32>
    %491 = arith.divf %489, %490 : vector<8x128xf32>
    %492 = vector.extract_strided_slice %479 {offsets = [0, 256], sizes = [8, 128], strides = [1, 1]} : vector<8x512xf32> to vector<8x128xf32>
    %493 = math.tanh %492 : vector<8x128xf32>
    %494 = vector.extract_strided_slice %479 {offsets = [0, 384], sizes = [8, 128], strides = [1, 1]} : vector<8x512xf32> to vector<8x128xf32>
    %495 = arith.negf %494 : vector<8x128xf32>
    %496 = math.exp %495 : vector<8x128xf32>
    %cst_204 = arith.constant 1.000000e+00 : f32
    %497 = vector.broadcast %cst_204 : f32 to vector<8x128xf32>
    %498 = arith.addf %497, %496 : vector<8x128xf32>
    %499 = arith.divf %497, %498 : vector<8x128xf32>
    %500 = arith.mulf %491, %474 : vector<8x128xf32>
    %501 = arith.mulf %485, %493 : vector<8x128xf32>
    %502 = arith.addf %500, %501 : vector<8x128xf32>
    %503 = math.tanh %502 : vector<8x128xf32>
    %504 = arith.mulf %499, %503 : vector<8x128xf32>
    %c0_205 = arith.constant 0 : index
    %c0_206 = arith.constant 0 : index
    %505 = vector.load %arg13[%c0_205, %c0_206] : memref<8x128xf32, #tpu.memory_space<vmem>>, vector<8x128xf32>
    tpu.vector_store %arg13[%c0_205, %c0_206], %504 {strides = array<i32>} : memref<8x128xf32, #tpu.memory_space<vmem>>, vector<8x128xf32>,
    %c0_207 = arith.constant 0 : index
    %c0_208 = arith.constant 0 : index
    %506 = vector.load %arg14[%c0_207, %c0_208] : memref<8x128xf32, #tpu.memory_space<vmem>>, vector<8x128xf32>
    tpu.vector_store %arg14[%c0_207, %c0_208], %502 {strides = array<i32>} : memref<8x128xf32, #tpu.memory_space<vmem>>, vector<8x128xf32>,
    %507 = arith.index_cast %c6_i32 : i32 to index
    %c0_209 = arith.constant 0 : index
    %c0_210 = arith.constant 0 : index
    %508 = vector.load %arg6[%507, %c0_209, %c0_210] : memref<8x8x128xf32, #tpu.memory_space<vmem>>, vector<1x8x128xf32>
    %509 = vector.shape_cast %508 : vector<1x8x128xf32> to vector<8x128xf32>
    %510 = vector.shape_cast %504 : vector<8x128xf32> to vector<1x8x128xf32>
    tpu.vector_store %arg6[%507, %c0_209, %c0_210], %510 {strides = array<i32>} : memref<8x8x128xf32, #tpu.memory_space<vmem>>, vector<1x8x128xf32>,
    %c7_i32 = arith.constant 7 : i32
    %c0_211 = arith.constant 0 : index
    %c0_212 = arith.constant 0 : index
    %511 = vector.load %arg11[%c0_211, %c0_212] : memref<8x128xf32, #tpu.memory_space<vmem>>, vector<8x128xf32>
    %c0_213 = arith.constant 0 : index
    %c0_214 = arith.constant 0 : index
    %512 = vector.load %arg12[%c0_213, %c0_214] : memref<8x128xf32, #tpu.memory_space<vmem>>, vector<8x128xf32>
    %513 = arith.index_cast %c7_i32 : i32 to index
    %c0_215 = arith.constant 0 : index
    %c0_216 = arith.constant 0 : index
    %514 = vector.load %arg1[%513, %c0_215, %c0_216] : memref<8x8x512xf32, #tpu.memory_space<vmem>>, vector<1x8x512xf32>
    %515 = vector.shape_cast %514 : vector<1x8x512xf32> to vector<8x512xf32>
    %cst_217 = arith.constant dense<0.000000e+00> : vector<8x512xf32>
    %516 = tpu.matmul %511, %3, %cst_217 {dimension_numbers = #tpu.dot_dimension_numbers<[1], [0], [0], [1], [0, 0, 1, 1], [], []>} : vector<8x128xf32>, vector<128x512xf32>, vector<8x512xf32> -> vector<8x512xf32>
    %517 = arith.addf %515, %516 : vector<8x512xf32>
    %518 = vector.extract_strided_slice %517 {offsets = [0, 0], sizes = [8, 128], strides = [1, 1]} : vector<8x512xf32> to vector<8x128xf32>
    %519 = arith.negf %518 : vector<8x128xf32>
    %520 = math.exp %519 : vector<8x128xf32>
    %cst_218 = arith.constant 1.000000e+00 : f32
    %521 = vector.broadcast %cst_218 : f32 to vector<8x128xf32>
    %522 = arith.addf %521, %520 : vector<8x128xf32>
    %523 = arith.divf %521, %522 : vector<8x128xf32>
    %524 = vector.extract_strided_slice %517 {offsets = [0, 128], sizes = [8, 128], strides = [1, 1]} : vector<8x512xf32> to vector<8x128xf32>
    %525 = arith.negf %524 : vector<8x128xf32>
    %526 = math.exp %525 : vector<8x128xf32>
    %cst_219 = arith.constant 1.000000e+00 : f32
    %527 = vector.broadcast %cst_219 : f32 to vector<8x128xf32>
    %528 = arith.addf %527, %526 : vector<8x128xf32>
    %529 = arith.divf %527, %528 : vector<8x128xf32>
    %530 = vector.extract_strided_slice %517 {offsets = [0, 256], sizes = [8, 128], strides = [1, 1]} : vector<8x512xf32> to vector<8x128xf32>
    %531 = math.tanh %530 : vector<8x128xf32>
    %532 = vector.extract_strided_slice %517 {offsets = [0, 384], sizes = [8, 128], strides = [1, 1]} : vector<8x512xf32> to vector<8x128xf32>
    %533 = arith.negf %532 : vector<8x128xf32>
    %534 = math.exp %533 : vector<8x128xf32>
    %cst_220 = arith.constant 1.000000e+00 : f32
    %535 = vector.broadcast %cst_220 : f32 to vector<8x128xf32>
    %536 = arith.addf %535, %534 : vector<8x128xf32>
    %537 = arith.divf %535, %536 : vector<8x128xf32>
    %538 = arith.mulf %529, %512 : vector<8x128xf32>
    %539 = arith.mulf %523, %531 : vector<8x128xf32>
    %540 = arith.addf %538, %539 : vector<8x128xf32>
    %541 = math.tanh %540 : vector<8x128xf32>
    %542 = arith.mulf %537, %541 : vector<8x128xf32>
    %c0_221 = arith.constant 0 : index
    %c0_222 = arith.constant 0 : index
    %543 = vector.load %arg11[%c0_221, %c0_222] : memref<8x128xf32, #tpu.memory_space<vmem>>, vector<8x128xf32>
    tpu.vector_store %arg11[%c0_221, %c0_222], %542 {strides = array<i32>} : memref<8x128xf32, #tpu.memory_space<vmem>>, vector<8x128xf32>,
    %c0_223 = arith.constant 0 : index
    %c0_224 = arith.constant 0 : index
    %544 = vector.load %arg12[%c0_223, %c0_224] : memref<8x128xf32, #tpu.memory_space<vmem>>, vector<8x128xf32>
    tpu.vector_store %arg12[%c0_223, %c0_224], %540 {strides = array<i32>} : memref<8x128xf32, #tpu.memory_space<vmem>>, vector<8x128xf32>,
    %c0_225 = arith.constant 0 : index
    %c0_226 = arith.constant 0 : index
    %545 = vector.load %arg13[%c0_225, %c0_226] : memref<8x128xf32, #tpu.memory_space<vmem>>, vector<8x128xf32>
    %c0_227 = arith.constant 0 : index
    %c0_228 = arith.constant 0 : index
    %546 = vector.load %arg14[%c0_227, %c0_228] : memref<8x128xf32, #tpu.memory_space<vmem>>, vector<8x128xf32>
    %cst_229 = arith.constant dense<0.000000e+00> : vector<8x512xf32>
    %547 = tpu.matmul %542, %4, %cst_229 {dimension_numbers = #tpu.dot_dimension_numbers<[1], [0], [0], [1], [0, 0, 1, 1], [], []>} : vector<8x128xf32>, vector<128x512xf32>, vector<8x512xf32> -> vector<8x512xf32>
    %548 = vector.broadcast %6 : vector<1x512xf32> to vector<8x512xf32>
    %549 = arith.addf %548, %547 : vector<8x512xf32>
    %cst_230 = arith.constant dense<0.000000e+00> : vector<8x512xf32>
    %550 = tpu.matmul %545, %5, %cst_230 {dimension_numbers = #tpu.dot_dimension_numbers<[1], [0], [0], [1], [0, 0, 1, 1], [], []>} : vector<8x128xf32>, vector<128x512xf32>, vector<8x512xf32> -> vector<8x512xf32>
    %551 = arith.addf %549, %550 : vector<8x512xf32>
    %552 = vector.extract_strided_slice %551 {offsets = [0, 0], sizes = [8, 128], strides = [1, 1]} : vector<8x512xf32> to vector<8x128xf32>
    %553 = arith.negf %552 : vector<8x128xf32>
    %554 = math.exp %553 : vector<8x128xf32>
    %cst_231 = arith.constant 1.000000e+00 : f32
    %555 = vector.broadcast %cst_231 : f32 to vector<8x128xf32>
    %556 = arith.addf %555, %554 : vector<8x128xf32>
    %557 = arith.divf %555, %556 : vector<8x128xf32>
    %558 = vector.extract_strided_slice %551 {offsets = [0, 128], sizes = [8, 128], strides = [1, 1]} : vector<8x512xf32> to vector<8x128xf32>
    %559 = arith.negf %558 : vector<8x128xf32>
    %560 = math.exp %559 : vector<8x128xf32>
    %cst_232 = arith.constant 1.000000e+00 : f32
    %561 = vector.broadcast %cst_232 : f32 to vector<8x128xf32>
    %562 = arith.addf %561, %560 : vector<8x128xf32>
    %563 = arith.divf %561, %562 : vector<8x128xf32>
    %564 = vector.extract_strided_slice %551 {offsets = [0, 256], sizes = [8, 128], strides = [1, 1]} : vector<8x512xf32> to vector<8x128xf32>
    %565 = math.tanh %564 : vector<8x128xf32>
    %566 = vector.extract_strided_slice %551 {offsets = [0, 384], sizes = [8, 128], strides = [1, 1]} : vector<8x512xf32> to vector<8x128xf32>
    %567 = arith.negf %566 : vector<8x128xf32>
    %568 = math.exp %567 : vector<8x128xf32>
    %cst_233 = arith.constant 1.000000e+00 : f32
    %569 = vector.broadcast %cst_233 : f32 to vector<8x128xf32>
    %570 = arith.addf %569, %568 : vector<8x128xf32>
    %571 = arith.divf %569, %570 : vector<8x128xf32>
    %572 = arith.mulf %563, %546 : vector<8x128xf32>
    %573 = arith.mulf %557, %565 : vector<8x128xf32>
    %574 = arith.addf %572, %573 : vector<8x128xf32>
    %575 = math.tanh %574 : vector<8x128xf32>
    %576 = arith.mulf %571, %575 : vector<8x128xf32>
    %c0_234 = arith.constant 0 : index
    %c0_235 = arith.constant 0 : index
    %577 = vector.load %arg13[%c0_234, %c0_235] : memref<8x128xf32, #tpu.memory_space<vmem>>, vector<8x128xf32>
    tpu.vector_store %arg13[%c0_234, %c0_235], %576 {strides = array<i32>} : memref<8x128xf32, #tpu.memory_space<vmem>>, vector<8x128xf32>,
    %c0_236 = arith.constant 0 : index
    %c0_237 = arith.constant 0 : index
    %578 = vector.load %arg14[%c0_236, %c0_237] : memref<8x128xf32, #tpu.memory_space<vmem>>, vector<8x128xf32>
    tpu.vector_store %arg14[%c0_236, %c0_237], %574 {strides = array<i32>} : memref<8x128xf32, #tpu.memory_space<vmem>>, vector<8x128xf32>,
    %579 = arith.index_cast %c7_i32 : i32 to index
    %c0_238 = arith.constant 0 : index
    %c0_239 = arith.constant 0 : index
    %580 = vector.load %arg6[%579, %c0_238, %c0_239] : memref<8x8x128xf32, #tpu.memory_space<vmem>>, vector<1x8x128xf32>
    %581 = vector.shape_cast %580 : vector<1x8x128xf32> to vector<8x128xf32>
    %582 = vector.shape_cast %576 : vector<8x128xf32> to vector<1x8x128xf32>
    tpu.vector_store %arg6[%579, %c0_238, %c0_239], %582 {strides = array<i32>} : memref<8x8x128xf32, #tpu.memory_space<vmem>>, vector<1x8x128xf32>,
    %c8_i32 = arith.constant 8 : i32
    %c0_i32_240 = arith.constant 0 : i32
    %583 = arith.cmpi eq, %arg0, %c0_i32_240 : i32
    %584 = arith.extui %583 : i1 to i32
    %c0_i32_241 = arith.constant 0 : i32
    %585 = arith.cmpi ne, %584, %c0_i32_241 : i32
    scf.if %585 {
      %c0_242 = arith.constant 0 : index
      %c0_243 = arith.constant 0 : index
      %586 = vector.load %arg11[%c0_242, %c0_243] : memref<8x128xf32, #tpu.memory_space<vmem>>, vector<8x128xf32>
      %c0_244 = arith.constant 0 : index
      %c0_245 = arith.constant 0 : index
      %587 = vector.load %arg7[%c0_244, %c0_245] : memref<8x128xf32, #tpu.memory_space<vmem>>, vector<8x128xf32>
      tpu.vector_store %arg7[%c0_244, %c0_245], %586 {strides = array<i32>} : memref<8x128xf32, #tpu.memory_space<vmem>>, vector<8x128xf32>,
      %c0_246 = arith.constant 0 : index
      %c0_247 = arith.constant 0 : index
      %588 = vector.load %arg12[%c0_246, %c0_247] : memref<8x128xf32, #tpu.memory_space<vmem>>, vector<8x128xf32>
      %c0_248 = arith.constant 0 : index
      %c0_249 = arith.constant 0 : index
      %589 = vector.load %arg8[%c0_248, %c0_249] : memref<8x128xf32, #tpu.memory_space<vmem>>, vector<8x128xf32>
      tpu.vector_store %arg8[%c0_248, %c0_249], %588 {strides = array<i32>} : memref<8x128xf32, #tpu.memory_space<vmem>>, vector<8x128xf32>,
      %c0_250 = arith.constant 0 : index
      %c0_251 = arith.constant 0 : index
      %590 = vector.load %arg13[%c0_250, %c0_251] : memref<8x128xf32, #tpu.memory_space<vmem>>, vector<8x128xf32>
      %c0_252 = arith.constant 0 : index
      %c0_253 = arith.constant 0 : index
      %591 = vector.load %arg9[%c0_252, %c0_253] : memref<8x128xf32, #tpu.memory_space<vmem>>, vector<8x128xf32>
      tpu.vector_store %arg9[%c0_252, %c0_253], %590 {strides = array<i32>} : memref<8x128xf32, #tpu.memory_space<vmem>>, vector<8x128xf32>,
      %c0_254 = arith.constant 0 : index
      %c0_255 = arith.constant 0 : index
      %592 = vector.load %arg14[%c0_254, %c0_255] : memref<8x128xf32, #tpu.memory_space<vmem>>, vector<8x128xf32>
      %c0_256 = arith.constant 0 : index
      %c0_257 = arith.constant 0 : index
      %593 = vector.load %arg10[%c0_256, %c0_257] : memref<8x128xf32, #tpu.memory_space<vmem>>, vector<8x128xf32>
      tpu.vector_store %arg10[%c0_256, %c0_257], %592 {strides = array<i32>} : memref<8x128xf32, #tpu.memory_space<vmem>>, vector<8x128xf32>,
    } else {
    }
    return
  }
  func.func @transform_0(%arg0: i32) -> (i32, i32, i32) {
    %c0_i32 = arith.constant 0 : i32
    %c0_i32_0 = arith.constant 0 : i32
    %c0_i32_1 = arith.constant 0 : i32
    return %arg0, %c0_i32, %c0_i32_0 : i32, i32, i32
  }
  func.func @transform_1(%arg0: i32) -> (i32, i32) {
    %c0_i32 = arith.constant 0 : i32
    %c0_i32_0 = arith.constant 0 : i32
    %c0_i32_1 = arith.constant 0 : i32
    return %c0_i32, %c0_i32_0 : i32, i32
  }
  func.func @transform_2(%arg0: i32) -> (i32, i32) {
    %c0_i32 = arith.constant 0 : i32
    %c0_i32_0 = arith.constant 0 : i32
    %c0_i32_1 = arith.constant 0 : i32
    return %c0_i32, %c0_i32_0 : i32, i32
  }
  func.func @transform_3(%arg0: i32) -> (i32, i32) {
    %c0_i32 = arith.constant 0 : i32
    %c0_i32_0 = arith.constant 0 : i32
    %c0_i32_1 = arith.constant 0 : i32
    return %c0_i32, %c0_i32_0 : i32, i32
  }
  func.func @transform_4(%arg0: i32) -> (i32, i32) {
    %c0_i32 = arith.constant 0 : i32
    %c0_i32_0 = arith.constant 0 : i32
    %c0_i32_1 = arith.constant 0 : i32
    return %c0_i32, %c0_i32_0 : i32, i32
  }
  func.func @transform_5(%arg0: i32) -> (i32, i32, i32) {
    %c0_i32 = arith.constant 0 : i32
    %c0_i32_0 = arith.constant 0 : i32
    %c0_i32_1 = arith.constant 0 : i32
    return %arg0, %c0_i32, %c0_i32_0 : i32, i32, i32
  }
  func.func @transform_6(%arg0: i32) -> (i32, i32) {
    %c0_i32 = arith.constant 0 : i32
    %c0_i32_0 = arith.constant 0 : i32
    %c0_i32_1 = arith.constant 0 : i32
    return %c0_i32, %c0_i32_0 : i32, i32
  }
  func.func @transform_7(%arg0: i32) -> (i32, i32) {
    %c0_i32 = arith.constant 0 : i32
    %c0_i32_0 = arith.constant 0 : i32
    %c0_i32_1 = arith.constant 0 : i32
    return %c0_i32, %c0_i32_0 : i32, i32
  }
  func.func @transform_8(%arg0: i32) -> (i32, i32) {
    %c0_i32 = arith.constant 0 : i32
    %c0_i32_0 = arith.constant 0 : i32
    %c0_i32_1 = arith.constant 0 : i32
    return %c0_i32, %c0_i32_0 : i32, i32
  }
  func.func @transform_9(%arg0: i32) -> (i32, i32) {
    %c0_i32 = arith.constant 0 : i32
    %c0_i32_0 = arith.constant 0 : i32
    %c0_i32_1 = arith.constant 0 : i32
    return %c0_i32, %c0_i32_0 : i32, i32
  }
}

</mosaic_0001>

<bundles_post_ra>
// kernel: rnn_lm_forward.5
= control target key start
LH: loop header
LB: loop body
LE: loop exit
PB: predicated region body
PF: predicated region fallthrough
CT: control target
= control target key end

     0   :  { %s338_s0 = inlined_call_operand.vmem [shape: f32[16,128], index: 0, kind: input, shape index: {}]   ;;  %s339_s1 = inlined_call_operand.vmem [shape: f32[128,128], index: 1, kind: input, shape index: {}]   ;;  %s340_s2 = inlined_call_operand.vmem [shape: f32[1,128], index: 2, kind: input, shape index: {}]   ;;  %s341_s3 = inlined_call_operand.hbm [shape: f32[16,128], index: 3, kind: output, shape index: {}]  }
   0x1   :  { %v17_v0 = vld [vmem:[%s339_s1] sm:$0xff]  ;;  %v18_v1 = vld [vmem:[%s339_s1 + $0x8] sm:$0xff]  ;;  %v19_v2 = vld [vmem:[%s339_s1 + $0x10] sm:$0xff] }
   0x2   :  { %v187_v3 = vpack.c.bf16 %v18_v1, %v17_v0  ;;  %v20_v4 = vld [vmem:[%s339_s1 + $0x18] sm:$0xff]  ;;  %v21_v6 = vld [vmem:[%s339_s1 + $0x20] sm:$0xff]  ;;  %v22_v7 = vld [vmem:[%s339_s1 + $0x28] sm:$0xff] }
   0x3   :  { %v191_v5 = vpack.c.bf16 %v20_v4, %v19_v2  ;;  %v195_v8 = vpack.c.bf16 %v22_v7, %v21_v6  ;;  %v15_v9 = vld [vmem:[%s338_s0] sm:$0xff]  ;;  %v23_v10 = vld [vmem:[%s339_s1 + $0x30] sm:$0xff]  ;;  %v24_v11 = vld [vmem:[%s339_s1 + $0x38] sm:$0xff] }
   0x4   :  { %188 = vmatprep.subr.bf16.mxu0 %v187_v3  ;;  %184 = vmatprep.mubr.f32.mxu0 %v15_v9 }
   0x5   :  { %190 = vmatpush3.bf16.msra.mxu0 %v187_v3 }
   0x6   :  { %192 = vmatprep.subr.bf16.mxu0 %v191_v5 }
   0x7   :  { %8 = vsyncpa [#allocation3], 0  ;;  %v199_v12 = vpack.c.bf16 %v24_v11, %v23_v10  ;;  %v25_v13 = vld [vmem:[%s339_s1 + $0x40] sm:$0xff]  ;;  %v26_v14 = vld [vmem:[%s339_s1 + $0x48] sm:$0xff]  ;;  %s246_s23 = smov [#allocation2]  }
   0x8   :  { %v203_v15 = vpack.c.bf16 %v26_v14, %v25_v13  ;;  %v27_v16 = vld [vmem:[%s339_s1 + $0x50] sm:$0xff]  ;;  %v28_v17 = vld [vmem:[%s339_s1 + $0x58] sm:$0xff]  ;;  %v29_v19 = vld [vmem:[%s339_s1 + $0x60] sm:$0xff]  ;;  %s122_s24 = sshll.u32 %s246_s23, 4  ;;  %s123_s24 = int_to_ptr.vmem [resolvable:$true] %s122_s24 }
   0x9   :  { %194 = vmatpush3.bf16.msra.mxu0 %v191_v5  ;;  %v207_v18 = vpack.c.bf16 %v28_v17, %v27_v16  ;;  %v30_v20 = vld [vmem:[%s339_s1 + $0x68] sm:$0xff]  ;;  %v31_v22 = vld [vmem:[%s339_s1 + $0x70] sm:$0xff]  ;;  %v32_v23 = vld [vmem:[%s339_s1 + $0x78] sm:$0xff]  ;;  %s222_s1 = scalar_lea.vmem %s123_s24, 256  ;;  %p227_p1 = scmp.lt.s32.totalorder %s123_s24, %s123_s24 }
   0xa   :  { %196 = vmatprep.subr.bf16.mxu0 %v195_v8  ;;  %v211_v21 = vpack.c.bf16 %v30_v20, %v29_v19  ;;  %v215_v24 = vpack.c.bf16 %v32_v23, %v31_v22  ;;  %v16_v25 = vld [vmem:[%s338_s0 + $0x8] sm:$0xff]  ;;  %v133_v26 = vld [vmem:[%s340_s2] ss:$0 sm:$0xff]  ;;  %p223_p0 = scmp.ne.s32.totalorder %s123_s24, %s222_s1  ;;  %p228_p2 = scmp.lt.s32.totalorder %s222_s1, %s222_s1 }
   0xc   :  { %p229_p3 = por %p228_p2, %p227_p1 }
   0xd   :  { %198 = vmatpush3.bf16.msra.mxu0 %v195_v8 }
   0xe   :  { %200 = vmatprep.subr.bf16.mxu0 %v199_v12  ;;  %p230_p4 = pnand %p229_p3, %p223_p0 }
  0x11   :  { %202 = vmatpush3.bf16.msra.mxu0 %v199_v12 }
  0x12   :  { %204 = vmatprep.subr.bf16.mxu0 %v203_v15 }
  0x15   :  { %206 = vmatpush3.bf16.msra.mxu0 %v203_v15 }
  0x16   :  { %208 = vmatprep.subr.bf16.mxu0 %v207_v18 }
  0x19   :  { %210 = vmatpush3.bf16.msra.mxu0 %v207_v18 }
  0x1a   :  { %212 = vmatprep.subr.bf16.mxu0 %v211_v21 }
  0x1d   :  { %214 = vmatpush3.bf16.msra.mxu0 %v211_v21 }
  0x1e   :  { %216 = vmatprep.subr.bf16.mxu0 %v215_v24 }
  0x21   :  { %218 = vmatpush3.bf16.msra.mxu0 %v215_v24 }
  0x24   :  { %185 = vmatmul.mubr.f32.vlgmr.msra.gmra.mrb[0].mxu0 %v16_v25 }
  0xf7   :  { %v186_v27 = vpop.f32.mrb[0].mxu0 }
  0xf8   :  { %v112_v28 = vadd.f32 %v186_v27, %v133_v26  ;;  %v106_v29 = vpop.f32.mrb[1].mxu0 }
  0xf9   :  { %v107_v30 = vadd.f32 %v133_v26, %v106_v29 }
  0xfa   :  { %116 = vst [vmem:[#allocation2 + $0x8] sm:$0xff] %v112_v28 }
  0xfb   :  { %115 = vst [vmem:[#allocation2] sm:$0xff] %v107_v30 }
  0xfc   :  { %233 = shalt.err (!%p230_p4)
}
  0xfd   :  { %s234_s2 = scalar_lea.hbm %s341_s3, 256 }
  0xfe   :  { %p235_p5 = scmp.ne.s32.totalorder %s341_s3, %s234_s2  ;;  %p238_p6 = scmp.lt.u32.totalorder %s234_s2, %s341_s3 }
 0x100   :  { %p240_p7 = pnand %p238_p6, %p235_p5 }
 0x102   :  { %243 = shalt.err (!%p240_p7)
}
 0x103   :  { %s247_s30 = smov 128   ;;  %s248_s4 = smov 8  }
 0x104   :  { %128 = dma.vmem_to_hbm [thread:$0]  %s123_s24, 256, %s341_s3, [#allocation3], %s247_s30, %s247_s30, %s248_s4  }
 0x105   :  { %244 = dma.done.wait [#allocation3], 256  }
 0x106   :  { %245 = vsyncadd [#allocation3], 4294967040 }
 0x107   :  { %132 = vsyncpa [#allocation3], 1 }

// kernel: rnn_lm_forward.3
= control target key start
LH: loop header
LB: loop body
LE: loop exit
PB: predicated region body
PF: predicated region fallthrough
CT: control target
= control target key end

     0   :  { %v396_v3 = vmov 0.0   ;;  %vm68_vm0 = vcmask 392192   ;;  %v48_v45 = vlaneseq  ;;  %s684_s1 = inlined_call_operand.vmem [shape: f32[48,512], index: 1, kind: input, shape index: {}]   ;;  %s685_s0 = inlined_call_operand.vmem [shape: f32[64,48], index: 0, kind: input, shape index: {}]   ;;  %s686_s2 = inlined_call_operand.vmem [shape: f32[1,512], index: 2, kind: input, shape index: {}]   ;;  %s687_s3 = inlined_call_operand.vmem [shape: f32[64,512], index: 3, kind: output, shape index: {}]  }
   0x1   :  { %v23_v0 = vld [vmem:[%s684_s1 + $0x8] sm:$0xff]  ;;  %v25_v2 = vld [vmem:[%s684_s1 + $0x18] sm:$0xff]  ;;  %157 = vmatprep.mubr.f32.mxu0 %v396_v3  ;;  %270 = vmatprep.mubr.f32.mxu1 %v396_v3  ;;  %v22_v6 = vld [vmem:[%s684_s1] sm:$0xff] }
   0x2   :  { %v27_v1 = vld [vmem:[%s684_s1 + $0x28] sm:$0xff]  ;;  %v29_v5 = vld [vmem:[%s684_s1 + $0x38] sm:$0xff]  ;;  %v26_v7 = vld [vmem:[%s684_s1 + $0x20] sm:$0xff]  ;;  %v49_v46 = vshrl.u32 %v48_v45, 7 }
   0x3   :  { %v371_v4 = vpack.c.bf16 %v27_v1, %v23_v0  ;;  %v383_v8 = vpack.c.bf16 %v29_v5, %v25_v2  ;;  %v373_v9 = vpack.c.bf16 %v26_v7, %v22_v6  ;;  %v24_v10 = vld [vmem:[%s684_s1 + $0x10] sm:$0xff]  ;;  %v31_v12 = vld [vmem:[%s684_s1 + $0x48] sm:$0xff]  ;;  %v33_v15 = vld [vmem:[%s684_s1 + $0x58] sm:$0xff] }
   0x4   :  { %v28_v11 = vld [vmem:[%s684_s1 + $0x30] sm:$0xff]  ;;  %v35_v14 = vld [vmem:[%s684_s1 + $0x68] sm:$0xff]  ;;  %v37_v16 = vld [vmem:[%s684_s1 + $0x78] sm:$0xff]  ;;  %v50_v47 = vsub.s32 0, %v49_v46  ;;  %v58_v49 = vsub.s32 2, %v49_v46  ;;  %v54_v50 = vsub.s32 1, %v49_v46 }
   0x5   :  { %372 = vmatprep.subr.bf16.mxu0 %v371_v4  ;;  %v385_v13 = vpack.c.bf16 %v28_v11, %v24_v10  ;;  %384 = vmatprep.subr.bf16.mxu1 %v383_v8  ;;  %v375_v17 = vpack.c.bf16 %v35_v14, %v31_v12  ;;  %v387_v18 = vpack.c.bf16 %v37_v16, %v33_v15  ;;  %v30_v19 = vld [vmem:[%s684_s1 + $0x40] sm:$0xff]  ;;  %v32_v21 = vld [vmem:[%s684_s1 + $0x50] sm:$0xff]  ;;  %v39_v24 = vld [vmem:[%s684_s1 + $0x88] sm:$0xff]  ;;  %v62_v51 = vsub.s32 3, %v49_v46 }
   0x6   :  { %374 = vmatpush1.bf16.msra.mxu0 %v373_v9  ;;  %v34_v20 = vld [vmem:[%s684_s1 + $0x60] sm:$0xff]  ;;  %v36_v23 = vld [vmem:[%s684_s1 + $0x70] sm:$0xff]  ;;  %v43_v25 = vld [vmem:[%s684_s1 + $0xa8] sm:$0xff] }
   0x7   :  { %386 = vmatpush1.bf16.msra.mxu1 %v385_v13  ;;  %v377_v22 = vpack.c.bf16 %v34_v20, %v30_v19  ;;  %376 = vmatprep.subr.bf16.mxu0 %v375_v17  ;;  %v389_v26 = vpack.c.bf16 %v36_v23, %v32_v21  ;;  %v379_v27 = vpack.c.bf16 %v43_v25, %v39_v24  ;;  %v41_v28 = vld [vmem:[%s684_s1 + $0x98] sm:$0xff]  ;;  %v38_v30 = vld [vmem:[%s684_s1 + $0x80] sm:$0xff]  ;;  %v40_v33 = vld [vmem:[%s684_s1 + $0x90] sm:$0xff] }
   0x8   :  { %388 = vmatprep.subr.bf16.mxu1 %v387_v18  ;;  %v45_v29 = vld [vmem:[%s684_s1 + $0xb8] sm:$0xff]  ;;  %v42_v32 = vld [vmem:[%s684_s1 + $0xa0] sm:$0xff]  ;;  %v44_v34 = vld [vmem:[%s684_s1 + $0xb0] sm:$0xff] }
   0x9   :  { %v391_v31 = vpack.c.bf16 %v45_v29, %v41_v28  ;;  %v381_v35 = vpack.c.bf16 %v42_v32, %v38_v30  ;;  %v393_v36 = vpack.c.bf16 %v44_v34, %v40_v33  ;;  %v14_v37 = vld [vmem:[%s685_s0] sm:$0xff]  ;;  %v15_v38 = vld [vmem:[%s685_s0 + $0x8] sm:$0xff]  ;;  %v16_v39 = vld [vmem:[%s685_s0 + $0x10] sm:$0xff] }
   0xa   :  { %378 = vmatpush1.bf16.msra.mxu0 %v377_v22  ;;  %v17_v40 = vld [vmem:[%s685_s0 + $0x18] sm:$0xff]  ;;  %v18_v41 = vld [vmem:[%s685_s0 + $0x20] sm:$0xff]  ;;  %v19_v42 = vld [vmem:[%s685_s0 + $0x28] sm:$0xff] }
   0xb   :  { %390 = vmatpush1.bf16.msra.mxu1 %v389_v26  ;;  %380 = vmatprep.subr.bf16.mxu0 %v379_v27  ;;  %v20_v43 = vld [vmem:[%s685_s0 + $0x30] sm:$0xff]  ;;  %v21_v44 = vld [vmem:[%s685_s0 + $0x38] sm:$0xff]  ;;  %v46_v48 = vld [vmem:[%s686_s2] sm:$0xf] }
   0xc   :  { %392 = vmatprep.subr.bf16.mxu1 %v391_v31  ;;  %v548_v52 = vrot.slane %v46_v48, %v50_v47  ;;  %v550_v53 = vrot.slane %v46_v48, %v58_v49  ;;  %v552_v54 = vrot.slane %v46_v48, %v54_v50  ;;  %v554_v55 = vrot.slane %v46_v48, %v62_v51 }
   0xe   :  { %382 = vmatpush1.bf16.msra.mxu0 %v381_v35 }
   0xf   :  { %394 = vmatpush1.bf16.msra.mxu1 %v393_v36 }
  0x11   :  { %355 = vmatmul.mubr.msk.f32.vlgmr.msra.gmra.mrb[0].mxu0 %vm68_vm0, %v14_v37 }
  0x12   :  { %363 = vmatmul.mubr.msk.f32.vlgmr.msra.gmra.mrb[0].mxu1 %vm68_vm0, %v14_v37  ;;  %163 = vmatprep.mubr.f32.mxu0 %v396_v3 }
  0x13   :  { %276 = vmatprep.mubr.f32.mxu1 %v396_v3 }
  0x15   :  { %356 = vmatmul.mubr.msk.f32.gmra.mrb[2].mxu0 %vm68_vm0, %v15_v38 }
  0x16   :  { %364 = vmatmul.mubr.msk.f32.gmra.mrb[2].mxu1 %vm68_vm0, %v15_v38  ;;  %169 = vmatprep.mubr.f32.mxu0 %v396_v3 }
  0x17   :  { %282 = vmatprep.mubr.f32.mxu1 %v396_v3 }
  0x19   :  { %357 = vmatmul.mubr.msk.f32.gmra.mrb[4].mxu0 %vm68_vm0, %v16_v39 }
  0x1a   :  { %365 = vmatmul.mubr.msk.f32.gmra.mrb[4].mxu1 %vm68_vm0, %v16_v39  ;;  %175 = vmatprep.mubr.f32.mxu0 %v396_v3 }
  0x1b   :  { %288 = vmatprep.mubr.f32.mxu1 %v396_v3 }
  0x1d   :  { %358 = vmatmul.mubr.msk.f32.gmra.mrb[6].mxu0 %vm68_vm0, %v17_v40 }
  0x1e   :  { %366 = vmatmul.mubr.msk.f32.gmra.mrb[6].mxu1 %vm68_vm0, %v17_v40  ;;  %181 = vmatprep.mubr.f32.mxu0 %v396_v3 }
  0x1f   :  { %294 = vmatprep.mubr.f32.mxu1 %v396_v3 }
  0x21   :  { %359 = vmatmul.mubr.msk.f32.gmra.mrb[8].mxu0 %vm68_vm0, %v18_v41 }
  0x22   :  { %367 = vmatmul.mubr.msk.f32.gmra.mrb[8].mxu1 %vm68_vm0, %v18_v41  ;;  %187 = vmatprep.mubr.f32.mxu0 %v396_v3 }
  0x23   :  { %300 = vmatprep.mubr.f32.mxu1 %v396_v3 }
  0x25   :  { %360 = vmatmul.mubr.msk.f32.gmra.mrb[10].mxu0 %vm68_vm0, %v19_v42 }
  0x26   :  { %368 = vmatmul.mubr.msk.f32.gmra.mrb[10].mxu1 %vm68_vm0, %v19_v42  ;;  %193 = vmatprep.mubr.f32.mxu0 %v396_v3 }
  0x27   :  { %306 = vmatprep.mubr.f32.mxu1 %v396_v3 }
  0x29   :  { %361 = vmatmul.mubr.msk.f32.gmra.mrb[12].mxu0 %vm68_vm0, %v20_v43 }
  0x2a   :  { %369 = vmatmul.mubr.msk.f32.gmra.mrb[12].mxu1 %vm68_vm0, %v20_v43  ;;  %199 = vmatprep.mubr.f32.mxu0 %v396_v3 }
  0x2b   :  { %312 = vmatprep.mubr.f32.mxu1 %v396_v3 }
  0x2d   :  { %362 = vmatmul.mubr.msk.f32.gmra.mrb[14].mxu0 %vm68_vm0, %v21_v44 }
  0x2e   :  { %370 = vmatmul.mubr.msk.f32.gmra.mrb[14].mxu1 %vm68_vm0, %v21_v44 }
  0xe4   :  { %v159_v56 = vpop.f32.mrb[0].mxu0 }
  0xe5   :  { %v160_v57 = vadd.f32 %v159_v56, %v548_v52  ;;  %v272_v58 = vpop.f32.mrb[0].mxu1  ;;  %v161_v59 = vpop.f32.mrb[1].mxu0 }
  0xe6   :  { %v273_v60 = vadd.f32 %v272_v58, %v550_v53  ;;  %v162_v61 = vadd.f32 %v161_v59, %v552_v54  ;;  %v274_v62 = vpop.f32.mrb[1].mxu1 }
  0xe7   :  { %319 = vst [vmem:[%s687_s3] sm:$0xff] %v160_v57  ;;  %v275_v63 = vadd.f32 %v274_v62, %v554_v55 }
  0xe8   :  { %321 = vst [vmem:[%s687_s3 + $0x10] sm:$0xff] %v273_v60  ;;  %320 = vst [vmem:[%s687_s3 + $0x8] sm:$0xff] %v162_v61  ;;  %v165_v0 = vpop.f32.mrb[2].mxu0 }
  0xe9   :  { %322 = vst [vmem:[%s687_s3 + $0x18] sm:$0xff] %v275_v63  ;;  %v166_v1 = vadd.f32 %v165_v0, %v548_v52  ;;  %v278_v2 = vpop.f32.mrb[2].mxu1  ;;  %v167_v3 = vpop.f32.mrb[3].mxu0 }
  0xea   :  { %v279_v4 = vadd.f32 %v278_v2, %v550_v53  ;;  %v168_v5 = vadd.f32 %v167_v3, %v552_v54  ;;  %v280_v6 = vpop.f32.mrb[3].mxu1 }
  0xeb   :  { %323 = vst [vmem:[%s687_s3 + $0x20] sm:$0xff] %v166_v1  ;;  %v281_v7 = vadd.f32 %v280_v6, %v554_v55 }
  0xec   :  { %325 = vst [vmem:[%s687_s3 + $0x30] sm:$0xff] %v279_v4  ;;  %324 = vst [vmem:[%s687_s3 + $0x28] sm:$0xff] %v168_v5  ;;  %v171_v8 = vpop.f32.mrb[4].mxu0 }
  0xed   :  { %326 = vst [vmem:[%s687_s3 + $0x38] sm:$0xff] %v281_v7  ;;  %v172_v9 = vadd.f32 %v171_v8, %v548_v52  ;;  %v284_v10 = vpop.f32.mrb[4].mxu1  ;;  %v173_v11 = vpop.f32.mrb[5].mxu0 }
  0xee   :  { %v285_v12 = vadd.f32 %v284_v10, %v550_v53  ;;  %v174_v13 = vadd.f32 %v173_v11, %v552_v54  ;;  %v286_v14 = vpop.f32.mrb[5].mxu1 }
  0xef   :  { %327 = vst [vmem:[%s687_s3 + $0x40] sm:$0xff] %v172_v9  ;;  %v287_v15 = vadd.f32 %v286_v14, %v554_v55 }
  0xf0   :  { %329 = vst [vmem:[%s687_s3 + $0x50] sm:$0xff] %v285_v12  ;;  %328 = vst [vmem:[%s687_s3 + $0x48] sm:$0xff] %v174_v13  ;;  %v177_v16 = vpop.f32.mrb[6].mxu0 }
  0xf1   :  { %330 = vst [vmem:[%s687_s3 + $0x58] sm:$0xff] %v287_v15  ;;  %v178_v17 = vadd.f32 %v177_v16, %v548_v52  ;;  %v290_v18 = vpop.f32.mrb[6].mxu1  ;;  %v179_v19 = vpop.f32.mrb[7].mxu0 }
  0xf2   :  { %v291_v20 = vadd.f32 %v290_v18, %v550_v53  ;;  %v180_v21 = vadd.f32 %v179_v19, %v552_v54  ;;  %v292_v22 = vpop.f32.mrb[7].mxu1 }
  0xf3   :  { %331 = vst [vmem:[%s687_s3 + $0x60] sm:$0xff] %v178_v17  ;;  %v293_v23 = vadd.f32 %v292_v22, %v554_v55 }
  0xf4   :  { %333 = vst [vmem:[%s687_s3 + $0x70] sm:$0xff] %v291_v20  ;;  %332 = vst [vmem:[%s687_s3 + $0x68] sm:$0xff] %v180_v21  ;;  %v183_v24 = vpop.f32.mrb[8].mxu0 }
  0xf5   :  { %334 = vst [vmem:[%s687_s3 + $0x78] sm:$0xff] %v293_v23  ;;  %v184_v25 = vadd.f32 %v183_v24, %v548_v52  ;;  %v296_v26 = vpop.f32.mrb[8].mxu1  ;;  %v185_v27 = vpop.f32.mrb[9].mxu0 }
  0xf6   :  { %v297_v28 = vadd.f32 %v296_v26, %v550_v53  ;;  %v186_v29 = vadd.f32 %v185_v27, %v552_v54  ;;  %v298_v30 = vpop.f32.mrb[9].mxu1 }
  0xf7   :  { %335 = vst [vmem:[%s687_s3 + $0x80] sm:$0xff] %v184_v25  ;;  %v299_v31 = vadd.f32 %v298_v30, %v554_v55 }
  0xf8   :  { %337 = vst [vmem:[%s687_s3 + $0x90] sm:$0xff] %v297_v28  ;;  %336 = vst [vmem:[%s687_s3 + $0x88] sm:$0xff] %v186_v29  ;;  %v189_v32 = vpop.f32.mrb[10].mxu0 }
  0xf9   :  { %338 = vst [vmem:[%s687_s3 + $0x98] sm:$0xff] %v299_v31  ;;  %v190_v33 = vadd.f32 %v189_v32, %v548_v52  ;;  %v302_v34 = vpop.f32.mrb[10].mxu1  ;;  %v191_v35 = vpop.f32.mrb[11].mxu0 }
  0xfa   :  { %v303_v36 = vadd.f32 %v302_v34, %v550_v53  ;;  %v192_v37 = vadd.f32 %v191_v35, %v552_v54  ;;  %v304_v38 = vpop.f32.mrb[11].mxu1 }
  0xfb   :  { %339 = vst [vmem:[%s687_s3 + $0xa0] sm:$0xff] %v190_v33  ;;  %v305_v39 = vadd.f32 %v304_v38, %v554_v55 }
  0xfc   :  { %341 = vst [vmem:[%s687_s3 + $0xb0] sm:$0xff] %v303_v36  ;;  %340 = vst [vmem:[%s687_s3 + $0xa8] sm:$0xff] %v192_v37  ;;  %v195_v40 = vpop.f32.mrb[12].mxu0 }
  0xfd   :  { %342 = vst [vmem:[%s687_s3 + $0xb8] sm:$0xff] %v305_v39  ;;  %v196_v41 = vadd.f32 %v195_v40, %v548_v52  ;;  %v308_v42 = vpop.f32.mrb[12].mxu1  ;;  %v197_v43 = vpop.f32.mrb[13].mxu0 }
  0xfe   :  { %v309_v44 = vadd.f32 %v308_v42, %v550_v53  ;;  %v198_v45 = vadd.f32 %v197_v43, %v552_v54  ;;  %v310_v46 = vpop.f32.mrb[13].mxu1 }
  0xff   :  { %343 = vst [vmem:[%s687_s3 + $0xc0] sm:$0xff] %v196_v41  ;;  %v311_v47 = vadd.f32 %v310_v46, %v554_v55 }
 0x100   :  { %345 = vst [vmem:[%s687_s3 + $0xd0] sm:$0xff] %v309_v44  ;;  %344 = vst [vmem:[%s687_s3 + $0xc8] sm:$0xff] %v198_v45  ;;  %v201_v48 = vpop.f32.mrb[14].mxu0 }
 0x101   :  { %346 = vst [vmem:[%s687_s3 + $0xd8] sm:$0xff] %v311_v47  ;;  %v202_v49 = vadd.f32 %v201_v48, %v548_v52  ;;  %v314_v50 = vpop.f32.mrb[14].mxu1  ;;  %v203_v51 = vpop.f32.mrb[15].mxu0 }
 0x102   :  { %v315_v56 = vadd.f32 %v314_v50, %v550_v53  ;;  %v204_v57 = vadd.f32 %v203_v51, %v552_v54  ;;  %v316_v58 = vpop.f32.mrb[15].mxu1 }
 0x103   :  { %347 = vst [vmem:[%s687_s3 + $0xe0] sm:$0xff] %v202_v49  ;;  %v317_v59 = vadd.f32 %v316_v58, %v554_v55 }
 0x104   :  { %349 = vst [vmem:[%s687_s3 + $0xf0] sm:$0xff] %v315_v56  ;;  %348 = vst [vmem:[%s687_s3 + $0xe8] sm:$0xff] %v204_v57 }
 0x105   :  { %350 = vst [vmem:[%s687_s3 + $0xf8] sm:$0xff] %v317_v59 }

// kernel: rnn_lm_forward.4
= control target key start
LH: loop header
LB: loop body
LE: loop exit
PB: predicated region body
PF: predicated region fallthrough
CT: control target
= control target key end

     0   :  { %v8146_v3 = vmov 0.0   ;;  %s8136_s1 = inlined_call_operand.vmem [shape: f32[128,512], index: 1, kind: input, shape index: {}]   ;;  %s8137_s2 = inlined_call_operand.vmem [shape: f32[128,512], index: 2, kind: input, shape index: {}]   ;;  %s8138_s3 = inlined_call_operand.vmem [shape: f32[128,512], index: 3, kind: input, shape index: {}]   ;;  %s8139_s0 = inlined_call_operand.vmem [shape: f32[8,8,512], index: 0, kind: input, shape index: {}]   ;;  %s8140_s4 = inlined_call_operand.vmem [shape: f32[1,512], index: 4, kind: input, shape index: {}]   ;;  %s8141_s5 = inlined_call_operand.vmem [shape: f32[8,8,128], index: 5, kind: output, shape index: {0}]   ;;  %s8142_s7 = inlined_call_operand.vmem [shape: f32[8,128], index: 7, kind: output, shape index: {2}]   ;;  %s8143_s6 = inlined_call_operand.vmem [shape: f32[8,128], index: 6, kind: output, shape index: {1}]   ;;  %s8144_s9 = inlined_call_operand.vmem [shape: f32[8,128], index: 9, kind: output, shape index: {4}]   ;;  %s8145_s8 = inlined_call_operand.vmem [shape: f32[8,128], index: 8, kind: output, shape index: {3}]  }
   0x1   :  { %v34_v0 = vld [vmem:[%s8136_s1 + $0x8] sm:$0xff]  ;;  %v33_v2 = vld [vmem:[%s8136_s1] sm:$0xff]  ;;  %296 = vmatprep.mubr.f32.mxu0 %v8146_v3  ;;  %367 = vmatprep.mubr.f32.mxu1 %v8146_v3  ;;  %v36_v19 = vld [vmem:[%s8136_s1 + $0x18] sm:$0xff] }
   0x2   :  { %v38_v1 = vld [vmem:[%s8136_s1 + $0x28] sm:$0xff]  ;;  %v37_v5 = vld [vmem:[%s8136_s1 + $0x20] sm:$0xff]  ;;  %v40_v20 = vld [vmem:[%s8136_s1 + $0x38] sm:$0xff] }
   0x3   :  { %v6286_v4 = vpack.c.bf16 %v38_v1, %v34_v0  ;;  %v42_v6 = vld [vmem:[%s8136_s1 + $0x48] sm:$0xff]  ;;  %v6297_v8 = vpack.c.bf16 %v37_v5, %v33_v2  ;;  %v41_v10 = vld [vmem:[%s8136_s1 + $0x40] sm:$0xff]  ;;  %v6338_v22 = vpack.c.bf16 %v40_v20, %v36_v19  ;;  %v35_v23 = vld [vmem:[%s8136_s1 + $0x10] sm:$0xff] }
   0x4   :  { %v46_v7 = vld [vmem:[%s8136_s1 + $0x68] sm:$0xff]  ;;  %v45_v11 = vld [vmem:[%s8136_s1 + $0x60] sm:$0xff]  ;;  %v39_v24 = vld [vmem:[%s8136_s1 + $0x30] sm:$0xff] }
   0x5   :  { %v6299_v9 = vpack.c.bf16 %v46_v7, %v42_v6  ;;  %v50_v12 = vld [vmem:[%s8136_s1 + $0x88] sm:$0xff]  ;;  %4368 = vmatprep.subr.bf16.mxu0 %v6286_v4  ;;  %v6315_v14 = vpack.c.bf16 %v45_v11, %v41_v10  ;;  %v49_v15 = vld [vmem:[%s8136_s1 + $0x80] sm:$0xff]  ;;  %v6346_v25 = vpack.c.bf16 %v39_v24, %v35_v23  ;;  %4400 = vmatprep.subr.bf16.mxu1 %v6338_v22  ;;  %v44_v27 = vld [vmem:[%s8136_s1 + $0x58] sm:$0xff] }
   0x6   :  { %v54_v13 = vld [vmem:[%s8136_s1 + $0xa8] sm:$0xff]  ;;  %4370 = vmatpush1.bf16.msra.mxu0 %v6297_v8  ;;  %v53_v16 = vld [vmem:[%s8136_s1 + $0xa0] sm:$0xff]  ;;  %v48_v28 = vld [vmem:[%s8136_s1 + $0x78] sm:$0xff] }
   0x7   :  { %4372 = vmatprep.subr.bf16.mxu0 %v6299_v9  ;;  %v6324_v17 = vpack.c.bf16 %v54_v13, %v50_v12  ;;  %v58_v18 = vld [vmem:[%s8136_s1 + $0xc8] sm:$0xff]  ;;  %v6349_v26 = vpack.c.bf16 %v53_v16, %v49_v15  ;;  %v43_v29 = vld [vmem:[%s8136_s1 + $0x50] sm:$0xff]  ;;  %v57_v31 = vld [vmem:[%s8136_s1 + $0xc0] sm:$0xff]  ;;  %4402 = vmatpush1.bf16.msra.mxu1 %v6346_v25  ;;  %v6371_v33 = vpack.c.bf16 %v48_v28, %v44_v27 }
   0x8   :  { %v62_v21 = vld [vmem:[%s8136_s1 + $0xe8] sm:$0xff]  ;;  %v61_v32 = vld [vmem:[%s8136_s1 + $0xe0] sm:$0xff]  ;;  %v47_v34 = vld [vmem:[%s8136_s1 + $0x70] sm:$0xff] }
   0x9   :  { %v6362_v30 = vpack.c.bf16 %v62_v21, %v58_v18  ;;  %v66_v35 = vld [vmem:[%s8136_s1 + $0x108] sm:$0xff]  ;;  %v6382_v37 = vpack.c.bf16 %v47_v34, %v43_v29  ;;  %v52_v38 = vld [vmem:[%s8136_s1 + $0x98] sm:$0xff]  ;;  %4404 = vmatprep.subr.bf16.mxu1 %v6371_v33  ;;  %v51_v40 = vld [vmem:[%s8136_s1 + $0x90] sm:$0xff]  ;;  %v6398_v42 = vpack.c.bf16 %v61_v32, %v57_v31 }
   0xa   :  { %4374 = vmatpush1.bf16.msra.mxu0 %v6315_v14  ;;  %v70_v36 = vld [vmem:[%s8136_s1 + $0x128] sm:$0xff]  ;;  %v56_v39 = vld [vmem:[%s8136_s1 + $0xb8] sm:$0xff]  ;;  %v55_v41 = vld [vmem:[%s8136_s1 + $0xb0] sm:$0xff] }
   0xb   :  { %4376 = vmatprep.subr.bf16.mxu0 %v6324_v17  ;;  %8307 = vst [vmem:[#allocation6_spill] sm:$0xff] %v6398_v42  ;;  %v65_v43 = vld [vmem:[%s8136_s1 + $0x100] sm:$0xff]  ;;  %v6406_v45 = vpack.c.bf16 %v56_v39, %v52_v38  ;;  %v6409_v46 = vpack.c.bf16 %v70_v36, %v66_v35  ;;  %4406 = vmatpush1.bf16.msra.mxu1 %v6382_v37  ;;  %v74_v47 = vld [vmem:[%s8136_s1 + $0x148] sm:$0xff]  ;;  %v60_v49 = vld [vmem:[%s8136_s1 + $0xd8] sm:$0xff] }
   0xc   :  { %v69_v44 = vld [vmem:[%s8136_s1 + $0x120] sm:$0xff]  ;;  %v6415_v48 = vpack.c.bf16 %v55_v41, %v51_v40  ;;  %v64_v50 = vld [vmem:[%s8136_s1 + $0xf8] sm:$0xff]  ;;  %v78_v51 = vld [vmem:[%s8136_s1 + $0x168] sm:$0xff] }
   0xd   :  { %8308 = vst [vmem:[#allocation7_spill] sm:$0xff] %v6409_v46  ;;  %4408 = vmatprep.subr.bf16.mxu1 %v6406_v45  ;;  %v6427_v52 = vpack.c.bf16 %v64_v50, %v60_v49  ;;  %v59_v53 = vld [vmem:[%s8136_s1 + $0xd0] sm:$0xff]  ;;  %v6436_v55 = vpack.c.bf16 %v69_v44, %v65_v43  ;;  %v68_v56 = vld [vmem:[%s8136_s1 + $0x118] sm:$0xff]  ;;  %v6445_v58 = vpack.c.bf16 %v78_v51, %v74_v47  ;;  %v73_v59 = vld [vmem:[%s8136_s1 + $0x140] sm:$0xff] }
   0xe   :  { %4378 = vmatpush1.bf16.msra.mxu0 %v6349_v26  ;;  %v63_v54 = vld [vmem:[%s8136_s1 + $0xf0] sm:$0xff]  ;;  %v72_v57 = vld [vmem:[%s8136_s1 + $0x138] sm:$0xff]  ;;  %v77_v60 = vld [vmem:[%s8136_s1 + $0x160] sm:$0xff] }
   0xf   :  { %4380 = vmatprep.subr.bf16.mxu0 %v6362_v30  ;;  %8309 = vst [vmem:[#allocation8_spill] sm:$0xff] %v6427_v52  ;;  %8310 = vst [vmem:[#allocation9_spill] sm:$0xff] %v6436_v55  ;;  %4410 = vmatpush1.bf16.msra.mxu1 %v6415_v48  ;;  %v82_v61 = vld [vmem:[%s8136_s1 + $0x188] sm:$0xff]  ;;  %v6457_v62 = vpack.c.bf16 %v63_v54, %v59_v53  ;;  %v6463_v0 = vpack.c.bf16 %v72_v57, %v68_v56  ;;  %v67_v1 = vld [vmem:[%s8136_s1 + $0x110] sm:$0xff] }
  0x10   :  { %8311 = vst [vmem:[#allocation10_spill] sm:$0xff] %v6445_v58  ;;  %v86_v63 = vld [vmem:[%s8136_s1 + $0x1a8] sm:$0xff]  ;;  %4412 = vmatprep.subr.bf16.mxu1 %v6427_v52  ;;  %v71_v2 = vld [vmem:[%s8136_s1 + $0x130] sm:$0xff]  ;;  %v76_v5 = vld [vmem:[%s8136_s1 + $0x158] sm:$0xff]  ;;  %v6478_v7 = vpack.c.bf16 %v77_v60, %v73_v59 }
  0x11   :  { %8312 = vst [vmem:[#allocation11_spill] sm:$0xff] %v6457_v62  ;;  %8313 = vst [vmem:[#allocation12_spill] sm:$0xff] %v6463_v0  ;;  %v80_v6 = vld [vmem:[%s8136_s1 + $0x178] sm:$0xff]  ;;  %v6481_v10 = vpack.c.bf16 %v86_v63, %v82_v61  ;;  %v81_v11 = vld [vmem:[%s8136_s1 + $0x180] sm:$0xff]  ;;  %v6493_v15 = vpack.c.bf16 %v71_v2, %v67_v1 }
  0x12   :  { %4382 = vmatpush1.bf16.msra.mxu0 %v6398_v42  ;;  %8314 = vst [vmem:[#allocation13_spill] sm:$0xff] %v6478_v7  ;;  %v85_v12 = vld [vmem:[%s8136_s1 + $0x1a0] sm:$0xff]  ;;  %v90_v13 = vld [vmem:[%s8136_s1 + $0x1c8] sm:$0xff]  ;;  %v6499_v18 = vpack.c.bf16 %v80_v6, %v76_v5  ;;  %v75_v19 = vld [vmem:[%s8136_s1 + $0x150] sm:$0xff] }
  0x13   :  { %4384 = vmatprep.subr.bf16.mxu0 %v6409_v46  ;;  %8315 = vst [vmem:[#allocation14_spill] sm:$0xff] %v6481_v10  ;;  %4414 = vmatpush1.bf16.msra.mxu1 %v6457_v62  ;;  %8316 = vst [vmem:[#allocation15_spill] sm:$0xff] %v6493_v15  ;;  %v94_v16 = vld [vmem:[%s8136_s1 + $0x1e8] sm:$0xff]  ;;  %v79_v20 = vld [vmem:[%s8136_s1 + $0x170] sm:$0xff]  ;;  %v6514_v24 = vpack.c.bf16 %v85_v12, %v81_v11 }
  0x14   :  { %4416 = vmatprep.subr.bf16.mxu1 %v6463_v0  ;;  %8317 = vst [vmem:[#allocation16_spill] sm:$0xff] %v6499_v18  ;;  %v84_v21 = vld [vmem:[%s8136_s1 + $0x198] sm:$0xff]  ;;  %v6517_v27 = vpack.c.bf16 %v94_v16, %v90_v13  ;;  %v89_v28 = vld [vmem:[%s8136_s1 + $0x1c0] sm:$0xff]  ;;  %v6526_v31 = vpack.c.bf16 %v79_v20, %v75_v19  ;;  %v83_v34 = vld [vmem:[%s8136_s1 + $0x190] sm:$0xff] }
  0x15   :  { %v88_v23 = vld [vmem:[%s8136_s1 + $0x1b8] sm:$0xff]  ;;  %8318 = vst [vmem:[#allocation17_spill] sm:$0xff] %v6514_v24  ;;  %v93_v29 = vld [vmem:[%s8136_s1 + $0x1e0] sm:$0xff]  ;;  %v87_v35 = vld [vmem:[%s8136_s1 + $0x1b0] sm:$0xff] }
  0x16   :  { %4386 = vmatpush1.bf16.msra.mxu0 %v6436_v55  ;;  %8319 = vst [vmem:[#allocation18_spill] sm:$0xff] %v6517_v27  ;;  %8320 = vst [vmem:[#allocation19_spill] sm:$0xff] %v6526_v31  ;;  %v6529_v32 = vpack.c.bf16 %v88_v23, %v84_v21  ;;  %v92_v36 = vld [vmem:[%s8136_s1 + $0x1d8] sm:$0xff]  ;;  %v6544_v39 = vpack.c.bf16 %v93_v29, %v89_v28  ;;  %v6548_v40 = vpack.c.bf16 %v87_v35, %v83_v34  ;;  %v91_v43 = vld [vmem:[%s8136_s1 + $0x1d0] sm:$0xff] }
  0x17   :  { %4388 = vmatprep.subr.bf16.mxu0 %v6445_v58  ;;  %4418 = vmatpush1.bf16.msra.mxu1 %v6493_v15  ;;  %v96_v38 = vld [vmem:[%s8136_s1 + $0x1f8] sm:$0xff]  ;;  %v95_v44 = vld [vmem:[%s8136_s1 + $0x1f0] sm:$0xff]  ;;  %v98_v49 = vld [vmem:[%s8137_s2 + $0x8] sm:$0xff] }
  0x18   :  { %4420 = vmatprep.subr.bf16.mxu1 %v6499_v18  ;;  %8321 = vst [vmem:[#allocation20_spill] sm:$0xff] %v6529_v32  ;;  %8322 = vst [vmem:[#allocation21_spill] sm:$0xff] %v6544_v39  ;;  %v6551_v41 = vpack.c.bf16 %v96_v38, %v92_v36  ;;  %v6561_v47 = vpack.c.bf16 %v95_v44, %v91_v43  ;;  %v102_v50 = vld [vmem:[%s8137_s2 + $0x28] sm:$0xff]  ;;  %v100_v51 = vld [vmem:[%s8137_s2 + $0x18] sm:$0xff] }
  0x19   :  { %8323 = vst [vmem:[#allocation22_spill] sm:$0xff] %v6548_v40  ;;  %v6578_v53 = vpack.c.bf16 %v102_v50, %v98_v49  ;;  %v104_v54 = vld [vmem:[%s8137_s2 + $0x38] sm:$0xff]  ;;  %v97_v56 = vld [vmem:[%s8137_s2] sm:$0xff]  ;;  %v99_v61 = vld [vmem:[%s8137_s2 + $0x10] sm:$0xff] }
  0x1a   :  { %4390 = vmatpush1.bf16.msra.mxu0 %v6478_v7  ;;  %8324 = vst [vmem:[#allocation23_spill] sm:$0xff] %v6551_v41  ;;  %8325 = vst [vmem:[#allocation24_spill] sm:$0xff] %v6561_v47  ;;  %v101_v57 = vld [vmem:[%s8137_s2 + $0x20] sm:$0xff]  ;;  %v6589_v59 = vpack.c.bf16 %v104_v54, %v100_v51  ;;  %v103_v63 = vld [vmem:[%s8137_s2 + $0x30] sm:$0xff] }
  0x1b   :  { %4392 = vmatprep.subr.bf16.mxu0 %v6481_v10  ;;  %4422 = vmatpush1.bf16.msra.mxu1 %v6526_v31  ;;  %8326 = vst [vmem:[#allocation25_spill] sm:$0xff] %v6578_v53  ;;  %v6591_v60 = vpack.c.bf16 %v101_v57, %v97_v56  ;;  %v6600_v1 = vpack.c.bf16 %v103_v63, %v99_v61  ;;  %v106_v2 = vld [vmem:[%s8137_s2 + $0x48] sm:$0xff]  ;;  %v108_v6 = vld [vmem:[%s8137_s2 + $0x58] sm:$0xff]  ;;  %v105_v16 = vld [vmem:[%s8137_s2 + $0x40] sm:$0xff] }
  0x1c   :  { %4424 = vmatprep.subr.bf16.mxu1 %v6529_v32  ;;  %8327 = vst [vmem:[#allocation26_spill] sm:$0xff] %v6589_v59  ;;  %v110_v5 = vld [vmem:[%s8137_s2 + $0x68] sm:$0xff]  ;;  %v112_v11 = vld [vmem:[%s8137_s2 + $0x78] sm:$0xff]  ;;  %v109_v19 = vld [vmem:[%s8137_s2 + $0x60] sm:$0xff] }
  0x1d   :  { %8328 = vst [vmem:[#allocation27_spill] sm:$0xff] %v6591_v60  ;;  %8329 = vst [vmem:[#allocation28_spill] sm:$0xff] %v6600_v1  ;;  %v6617_v12 = vpack.c.bf16 %v110_v5, %v106_v2  ;;  %v6619_v13 = vpack.c.bf16 %v112_v11, %v108_v6  ;;  %v107_v20 = vld [vmem:[%s8137_s2 + $0x50] sm:$0xff]  ;;  %v6630_v21 = vpack.c.bf16 %v109_v19, %v105_v16  ;;  %v114_v29 = vld [vmem:[%s8137_s2 + $0x88] sm:$0xff] }
  0x1e   :  { %4394 = vmatpush1.bf16.msra.mxu0 %v6514_v24  ;;  %v111_v23 = vld [vmem:[%s8137_s2 + $0x70] sm:$0xff]  ;;  %v118_v34 = vld [vmem:[%s8137_s2 + $0xa8] sm:$0xff]  ;;  %v116_v35 = vld [vmem:[%s8137_s2 + $0x98] sm:$0xff] }
  0x1f   :  { %4396 = vmatprep.subr.bf16.mxu0 %v6517_v27  ;;  %4426 = vmatpush1.bf16.msra.mxu1 %v6548_v40  ;;  %8330 = vst [vmem:[#allocation29_spill] sm:$0xff] %v6617_v12  ;;  %8331 = vst [vmem:[#allocation30_spill] sm:$0xff] %v6619_v13  ;;  %v6637_v28 = vpack.c.bf16 %v111_v23, %v107_v20  ;;  %v6649_v36 = vpack.c.bf16 %v118_v34, %v114_v29  ;;  %v120_v38 = vld [vmem:[%s8137_s2 + $0xb8] sm:$0xff]  ;;  %v113_v43 = vld [vmem:[%s8137_s2 + $0x80] sm:$0xff] }
  0x20   :  { %4428 = vmatprep.subr.bf16.mxu1 %v6551_v41  ;;  %8332 = vst [vmem:[#allocation31_spill] sm:$0xff] %v6630_v21  ;;  %v117_v44 = vld [vmem:[%s8137_s2 + $0xa0] sm:$0xff]  ;;  %v6661_v49 = vpack.c.bf16 %v120_v38, %v116_v35  ;;  %v115_v51 = vld [vmem:[%s8137_s2 + $0x90] sm:$0xff]  ;;  %v122_v57 = vld [vmem:[%s8137_s2 + $0xc8] sm:$0xff] }
  0x21   :  { %8333 = vst [vmem:[#allocation32_spill] sm:$0xff] %v6637_v28  ;;  %8334 = vst [vmem:[#allocation33_spill] sm:$0xff] %v6649_v36  ;;  %v6663_v50 = vpack.c.bf16 %v117_v44, %v113_v43  ;;  %v119_v54 = vld [vmem:[%s8137_s2 + $0xb0] sm:$0xff]  ;;  %v126_v61 = vld [vmem:[%s8137_s2 + $0xe8] sm:$0xff] }
  0x22   :  { %4398 = vmatpush1.bf16.msra.mxu0 %v6544_v39  ;;  %8335 = vst [vmem:[#allocation34_spill] sm:$0xff] %v6661_v49  ;;  %v6672_v56 = vpack.c.bf16 %v119_v54, %v115_v51  ;;  %v124_v63 = vld [vmem:[%s8137_s2 + $0xd8] sm:$0xff]  ;;  %v6685_v2 = vpack.c.bf16 %v126_v61, %v122_v57  ;;  %v121_v6 = vld [vmem:[%s8137_s2 + $0xc0] sm:$0xff]  ;;  %v123_v20 = vld [vmem:[%s8137_s2 + $0xd0] sm:$0xff] }
  0x23   :  { %4430 = vmatpush1.bf16.msra.mxu1 %v6561_v47  ;;  %4432 = vmatprep.subr.bf16.mxu0 %v6578_v53  ;;  %8336 = vst [vmem:[#allocation35_spill] sm:$0xff] %v6663_v50  ;;  %v128_v5 = vld [vmem:[%s8137_s2 + $0xf8] sm:$0xff]  ;;  %v125_v11 = vld [vmem:[%s8137_s2 + $0xe0] sm:$0xff]  ;;  %v127_v23 = vld [vmem:[%s8137_s2 + $0xf0] sm:$0xff] }
  0x24   :  { %4464 = vmatprep.subr.bf16.mxu1 %v6589_v59  ;;  %8337 = vst [vmem:[#allocation36_spill] sm:$0xff] %v6672_v56  ;;  %8338 = vst [vmem:[#allocation37_spill] sm:$0xff] %v6685_v2  ;;  %v6697_v16 = vpack.c.bf16 %v128_v5, %v124_v63  ;;  %v6699_v19 = vpack.c.bf16 %v125_v11, %v121_v6  ;;  %v6708_v29 = vpack.c.bf16 %v127_v23, %v123_v20  ;;  %v130_v34 = vld [vmem:[%s8137_s2 + $0x108] sm:$0xff]  ;;  %v132_v38 = vld [vmem:[%s8137_s2 + $0x118] sm:$0xff] }
  0x25   :  { %297 = vmatmul.mubr.f32.vlgmr.msra.gmra.mrb[0].mxu0 %v8146_v3  ;;  %v134_v35 = vld [vmem:[%s8137_s2 + $0x128] sm:$0xff]  ;;  %v136_v44 = vld [vmem:[%s8137_s2 + $0x138] sm:$0xff]  ;;  %v129_v51 = vld [vmem:[%s8137_s2 + $0x100] sm:$0xff] }
  0x26   :  { %470 = vmatprep.mubr.f32.mxu0 %v8146_v3  ;;  %368 = vmatmul.mubr.f32.vlgmr.msra.gmra.mrb[0].mxu1 %v8146_v3  ;;  %8339 = vst [vmem:[#allocation38_spill] sm:$0xff] %v6697_v16  ;;  %8340 = vst [vmem:[#allocation39_spill] sm:$0xff] %v6699_v19  ;;  %v6721_v43 = vpack.c.bf16 %v134_v35, %v130_v34  ;;  %v133_v54 = vld [vmem:[%s8137_s2 + $0x120] sm:$0xff]  ;;  %v6733_v57 = vpack.c.bf16 %v136_v44, %v132_v38  ;;  %v131_v63 = vld [vmem:[%s8137_s2 + $0x110] sm:$0xff] }
  0x27   :  { %541 = vmatprep.mubr.f32.mxu1 %v8146_v3  ;;  %4434 = vmatpush1.bf16.msra.mxu0 %v6591_v60  ;;  %8341 = vst [vmem:[#allocation40_spill] sm:$0xff] %v6708_v29  ;;  %v6735_v61 = vpack.c.bf16 %v133_v54, %v129_v51  ;;  %v135_v5 = vld [vmem:[%s8137_s2 + $0x130] sm:$0xff]  ;;  %v138_v11 = vld [vmem:[%s8137_s2 + $0x148] sm:$0xff]  ;;  %v140_v23 = vld [vmem:[%s8137_s2 + $0x158] sm:$0xff] }
  0x28   :  { %4466 = vmatpush1.bf16.msra.mxu1 %v6600_v1  ;;  %4436 = vmatprep.subr.bf16.mxu0 %v6617_v12  ;;  %8342 = vst [vmem:[#allocation41_spill] sm:$0xff] %v6721_v43  ;;  %8343 = vst [vmem:[#allocation42_spill] sm:$0xff] %v6733_v57  ;;  %v6744_v6 = vpack.c.bf16 %v135_v5, %v131_v63  ;;  %v142_v20 = vld [vmem:[%s8137_s2 + $0x168] sm:$0xff]  ;;  %v144_v35 = vld [vmem:[%s8137_s2 + $0x178] sm:$0xff] }
  0x29   :  { %4468 = vmatprep.subr.bf16.mxu1 %v6619_v13  ;;  %8344 = vst [vmem:[#allocation43_spill] sm:$0xff] %v6735_v61  ;;  %v6757_v34 = vpack.c.bf16 %v142_v20, %v138_v11  ;;  %v137_v38 = vld [vmem:[%s8137_s2 + $0x140] sm:$0xff]  ;;  %v6769_v51 = vpack.c.bf16 %v144_v35, %v140_v23  ;;  %v139_v63 = vld [vmem:[%s8137_s2 + $0x150] sm:$0xff]  ;;  %v146_v20 = vld [vmem:[%s8137_s2 + $0x188] sm:$0xff] }
  0x2a   :  { %8345 = vst [vmem:[#allocation44_spill] sm:$0xff] %v6744_v6  ;;  %v141_v44 = vld [vmem:[%s8137_s2 + $0x160] sm:$0xff]  ;;  %v143_v5 = vld [vmem:[%s8137_s2 + $0x170] sm:$0xff]  ;;  %v150_v23 = vld [vmem:[%s8137_s2 + $0x1a8] sm:$0xff] }
  0x2b   :  { %4438 = vmatpush1.bf16.msra.mxu0 %v6630_v21  ;;  %8346 = vst [vmem:[#allocation45_spill] sm:$0xff] %v6757_v34  ;;  %8347 = vst [vmem:[#allocation46_spill] sm:$0xff] %v6769_v51  ;;  %v6771_v54 = vpack.c.bf16 %v141_v44, %v137_v38  ;;  %v6780_v11 = vpack.c.bf16 %v143_v5, %v139_v63  ;;  %v148_v35 = vld [vmem:[%s8137_s2 + $0x198] sm:$0xff]  ;;  %v6792_v38 = vpack.c.bf16 %v150_v23, %v146_v20  ;;  %v145_v63 = vld [vmem:[%s8137_s2 + $0x180] sm:$0xff] }
  0x2c   :  { %4470 = vmatpush1.bf16.msra.mxu1 %v6637_v28  ;;  %4440 = vmatprep.subr.bf16.mxu0 %v6649_v36  ;;  %v152_v44 = vld [vmem:[%s8137_s2 + $0x1b8] sm:$0xff]  ;;  %v149_v5 = vld [vmem:[%s8137_s2 + $0x1a0] sm:$0xff]  ;;  %v147_v20 = vld [vmem:[%s8137_s2 + $0x190] sm:$0xff] }
  0x2d   :  { %4472 = vmatprep.subr.bf16.mxu1 %v6661_v49  ;;  %8348 = vst [vmem:[#allocation47_spill] sm:$0xff] %v6771_v54  ;;  %8349 = vst [vmem:[#allocation48_spill] sm:$0xff] %v6780_v11  ;;  %v6804_v3 = vpack.c.bf16 %v152_v44, %v148_v35  ;;  %v151_v23 = vld [vmem:[%s8137_s2 + $0x1b0] sm:$0xff]  ;;  %v158_v44 = vld [vmem:[%s8137_s2 + $0x1e8] sm:$0xff] }
  0x2e   :  { %8350 = vst [vmem:[#allocation49_spill] sm:$0xff] %v6792_v38  ;;  %v6819_v35 = vpack.c.bf16 %v151_v23, %v147_v20  ;;  %v153_v20 = vld [vmem:[%s8137_s2 + $0x1c0] sm:$0xff] }
  0x2f   :  { %4442 = vmatpush1.bf16.msra.mxu0 %v6663_v50  ;;  %8351 = vst [vmem:[#allocation50_spill] sm:$0xff] %v6804_v3  ;;  %v157_v23 = vld [vmem:[%s8137_s2 + $0x1e0] sm:$0xff] }
  0x30   :  { %4474 = vmatpush1.bf16.msra.mxu1 %v6672_v56  ;;  %4444 = vmatprep.subr.bf16.mxu0 %v6685_v2  ;;  %8353 = vst [vmem:[#allocation52_spill] sm:$0xff] %v6819_v35 }
  0x31   :  { %4476 = vmatprep.subr.bf16.mxu1 %v6697_v16 }
  0x33   :  { %4446 = vmatpush1.bf16.msra.mxu0 %v6699_v19 }
  0x34   :  { %4478 = vmatpush1.bf16.msra.mxu1 %v6708_v29  ;;  %4448 = vmatprep.subr.bf16.mxu0 %v6721_v43 }
  0x35   :  { %4480 = vmatprep.subr.bf16.mxu1 %v6733_v57 }
  0x37   :  { %4450 = vmatpush1.bf16.msra.mxu0 %v6735_v61 }
  0x38   :  { %4482 = vmatpush1.bf16.msra.mxu1 %v6744_v6  ;;  %4452 = vmatprep.subr.bf16.mxu0 %v6757_v34  ;;  %v6806_v34 = vpack.c.bf16 %v149_v5, %v145_v63  ;;  %v156_v63 = vld [vmem:[%s8137_s2 + $0x1d8] sm:$0xff] }
  0x39   :  { %4484 = vmatprep.subr.bf16.mxu1 %v6769_v51  ;;  %v154_v51 = vld [vmem:[%s8137_s2 + $0x1c8] sm:$0xff]  ;;  %v160_v5 = vld [vmem:[%s8137_s2 + $0x1f8] sm:$0xff] }
  0x3a   :  { %8352 = vst [vmem:[#allocation51_spill] sm:$0xff] %v6806_v34  ;;  %v168_v6 = vld [vmem:[%s8138_s3 + $0x38] sm:$0xff] }
  0x3b   :  { %4454 = vmatpush1.bf16.msra.mxu0 %v6771_v54  ;;  %v6831_v54 = vpack.c.bf16 %v158_v44, %v154_v51  ;;  %v162_v51 = vld [vmem:[%s8138_s3 + $0x8] sm:$0xff] }
  0x3c   :  { %4486 = vmatpush1.bf16.msra.mxu1 %v6780_v11  ;;  %4456 = vmatprep.subr.bf16.mxu0 %v6792_v38  ;;  %v6833_v11 = vpack.c.bf16 %v160_v5, %v156_v63  ;;  %v155_v38 = vld [vmem:[%s8137_s2 + $0x1d0] sm:$0xff]  ;;  %v166_v44 = vld [vmem:[%s8138_s3 + $0x28] sm:$0xff]  ;;  %v6854_v63 = vpack.c.bf16 %v157_v23, %v153_v20  ;;  %v164_v5 = vld [vmem:[%s8138_s3 + $0x18] sm:$0xff] }
  0x3d   :  { %4488 = vmatprep.subr.bf16.mxu1 %v6804_v3  ;;  %8354 = vst [vmem:[#allocation53_spill] sm:$0xff] %v6831_v54  ;;  %v159_v3 = vld [vmem:[%s8137_s2 + $0x1f0] sm:$0xff]  ;;  %v6866_v57 = vpack.c.bf16 %v166_v44, %v162_v51  ;;  %v6869_v20 = vpack.c.bf16 %v168_v6, %v164_v5  ;;  %v228_v23 = vld [vmem:[%s8139_s0] sm:$0xff] }
  0x3e   :  { %8355 = vst [vmem:[#allocation54_spill] sm:$0xff] %v6833_v11  ;;  %8356 = vst [vmem:[#allocation55_spill] sm:$0xff] %v6854_v63  ;;  %v6864_v61 = vpack.c.bf16 %v159_v3, %v155_v38  ;;  %v229_v3 = vld [vmem:[%s8139_s0 + $0x8] sm:$0xff] }
  0x3f   :  { %4458 = vmatpush1.bf16.msra.mxu0 %v6806_v34  ;;  %8358 = vst [vmem:[#allocation57_spill] sm:$0xff] %v6866_v57  ;;  %8359 = vst [vmem:[#allocation58_spill] sm:$0xff] %v6869_v20 }
  0x40   :  { %4490 = vmatpush1.bf16.msra.mxu1 %v6819_v35  ;;  %4460 = vmatprep.subr.bf16.mxu0 %v6831_v54  ;;  %8357 = vst [vmem:[#allocation56_spill] sm:$0xff] %v6864_v61  ;;  %v230_v54 = vld [vmem:[%s8139_s0 + $0x10] sm:$0xff] }
  0x41   :  { %4492 = vmatprep.subr.bf16.mxu1 %v6833_v11 }
  0x43   :  { %4462 = vmatpush1.bf16.msra.mxu0 %v6854_v63 }
  0x44   :  { %4494 = vmatpush1.bf16.msra.mxu1 %v6864_v61  ;;  %4496 = vmatprep.subr.bf16.mxu0 %v6866_v57  ;;  %v231_v57 = vld [vmem:[%s8139_s0 + $0x18] sm:$0xff] }
  0x45   :  { %4528 = vmatprep.subr.bf16.mxu1 %v6869_v20 }
  0xf8   :  { %v298_v38 = vpop.f32.mrb[0].mxu0 }
  0xf9   :  { %v374_v51 = vadd.f32 %v298_v38, %v228_v23  ;;  %v300_v6 = vpop.f32.mrb[1].mxu0  ;;  %v369_v20 = vpop.f32.mrb[0].mxu1 }
  0xfa   :  { %v375_v44 = vadd.f32 %v300_v6, %v229_v3  ;;  %v371_v61 = vpop.f32.mrb[1].mxu1  ;;  %v376_v34 = vadd.f32 %v369_v20, %v230_v54  ;;  %v161_v54 = vld [vmem:[%s8138_s3] sm:$0xff] }
  0xfb   :  { %v4284_v5 = vmul.f32 -1.442695, %v374_v51  ;;  %v377_v11 = vadd.f32 %v371_v61, %v231_v57 }
  0xfc   :  { %v4285_v63 = vmul.f32 -1.442695, %v375_v44 }
  0xfd   :  { %5968 = vpow2.f32 %v4284_v5  ;;  %v4286_v35 = vmul.f32 -1.442695, %v377_v11  ;;  %v163_v11 = vld [vmem:[%s8138_s3 + $0x10] sm:$0xff] }
  0xfe   :  { %5970 = vpow2.f32 %v4285_v63 }
  0xff   :  { %5972 = vpow2.f32 %v4286_v35  ;;  %v170_v35 = vld [vmem:[%s8138_s3 + $0x48] sm:$0xff] }
 0x100   :  { %5974 = vtanh.f32 %v376_v34  ;;  %v165_v34 = vld [vmem:[%s8138_s3 + $0x20] sm:$0xff] }
 0x107   :  { %v5969_v23 = vpop.eup %5968 }
 0x108   :  { %v5971_v3 = vpop.eup %5970  ;;  %v381_v38 = vadd.f32 1.0, %v5969_v23  ;;  %v174_v23 = vld [vmem:[%s8138_s3 + $0x68] sm:$0xff] }
 0x109   :  { %v387_v51 = vadd.f32 1.0, %v5971_v3  ;;  %v5973_v6 = vpop.eup %5972  ;;  %v172_v3 = vld [vmem:[%s8138_s3 + $0x58] sm:$0xff] }
 0x10a   :  { %5976 = vrcp.f32 %v381_v38  ;;  %v5975_v44 = vpop.eup %5974  ;;  %v394_v63 = vadd.f32 1.0, %v5973_v6  ;;  %v176_v38 = vld [vmem:[%s8138_s3 + $0x78] sm:$0xff]  ;;  %v6914_v6 = vpack.c.bf16 %v165_v34, %v161_v54  ;;  %v171_v54 = vld [vmem:[%s8138_s3 + $0x50] sm:$0xff] }
 0x10b   :  { %5978 = vrcp.f32 %v387_v51  ;;  %v175_v34 = vld [vmem:[%s8138_s3 + $0x70] sm:$0xff] }
 0x10c   :  { %5980 = vrcp.f32 %v394_v63  ;;  %8361 = vst [vmem:[#allocation60_spill] sm:$0xff] %v6914_v6  ;;  %v173_v63 = vld [vmem:[%s8138_s3 + $0x60] sm:$0xff] }
 0x114   :  { %v5977_v5 = vpop.eup %5976 }
 0x115   :  { %v5979_v43 = vpop.eup %5978  ;;  %v398_v57 = vmul.f32 %v5977_v5, %v5975_v44  ;;  %v169_v5 = vld [vmem:[%s8138_s3 + $0x40] sm:$0xff] }
 0x116   :  { %v397_v61 = vmul.f32 0.0, %v5979_v43  ;;  %v167_v43 = vld [vmem:[%s8138_s3 + $0x30] sm:$0xff]  ;;  %v5981_v20 = vpop.eup %5980 }
 0x117   :  { %v6916_v44 = vpack.c.bf16 %v167_v43, %v163_v11  ;;  %v178_v11 = vld [vmem:[%s8138_s3 + $0x88] sm:$0xff] }
 0x118   :  { %v6887_v29 = vadd.f32 %v398_v57, %v397_v61  ;;  %v6926_v61 = vpack.c.bf16 %v174_v23, %v170_v35  ;;  %v182_v43 = vld [vmem:[%s8138_s3 + $0xa8] sm:$0xff]  ;;  %v180_v35 = vld [vmem:[%s8138_s3 + $0x98] sm:$0xff]  ;;  %v6952_v23 = vpack.c.bf16 %v173_v63, %v169_v5  ;;  %v179_v5 = vld [vmem:[%s8138_s3 + $0x90] sm:$0xff] }
 0x119   :  { %8362 = vst [vmem:[#allocation61_spill] sm:$0xff] %v6916_v44  ;;  %v6964_v19 = vpack.c.bf16 %v182_v43, %v178_v11  ;;  %v183_v63 = vld [vmem:[%s8138_s3 + $0xb0] sm:$0xff]  ;;  %v188_v11 = vld [vmem:[%s8138_s3 + $0xd8] sm:$0xff] }
 0x11a   :  { %8360 = vst [vmem:[#allocation59_spill] sm:$0xff] %v6887_v29  ;;  %5982 = vtanh.f32 %v6887_v29  ;;  %8363 = vst [vmem:[#allocation62_spill] sm:$0xff] %v6926_v61  ;;  %v6928_v29 = vpack.c.bf16 %v176_v38, %v172_v3  ;;  %v6954_v3 = vpack.c.bf16 %v175_v34, %v171_v54  ;;  %v177_v38 = vld [vmem:[%s8138_s3 + $0x80] sm:$0xff]  ;;  %v186_v54 = vld [vmem:[%s8138_s3 + $0xc8] sm:$0xff] }
 0x11b   :  { %8365 = vst [vmem:[#allocation64_spill] sm:$0xff] %v6952_v23  ;;  %8367 = vst [vmem:[#allocation66_spill] sm:$0xff] %v6964_v19  ;;  %v190_v34 = vld [vmem:[%s8138_s3 + $0xe8] sm:$0xff]  ;;  %v192_v43 = vld [vmem:[%s8138_s3 + $0xf8] sm:$0xff] }
 0x11c   :  { %8364 = vst [vmem:[#allocation63_spill] sm:$0xff] %v6928_v29  ;;  %8366 = vst [vmem:[#allocation65_spill] sm:$0xff] %v6954_v3  ;;  %v7002_v16 = vpack.c.bf16 %v190_v34, %v186_v54  ;;  %v196_v54 = vld [vmem:[%s8138_s3 + $0x118] sm:$0xff] }
 0x11d   :  { %v200_v34 = vld [vmem:[%s8138_s3 + $0x138] sm:$0xff] }
 0x11e   :  { %8372 = vst [vmem:[#allocation70_spill] sm:$0xff] %v7002_v16 }
 0x124   :  { %v5983_v51 = vpop.eup %5982 }
 0x125   :  { %v6924_v57 = vmul.f32 %v5983_v51, %v5981_v20  ;;  %v184_v20 = vld [vmem:[%s8138_s3 + $0xb8] sm:$0xff]  ;;  %v181_v51 = vld [vmem:[%s8138_s3 + $0xa0] sm:$0xff] }
 0x127   :  { %471 = vmatmul.mubr.f32.vlgmr.msra.gmra.mrb[2].mxu0 %v6924_v57  ;;  %542 = vmatmul.mubr.f32.vlgmr.msra.gmra.mrb[2].mxu1 %v6924_v57 }
 0x128   :  { %4498 = vmatpush1.bf16.msra.mxu0 %v6914_v6  ;;  %4530 = vmatpush1.bf16.msra.mxu1 %v6916_v44  ;;  %v6966_v6 = vpack.c.bf16 %v184_v20, %v180_v35  ;;  %v8369_v35 = vmov 0.0   ;;  %v6990_v20 = vpack.c.bf16 %v181_v51, %v177_v38  ;;  %v189_v44 = vld [vmem:[%s8138_s3 + $0xe0] sm:$0xff]  ;;  %v187_v38 = vld [vmem:[%s8138_s3 + $0xd0] sm:$0xff] }
 0x129   :  { %4500 = vmatprep.subr.bf16.mxu0 %v6926_v61  ;;  %4532 = vmatprep.subr.bf16.mxu1 %v6928_v29  ;;  %v6992_v29 = vpack.c.bf16 %v183_v63, %v179_v5  ;;  %v185_v61 = vld [vmem:[%s8138_s3 + $0xc0] sm:$0xff]  ;;  %v191_v51 = vld [vmem:[%s8138_s3 + $0xf0] sm:$0xff]  ;;  %v194_v5 = vld [vmem:[%s8138_s3 + $0x108] sm:$0xff] }
 0x12a   :  { %8368 = vst [vmem:[#allocation67_spill] sm:$0xff] %v6966_v6  ;;  %637 = vmatprep.mubr.f32.mxu0 %v8369_v35  ;;  %708 = vmatprep.mubr.f32.mxu1 %v8369_v35  ;;  %8370 = vst [vmem:[#allocation68_spill] sm:$0xff] %v6990_v20  ;;  %v198_v63 = vld [vmem:[%s8138_s3 + $0x128] sm:$0xff] }
 0x12b   :  { %8371 = vst [vmem:[#allocation69_spill] sm:$0xff] %v6992_v29 }
 0x12c   :  { %4502 = vmatpush1.bf16.msra.mxu0 %v6952_v23  ;;  %4534 = vmatpush1.bf16.msra.mxu1 %v6954_v3  ;;  %v7004_v23 = vpack.c.bf16 %v192_v43, %v188_v11  ;;  %v7026_v11 = vpack.c.bf16 %v189_v44, %v185_v61  ;;  %v7028_v43 = vpack.c.bf16 %v191_v51, %v187_v38  ;;  %v195_v44 = vld [vmem:[%s8138_s3 + $0x110] sm:$0xff]  ;;  %v202_v38 = vld [vmem:[%s8138_s3 + $0x148] sm:$0xff] }
 0x12d   :  { %4504 = vmatprep.subr.bf16.mxu0 %v6964_v19  ;;  %4536 = vmatprep.subr.bf16.mxu1 %v6966_v6  ;;  %v193_v6 = vld [vmem:[%s8138_s3 + $0x100] sm:$0xff]  ;;  %v7038_v3 = vpack.c.bf16 %v198_v63, %v194_v5  ;;  %v199_v61 = vld [vmem:[%s8138_s3 + $0x130] sm:$0xff]  ;;  %v206_v51 = vld [vmem:[%s8138_s3 + $0x168] sm:$0xff] }
 0x12e   :  { %8373 = vst [vmem:[#allocation71_spill] sm:$0xff] %v7004_v23  ;;  %8374 = vst [vmem:[#allocation72_spill] sm:$0xff] %v7026_v11  ;;  %v197_v19 = vld [vmem:[%s8138_s3 + $0x120] sm:$0xff]  ;;  %v204_v5 = vld [vmem:[%s8138_s3 + $0x158] sm:$0xff] }
 0x12f   :  { %8375 = vst [vmem:[#allocation73_spill] sm:$0xff] %v7028_v43  ;;  %8376 = vst [vmem:[#allocation74_spill] sm:$0xff] %v7038_v3  ;;  %v208_v63 = vld [vmem:[%s8138_s3 + $0x178] sm:$0xff] }
 0x130   :  { %4506 = vmatpush1.bf16.msra.mxu0 %v6990_v20  ;;  %4538 = vmatpush1.bf16.msra.mxu1 %v6992_v29  ;;  %v7040_v20 = vpack.c.bf16 %v200_v34, %v196_v54  ;;  %v7062_v54 = vpack.c.bf16 %v197_v19, %v193_v6  ;;  %v7064_v34 = vpack.c.bf16 %v199_v61, %v195_v44  ;;  %v203_v19 = vld [vmem:[%s8138_s3 + $0x150] sm:$0xff]  ;;  %v210_v44 = vld [vmem:[%s8138_s3 + $0x188] sm:$0xff] }
 0x131   :  { %4508 = vmatprep.subr.bf16.mxu0 %v7002_v16  ;;  %4540 = vmatprep.subr.bf16.mxu1 %v7004_v23  ;;  %v201_v23 = vld [vmem:[%s8138_s3 + $0x140] sm:$0xff]  ;;  %v7074_v29 = vpack.c.bf16 %v206_v51, %v202_v38  ;;  %v207_v6 = vld [vmem:[%s8138_s3 + $0x170] sm:$0xff]  ;;  %v214_v61 = vld [vmem:[%s8138_s3 + $0x1a8] sm:$0xff] }
 0x132   :  { %8377 = vst [vmem:[#allocation75_spill] sm:$0xff] %v7040_v20  ;;  %8378 = vst [vmem:[#allocation76_spill] sm:$0xff] %v7062_v54  ;;  %v205_v16 = vld [vmem:[%s8138_s3 + $0x160] sm:$0xff]  ;;  %v212_v38 = vld [vmem:[%s8138_s3 + $0x198] sm:$0xff] }
 0x133   :  { %8379 = vst [vmem:[#allocation77_spill] sm:$0xff] %v7064_v34  ;;  %8380 = vst [vmem:[#allocation78_spill] sm:$0xff] %v7074_v29  ;;  %v216_v51 = vld [vmem:[%s8138_s3 + $0x1b8] sm:$0xff] }
 0x134   :  { %4510 = vmatpush1.bf16.msra.mxu0 %v7026_v11  ;;  %4542 = vmatpush1.bf16.msra.mxu1 %v7028_v43  ;;  %v7076_v11 = vpack.c.bf16 %v208_v63, %v204_v5  ;;  %v7098_v5 = vpack.c.bf16 %v205_v16, %v201_v23  ;;  %v7100_v63 = vpack.c.bf16 %v207_v6, %v203_v19  ;;  %v211_v16 = vld [vmem:[%s8138_s3 + $0x190] sm:$0xff]  ;;  %v218_v19 = vld [vmem:[%s8138_s3 + $0x1c8] sm:$0xff] }
 0x135   :  { %4512 = vmatprep.subr.bf16.mxu0 %v7038_v3  ;;  %4544 = vmatprep.subr.bf16.mxu1 %v7040_v20  ;;  %v209_v20 = vld [vmem:[%s8138_s3 + $0x180] sm:$0xff]  ;;  %v7110_v43 = vpack.c.bf16 %v214_v61, %v210_v44  ;;  %v215_v23 = vld [vmem:[%s8138_s3 + $0x1b0] sm:$0xff]  ;;  %v222_v6 = vld [vmem:[%s8138_s3 + $0x1e8] sm:$0xff] }
 0x136   :  { %8381 = vst [vmem:[#allocation79_spill] sm:$0xff] %v7076_v11  ;;  %8382 = vst [vmem:[#allocation80_spill] sm:$0xff] %v7100_v63  ;;  %v213_v3 = vld [vmem:[%s8138_s3 + $0x1a0] sm:$0xff]  ;;  %v220_v44 = vld [vmem:[%s8138_s3 + $0x1d8] sm:$0xff] }
 0x137   :  { %v224_v61 = vld [vmem:[%s8138_s3 + $0x1f8] sm:$0xff] }
 0x138   :  { %4514 = vmatpush1.bf16.msra.mxu0 %v7062_v54  ;;  %4546 = vmatpush1.bf16.msra.mxu1 %v7064_v34  ;;  %v7112_v54 = vpack.c.bf16 %v216_v51, %v212_v38  ;;  %v7134_v38 = vpack.c.bf16 %v213_v3, %v209_v20  ;;  %v7136_v51 = vpack.c.bf16 %v215_v23, %v211_v16  ;;  %v219_v3 = vld [vmem:[%s8138_s3 + $0x1d0] sm:$0xff] }
 0x139   :  { %4516 = vmatprep.subr.bf16.mxu0 %v7074_v29  ;;  %4548 = vmatprep.subr.bf16.mxu1 %v7076_v11  ;;  %v217_v11 = vld [vmem:[%s8138_s3 + $0x1c0] sm:$0xff]  ;;  %v7143_v29 = vpack.c.bf16 %v222_v6, %v218_v19  ;;  %v7145_v34 = vpack.c.bf16 %v224_v61, %v220_v44  ;;  %v223_v20 = vld [vmem:[%s8138_s3 + $0x1f0] sm:$0xff]  ;;  %v8386_v19 = vld [vmem:[#allocation41_spill] sm:$0xff] }
 0x13a   :  { %v7160_v23 = vpack.c.bf16 %v223_v20, %v219_v3  ;;  %v8387_v6 = vld [vmem:[#allocation42_spill] sm:$0xff]  ;;  %v8388_v44 = vld [vmem:[#allocation43_spill] sm:$0xff]  ;;  %v8389_v61 = vld [vmem:[#allocation44_spill] sm:$0xff] }
 0x13b   :  { %v8390_v3 = vld [vmem:[#allocation45_spill] sm:$0xff]  ;;  %v8391_v20 = vld [vmem:[#allocation46_spill] sm:$0xff] }
 0x13c   :  { %4518 = vmatpush1.bf16.msra.mxu0 %v7098_v5  ;;  %4550 = vmatpush1.bf16.msra.mxu1 %v7100_v63  ;;  %v221_v63 = vld [vmem:[%s8138_s3 + $0x1e0] sm:$0xff] }
 0x13d   :  { %4520 = vmatprep.subr.bf16.mxu0 %v7110_v43  ;;  %4552 = vmatprep.subr.bf16.mxu1 %v7112_v54  ;;  %v7158_v16 = vpack.c.bf16 %v221_v63, %v217_v11  ;;  %v8384_v11 = vld [vmem:[#allocation39_spill] sm:$0xff]  ;;  %v8385_v63 = vld [vmem:[#allocation40_spill] sm:$0xff] }
 0x140   :  { %4522 = vmatpush1.bf16.msra.mxu0 %v7134_v38  ;;  %4554 = vmatpush1.bf16.msra.mxu1 %v7136_v51 }
 0x141   :  { %4524 = vmatprep.subr.bf16.mxu0 %v7143_v29  ;;  %4556 = vmatprep.subr.bf16.mxu1 %v7145_v34 }
 0x144   :  { %4526 = vmatpush1.bf16.msra.mxu0 %v7158_v16  ;;  %4558 = vmatpush1.bf16.msra.mxu1 %v7160_v23 }
 0x145   :  { %4560 = vmatprep.subr.bf16.mxu0 %v6286_v4  ;;  %4592 = vmatprep.subr.bf16.mxu1 %v6338_v22 }
 0x147   :  { %638 = vmatmul.mubr.f32.vlgmr.msra.gmra.mrb[2].mxu0 %v8369_v35  ;;  %709 = vmatmul.mubr.f32.vlgmr.msra.gmra.mrb[2].mxu1 %v8369_v35 }
 0x148   :  { %4562 = vmatpush1.bf16.msra.mxu0 %v6297_v8  ;;  %4594 = vmatpush1.bf16.msra.mxu1 %v6346_v25 }
 0x149   :  { %4564 = vmatprep.subr.bf16.mxu0 %v6299_v9  ;;  %4596 = vmatprep.subr.bf16.mxu1 %v6371_v33 }
 0x14a   :  { %817 = vmatprep.mubr.f32.mxu0 %v8369_v35  ;;  %888 = vmatprep.mubr.f32.mxu1 %v8369_v35 }
 0x14c   :  { %4566 = vmatpush1.bf16.msra.mxu0 %v6315_v14  ;;  %4598 = vmatpush1.bf16.msra.mxu1 %v6382_v37 }
 0x14d   :  { %4568 = vmatprep.subr.bf16.mxu0 %v6324_v17  ;;  %4600 = vmatprep.subr.bf16.mxu1 %v6406_v45 }
 0x150   :  { %4570 = vmatpush1.bf16.msra.mxu0 %v6349_v26  ;;  %4602 = vmatpush1.bf16.msra.mxu1 %v6415_v48 }
 0x151   :  { %4572 = vmatprep.subr.bf16.mxu0 %v6362_v30  ;;  %4604 = vmatprep.subr.bf16.mxu1 %v6427_v52 }
 0x154   :  { %4574 = vmatpush1.bf16.msra.mxu0 %v6398_v42  ;;  %4606 = vmatpush1.bf16.msra.mxu1 %v6457_v62 }
 0x155   :  { %4576 = vmatprep.subr.bf16.mxu0 %v6409_v46  ;;  %4608 = vmatprep.subr.bf16.mxu1 %v6463_v0 }
 0x158   :  { %4578 = vmatpush1.bf16.msra.mxu0 %v6436_v55  ;;  %4610 = vmatpush1.bf16.msra.mxu1 %v6493_v15 }
 0x159   :  { %4580 = vmatprep.subr.bf16.mxu0 %v6445_v58  ;;  %4612 = vmatprep.subr.bf16.mxu1 %v6499_v18 }
 0x15c   :  { %4582 = vmatpush1.bf16.msra.mxu0 %v6478_v7  ;;  %4614 = vmatpush1.bf16.msra.mxu1 %v6526_v31 }
 0x15d   :  { %4584 = vmatprep.subr.bf16.mxu0 %v6481_v10  ;;  %4616 = vmatprep.subr.bf16.mxu1 %v6529_v32 }
 0x160   :  { %4586 = vmatpush1.bf16.msra.mxu0 %v6514_v24  ;;  %4618 = vmatpush1.bf16.msra.mxu1 %v6548_v40 }
 0x161   :  { %4588 = vmatprep.subr.bf16.mxu0 %v6517_v27  ;;  %4620 = vmatprep.subr.bf16.mxu1 %v6551_v41 }
 0x164   :  { %4590 = vmatpush1.bf16.msra.mxu0 %v6544_v39  ;;  %4622 = vmatpush1.bf16.msra.mxu1 %v6561_v47 }
 0x165   :  { %4624 = vmatprep.subr.bf16.mxu0 %v6578_v53  ;;  %4656 = vmatprep.subr.bf16.mxu1 %v6589_v59 }
 0x167   :  { %818 = vmatmul.mubr.f32.vlgmr.msra.gmra.mrb[4].mxu0 %v6924_v57  ;;  %889 = vmatmul.mubr.f32.vlgmr.msra.gmra.mrb[4].mxu1 %v6924_v57  ;;  %v8383_v57 = vld [vmem:[#allocation38_spill] sm:$0xff] }
 0x168   :  { %4626 = vmatpush1.bf16.msra.mxu0 %v6591_v60  ;;  %4658 = vmatpush1.bf16.msra.mxu1 %v6600_v1 }
 0x169   :  { %4628 = vmatprep.subr.bf16.mxu0 %v6617_v12  ;;  %4660 = vmatprep.subr.bf16.mxu1 %v6619_v13 }
 0x16a   :  { %991 = vmatprep.mubr.f32.mxu0 %v8369_v35  ;;  %1062 = vmatprep.mubr.f32.mxu1 %v8369_v35 }
 0x16c   :  { %4630 = vmatpush1.bf16.msra.mxu0 %v6630_v21  ;;  %4662 = vmatpush1.bf16.msra.mxu1 %v6637_v28 }
 0x16d   :  { %4632 = vmatprep.subr.bf16.mxu0 %v6649_v36  ;;  %4664 = vmatprep.subr.bf16.mxu1 %v6661_v49 }
 0x170   :  { %4634 = vmatpush1.bf16.msra.mxu0 %v6663_v50  ;;  %4666 = vmatpush1.bf16.msra.mxu1 %v6672_v56  ;;  %v8392_v56 = vld [vmem:[#allocation47_spill] sm:$0xff] }
 0x171   :  { %4636 = vmatprep.subr.bf16.mxu0 %v6685_v2  ;;  %4668 = vmatprep.subr.bf16.mxu1 %v8383_v57  ;;  %v8393_v2 = vld [vmem:[#allocation48_spill] sm:$0xff]  ;;  %v8394_v57 = vld [vmem:[#allocation49_spill] sm:$0xff] }
 0x174   :  { %4638 = vmatpush1.bf16.msra.mxu0 %v8384_v11  ;;  %4670 = vmatpush1.bf16.msra.mxu1 %v8385_v63  ;;  %v8395_v11 = vld [vmem:[#allocation50_spill] sm:$0xff]  ;;  %v8396_v63 = vld [vmem:[#allocation51_spill] sm:$0xff] }
 0x175   :  { %4640 = vmatprep.subr.bf16.mxu0 %v8386_v19  ;;  %4672 = vmatprep.subr.bf16.mxu1 %v8387_v6  ;;  %v8397_v19 = vld [vmem:[#allocation52_spill] sm:$0xff]  ;;  %v8398_v6 = vld [vmem:[#allocation53_spill] sm:$0xff] }
 0x178   :  { %4642 = vmatpush1.bf16.msra.mxu0 %v8388_v44  ;;  %4674 = vmatpush1.bf16.msra.mxu1 %v8389_v61  ;;  %v8399_v44 = vld [vmem:[#allocation54_spill] sm:$0xff]  ;;  %v8400_v61 = vld [vmem:[#allocation55_spill] sm:$0xff] }
 0x179   :  { %4644 = vmatprep.subr.bf16.mxu0 %v8390_v3  ;;  %4676 = vmatprep.subr.bf16.mxu1 %v8391_v20  ;;  %v8401_v3 = vld [vmem:[#allocation56_spill] sm:$0xff]  ;;  %v8402_v20 = vld [vmem:[#allocation57_spill] sm:$0xff] }
 0x17c   :  { %4646 = vmatpush1.bf16.msra.mxu0 %v8392_v56  ;;  %4678 = vmatpush1.bf16.msra.mxu1 %v8393_v2  ;;  %v8403_v56 = vld [vmem:[#allocation58_spill] sm:$0xff]  ;;  %v549_v2 = vlaneseq }
 0x17d   :  { %4648 = vmatprep.subr.bf16.mxu0 %v8394_v57  ;;  %4680 = vmatprep.subr.bf16.mxu1 %v8395_v11 }
 0x17e   :  { %v550_v57 = vshrl.u32 %v549_v2, 7 }
 0x180   :  { %4650 = vmatpush1.bf16.msra.mxu0 %v8396_v63  ;;  %4682 = vmatpush1.bf16.msra.mxu1 %v8397_v19  ;;  %v551_v50 = vsub.s32 0, %v550_v57  ;;  %v225_v63 = vld [vmem:[%s8140_s4] sm:$0xf]  ;;  %v555_v19 = vsub.s32 1, %v550_v57  ;;  %v563_v49 = vsub.s32 3, %v550_v57  ;;  %v559_v13 = vsub.s32 2, %v550_v57 }
 0x181   :  { %4652 = vmatprep.subr.bf16.mxu0 %v8398_v6  ;;  %4684 = vmatprep.subr.bf16.mxu1 %v8399_v44 }
 0x182   :  { %v7243_v11 = vrot.slane %v225_v63, %v551_v50  ;;  %v7245_v6 = vrot.slane %v225_v63, %v555_v19  ;;  %v7249_v21 = vrot.slane %v225_v63, %v563_v49  ;;  %v7252_v19 = vrot.slane %v225_v63, %v559_v13  ;;  %v4290_v13 = vld [vmem:[%s8139_s0 + $0x20] sm:$0xff] }
 0x184   :  { %4654 = vmatpush1.bf16.msra.mxu0 %v8400_v61  ;;  %4686 = vmatpush1.bf16.msra.mxu1 %v8401_v3  ;;  %8404 = vst [vmem:[#allocation81_spill] sm:$0xff] %v7243_v11  ;;  %8405 = vst [vmem:[#allocation82_spill] sm:$0xff] %v7245_v6 }
 0x185   :  { %4688 = vmatprep.subr.bf16.mxu0 %v8402_v20  ;;  %4720 = vmatprep.subr.bf16.mxu1 %v8403_v56 }
 0x21a   :  { %v639_v44 = vpop.f32.mrb[2].mxu0  ;;  %v710_v61 = vpop.f32.mrb[2].mxu1 }
 0x21b   :  { %v5903_v3 = vadd.f32 %v639_v44, %v7243_v11  ;;  %v641_v20 = vpop.f32.mrb[3].mxu0  ;;  %v712_v36 = vpop.f32.mrb[3].mxu1  ;;  %v5905_v1 = vadd.f32 %v710_v61, %v7252_v19 }
 0x21c   :  { %v5904_v56 = vadd.f32 %v641_v20, %v7245_v6  ;;  %v5906_v50 = vadd.f32 %v712_v36, %v7249_v21 }
 0x21d   :  { %v4287_v2 = vmul.f32 -1.442695, %v5903_v3 }
 0x21e   :  { %v4288_v28 = vmul.f32 -1.442695, %v5904_v56  ;;  %v4289_v12 = vmul.f32 -1.442695, %v5906_v50 }
 0x21f   :  { %5984 = vpow2.f32 %v4287_v2 }
 0x220   :  { %5986 = vpow2.f32 %v4288_v28 }
 0x221   :  { %5988 = vpow2.f32 %v4289_v12 }
 0x222   :  { %5990 = vtanh.f32 %v5905_v1 }
 0x229   :  { %v5985_v60 = vpop.eup %5984 }
 0x22a   :  { %v5987_v44 = vpop.eup %5986  ;;  %v722_v11 = vadd.f32 1.0, %v5985_v60  ;;  %v4291_v60 = vld [vmem:[%s8139_s0 + $0x28] sm:$0xff] }
 0x22b   :  { %v728_v20 = vadd.f32 1.0, %v5987_v44  ;;  %v5989_v49 = vpop.eup %5988 }
 0x22c   :  { %5992 = vrcp.f32 %v722_v11  ;;  %v5991_v56 = vpop.eup %5990  ;;  %v735_v2 = vadd.f32 1.0, %v5989_v49 }
 0x22d   :  { %5994 = vrcp.f32 %v728_v20 }
 0x22e   :  { %5996 = vrcp.f32 %v735_v2 }
 0x236   :  { %v5993_v3 = vpop.eup %5992 }
 0x237   :  { %v5995_v57 = vpop.eup %5994  ;;  %v739_v28 = vmul.f32 %v5993_v3, %v5991_v56  ;;  %v4293_v56 = vld [vmem:[%s8139_s0 + $0x38] sm:$0xff] }
 0x238   :  { %v738_v36 = vmul.f32 0.0, %v5995_v57  ;;  %v4292_v57 = vld [vmem:[%s8139_s0 + $0x30] sm:$0xff] }
 0x23a   :  { %v7261_v12 = vadd.f32 %v739_v28, %v738_v36  ;;  %v819_v1 = vpop.f32.mrb[4].mxu0  ;;  %v890_v11 = vpop.f32.mrb[4].mxu1 }
 0x23b   :  { %v895_v63 = vadd.f32 %v4290_v13, %v819_v1  ;;  %v821_v61 = vpop.f32.mrb[5].mxu0  ;;  %v892_v50 = vpop.f32.mrb[5].mxu1  ;;  %v897_v13 = vadd.f32 %v4292_v57, %v890_v11  ;;  %v8407_v11 = vld [vmem:[#allocation59_spill] sm:$0xff] }
 0x23c   :  { %8406 = vst [vmem:[#allocation83_spill] sm:$0xff] %v7261_v12  ;;  %5998 = vtanh.f32 %v7261_v12  ;;  %v896_v44 = vadd.f32 %v4291_v60, %v821_v61  ;;  %v898_v3 = vadd.f32 %v4293_v56, %v892_v50  ;;  %v5997_v28 = vpop.eup %5996 }
 0x23d   :  { %v4294_v20 = vmul.f32 -1.442695, %v895_v63 }
 0x23e   :  { %v4295_v49 = vmul.f32 -1.442695, %v896_v44  ;;  %v4296_v36 = vmul.f32 -1.442695, %v898_v3 }
 0x23f   :  { %6000 = vpow2.f32 %v4294_v20 }
 0x240   :  { %6002 = vpow2.f32 %v4295_v49 }
 0x241   :  { %6004 = vpow2.f32 %v4296_v36 }
 0x242   :  { %6006 = vtanh.f32 %v897_v13  ;;  %v8408_v13 = vld [vmem:[#allocation60_spill] sm:$0xff] }
 0x246   :  { %v5999_v2 = vpop.eup %5998 }
 0x247   :  { %v742_v1 = vmul.f32 %v5999_v2, %v5997_v28 }
 0x249   :  { %v6001_v12 = vpop.eup %6000  ;;  %745 = vst [vmem:[%s8141_s5] sm:$0xff] %v742_v1 }
 0x24a   :  { %v6003_v60 = vpop.eup %6002  ;;  %v902_v63 = vadd.f32 1.0, %v6001_v12 }
 0x24b   :  { %v908_v61 = vadd.f32 1.0, %v6003_v60  ;;  %v6005_v50 = vpop.eup %6004  ;;  %v8409_v60 = vld [vmem:[#allocation61_spill] sm:$0xff] }
 0x24c   :  { %6008 = vrcp.f32 %v902_v63  ;;  %v6007_v44 = vpop.eup %6006  ;;  %v915_v3 = vadd.f32 1.0, %v6005_v50  ;;  %v8410_v63 = vld [vmem:[#allocation62_spill] sm:$0xff]  ;;  %v8412_v50 = vld [vmem:[#allocation64_spill] sm:$0xff] }
 0x24d   :  { %6010 = vrcp.f32 %v908_v61  ;;  %v8411_v61 = vld [vmem:[#allocation63_spill] sm:$0xff] }
 0x24e   :  { %6012 = vrcp.f32 %v915_v3  ;;  %v8417_v3 = vld [vmem:[#allocation69_spill] sm:$0xff] }
 0x256   :  { %v6009_v20 = vpop.eup %6008 }
 0x257   :  { %v6011_v49 = vpop.eup %6010  ;;  %v919_v56 = vmul.f32 %v6009_v20, %v6007_v44  ;;  %v8413_v44 = vld [vmem:[#allocation65_spill] sm:$0xff]  ;;  %v8414_v20 = vld [vmem:[#allocation66_spill] sm:$0xff] }
 0x258   :  { %v918_v57 = vmul.f32 %v6011_v49, %v8407_v11  ;;  %v6013_v2 = vpop.eup %6012  ;;  %v8415_v49 = vld [vmem:[#allocation67_spill] sm:$0xff]  ;;  %v8418_v11 = vld [vmem:[#allocation70_spill] sm:$0xff] }
 0x25a   :  { %v7274_v28 = vadd.f32 %v919_v56, %v918_v57  ;;  %v8416_v56 = vld [vmem:[#allocation68_spill] sm:$0xff]  ;;  %v8419_v57 = vld [vmem:[#allocation71_spill] sm:$0xff] }
 0x25c   :  { %6014 = vtanh.f32 %v7274_v28 }
 0x266   :  { %v6015_v12 = vpop.eup %6014 }
 0x267   :  { %v7277_v36 = vmul.f32 %v6015_v12, %v6013_v2  ;;  %v8420_v2 = vld [vmem:[#allocation72_spill] sm:$0xff]  ;;  %v8421_v12 = vld [vmem:[#allocation73_spill] sm:$0xff] }
 0x269   :  { %992 = vmatmul.mubr.f32.vlgmr.msra.gmra.mrb[6].mxu0 %v7277_v36  ;;  %1063 = vmatmul.mubr.f32.vlgmr.msra.gmra.mrb[6].mxu1 %v7277_v36 }
 0x26a   :  { %4690 = vmatpush1.bf16.msra.mxu0 %v8408_v13  ;;  %4722 = vmatpush1.bf16.msra.mxu1 %v8409_v60 }
 0x26b   :  { %4692 = vmatprep.subr.bf16.mxu0 %v8410_v63  ;;  %4724 = vmatprep.subr.bf16.mxu1 %v8411_v61  ;;  %v8422_v61 = vld [vmem:[#allocation74_spill] sm:$0xff] }
 0x26c   :  { %1137 = vmatprep.mubr.f32.mxu0 %v8369_v35  ;;  %1208 = vmatprep.mubr.f32.mxu1 %v8369_v35 }
 0x26e   :  { %4694 = vmatpush1.bf16.msra.mxu0 %v8412_v50  ;;  %4726 = vmatpush1.bf16.msra.mxu1 %v8413_v44  ;;  %v8423_v50 = vld [vmem:[#allocation75_spill] sm:$0xff]  ;;  %v8424_v44 = vld [vmem:[#allocation76_spill] sm:$0xff] }
 0x26f   :  { %4696 = vmatprep.subr.bf16.mxu0 %v8414_v20  ;;  %4728 = vmatprep.subr.bf16.mxu1 %v8415_v49  ;;  %v8425_v20 = vld [vmem:[#allocation77_spill] sm:$0xff]  ;;  %v8426_v49 = vld [vmem:[#allocation78_spill] sm:$0xff] }
 0x272   :  { %4698 = vmatpush1.bf16.msra.mxu0 %v8416_v56  ;;  %4730 = vmatpush1.bf16.msra.mxu1 %v8417_v3  ;;  %v8427_v56 = vld [vmem:[#allocation79_spill] sm:$0xff] }
 0x273   :  { %4700 = vmatprep.subr.bf16.mxu0 %v8418_v11  ;;  %4732 = vmatprep.subr.bf16.mxu1 %v8419_v57  ;;  %v8428_v11 = vld [vmem:[#allocation80_spill] sm:$0xff] }
 0x276   :  { %4702 = vmatpush1.bf16.msra.mxu0 %v8420_v2  ;;  %4734 = vmatpush1.bf16.msra.mxu1 %v8421_v12 }
 0x277   :  { %4704 = vmatprep.subr.bf16.mxu0 %v8422_v61  ;;  %4736 = vmatprep.subr.bf16.mxu1 %v8423_v50 }
 0x27a   :  { %4706 = vmatpush1.bf16.msra.mxu0 %v8424_v44  ;;  %4738 = vmatpush1.bf16.msra.mxu1 %v8425_v20 }
 0x27b   :  { %4708 = vmatprep.subr.bf16.mxu0 %v8426_v49  ;;  %4740 = vmatprep.subr.bf16.mxu1 %v8427_v56 }
 0x27e   :  { %4710 = vmatpush1.bf16.msra.mxu0 %v7098_v5  ;;  %4742 = vmatpush1.bf16.msra.mxu1 %v8428_v11 }
 0x27f   :  { %4712 = vmatprep.subr.bf16.mxu0 %v7110_v43  ;;  %4744 = vmatprep.subr.bf16.mxu1 %v7112_v54 }
 0x282   :  { %4714 = vmatpush1.bf16.msra.mxu0 %v7134_v38  ;;  %4746 = vmatpush1.bf16.msra.mxu1 %v7136_v51 }
 0x283   :  { %4716 = vmatprep.subr.bf16.mxu0 %v7143_v29  ;;  %4748 = vmatprep.subr.bf16.mxu1 %v7145_v34 }
 0x286   :  { %4718 = vmatpush1.bf16.msra.mxu0 %v7158_v16  ;;  %4750 = vmatpush1.bf16.msra.mxu1 %v7160_v23 }
 0x287   :  { %4752 = vmatprep.subr.bf16.mxu0 %v6286_v4  ;;  %4784 = vmatprep.subr.bf16.mxu1 %v6338_v22 }
 0x289   :  { %1138 = vmatmul.mubr.f32.vlgmr.msra.gmra.mrb[6].mxu0 %v742_v1  ;;  %1209 = vmatmul.mubr.f32.vlgmr.msra.gmra.mrb[6].mxu1 %v742_v1  ;;  %v8429_v1 = vld [vmem:[#allocation27_spill] sm:$0xff] }
 0x28a   :  { %4754 = vmatpush1.bf16.msra.mxu0 %v6297_v8  ;;  %4786 = vmatpush1.bf16.msra.mxu1 %v6346_v25 }
 0x28b   :  { %4756 = vmatprep.subr.bf16.mxu0 %v6299_v9  ;;  %4788 = vmatprep.subr.bf16.mxu1 %v6371_v33 }
 0x28c   :  { %1318 = vmatprep.mubr.f32.mxu0 %v8369_v35  ;;  %1389 = vmatprep.mubr.f32.mxu1 %v8369_v35 }
 0x28e   :  { %4758 = vmatpush1.bf16.msra.mxu0 %v6315_v14  ;;  %4790 = vmatpush1.bf16.msra.mxu1 %v6382_v37 }
 0x28f   :  { %4760 = vmatprep.subr.bf16.mxu0 %v6324_v17  ;;  %4792 = vmatprep.subr.bf16.mxu1 %v6406_v45 }
 0x292   :  { %4762 = vmatpush1.bf16.msra.mxu0 %v6349_v26  ;;  %4794 = vmatpush1.bf16.msra.mxu1 %v6415_v48 }
 0x293   :  { %4764 = vmatprep.subr.bf16.mxu0 %v6362_v30  ;;  %4796 = vmatprep.subr.bf16.mxu1 %v6427_v52 }
 0x296   :  { %4766 = vmatpush1.bf16.msra.mxu0 %v6398_v42  ;;  %4798 = vmatpush1.bf16.msra.mxu1 %v6457_v62 }
 0x297   :  { %4768 = vmatprep.subr.bf16.mxu0 %v6409_v46  ;;  %4800 = vmatprep.subr.bf16.mxu1 %v6463_v0 }
 0x29a   :  { %4770 = vmatpush1.bf16.msra.mxu0 %v6436_v55  ;;  %4802 = vmatpush1.bf16.msra.mxu1 %v6493_v15 }
 0x29b   :  { %4772 = vmatprep.subr.bf16.mxu0 %v6445_v58  ;;  %4804 = vmatprep.subr.bf16.mxu1 %v6499_v18 }
 0x29e   :  { %4774 = vmatpush1.bf16.msra.mxu0 %v6478_v7  ;;  %4806 = vmatpush1.bf16.msra.mxu1 %v6526_v31 }
 0x29f   :  { %4776 = vmatprep.subr.bf16.mxu0 %v6481_v10  ;;  %4808 = vmatprep.subr.bf16.mxu1 %v6529_v32  ;;  %v8443_v32 = vld [vmem:[#allocation41_spill] sm:$0xff] }
 0x2a0   :  { %v8461_v10 = vld [vmem:[#allocation81_spill] sm:$0xff] }
 0x2a2   :  { %4778 = vmatpush1.bf16.msra.mxu0 %v6514_v24  ;;  %4810 = vmatpush1.bf16.msra.mxu1 %v6548_v40  ;;  %v8430_v24 = vld [vmem:[#allocation28_spill] sm:$0xff]  ;;  %v8431_v40 = vld [vmem:[#allocation29_spill] sm:$0xff] }
 0x2a3   :  { %4780 = vmatprep.subr.bf16.mxu0 %v6517_v27  ;;  %4812 = vmatprep.subr.bf16.mxu1 %v6551_v41  ;;  %v8432_v27 = vld [vmem:[#allocation30_spill] sm:$0xff]  ;;  %v8442_v41 = vld [vmem:[#allocation40_spill] sm:$0xff] }
 0x2a6   :  { %4782 = vmatpush1.bf16.msra.mxu0 %v6544_v39  ;;  %4814 = vmatpush1.bf16.msra.mxu1 %v6561_v47  ;;  %v8433_v47 = vld [vmem:[#allocation31_spill] sm:$0xff]  ;;  %v8436_v39 = vld [vmem:[#allocation34_spill] sm:$0xff] }
 0x2a7   :  { %4816 = vmatprep.subr.bf16.mxu0 %v6578_v53  ;;  %4848 = vmatprep.subr.bf16.mxu1 %v6589_v59  ;;  %v8434_v53 = vld [vmem:[#allocation32_spill] sm:$0xff]  ;;  %v8435_v59 = vld [vmem:[#allocation33_spill] sm:$0xff] }
 0x2a9   :  { %1319 = vmatmul.mubr.f32.vlgmr.msra.gmra.mrb[8].mxu0 %v7277_v36  ;;  %1390 = vmatmul.mubr.f32.vlgmr.msra.gmra.mrb[8].mxu1 %v7277_v36  ;;  %v8437_v36 = vld [vmem:[#allocation35_spill] sm:$0xff] }
 0x2aa   :  { %4818 = vmatpush1.bf16.msra.mxu0 %v8429_v1  ;;  %4850 = vmatpush1.bf16.msra.mxu1 %v8430_v24  ;;  %v8438_v1 = vld [vmem:[#allocation36_spill] sm:$0xff]  ;;  %v8439_v24 = vld [vmem:[#allocation37_spill] sm:$0xff] }
 0x2ab   :  { %4820 = vmatprep.subr.bf16.mxu0 %v8431_v40  ;;  %4852 = vmatprep.subr.bf16.mxu1 %v8432_v27  ;;  %v8440_v40 = vld [vmem:[#allocation38_spill] sm:$0xff]  ;;  %v8441_v27 = vld [vmem:[#allocation39_spill] sm:$0xff] }
 0x2ac   :  { %1492 = vmatprep.mubr.f32.mxu0 %v8369_v35  ;;  %1563 = vmatprep.mubr.f32.mxu1 %v8369_v35 }
 0x2ae   :  { %4822 = vmatpush1.bf16.msra.mxu0 %v8433_v47  ;;  %4854 = vmatpush1.bf16.msra.mxu1 %v8434_v53  ;;  %v8444_v47 = vld [vmem:[#allocation42_spill] sm:$0xff]  ;;  %v8445_v53 = vld [vmem:[#allocation43_spill] sm:$0xff] }
 0x2af   :  { %4824 = vmatprep.subr.bf16.mxu0 %v8435_v59  ;;  %4856 = vmatprep.subr.bf16.mxu1 %v8436_v39  ;;  %v8446_v59 = vld [vmem:[#allocation44_spill] sm:$0xff]  ;;  %v8447_v39 = vld [vmem:[#allocation45_spill] sm:$0xff] }
 0x2b2   :  { %4826 = vmatpush1.bf16.msra.mxu0 %v8437_v36  ;;  %4858 = vmatpush1.bf16.msra.mxu1 %v8438_v1  ;;  %v8448_v36 = vld [vmem:[#allocation46_spill] sm:$0xff]  ;;  %v8449_v1 = vld [vmem:[#allocation47_spill] sm:$0xff] }
 0x2b3   :  { %4828 = vmatprep.subr.bf16.mxu0 %v8439_v24  ;;  %4860 = vmatprep.subr.bf16.mxu1 %v8440_v40  ;;  %v8450_v24 = vld [vmem:[#allocation48_spill] sm:$0xff]  ;;  %v8451_v40 = vld [vmem:[#allocation49_spill] sm:$0xff] }
 0x2b6   :  { %4830 = vmatpush1.bf16.msra.mxu0 %v8441_v27  ;;  %4862 = vmatpush1.bf16.msra.mxu1 %v8442_v41  ;;  %v8452_v27 = vld [vmem:[#allocation50_spill] sm:$0xff]  ;;  %v8453_v41 = vld [vmem:[#allocation51_spill] sm:$0xff] }
 0x2b7   :  { %4832 = vmatprep.subr.bf16.mxu0 %v8443_v32  ;;  %4864 = vmatprep.subr.bf16.mxu1 %v8444_v47  ;;  %v8454_v32 = vld [vmem:[#allocation52_spill] sm:$0xff]  ;;  %v8455_v47 = vld [vmem:[#allocation53_spill] sm:$0xff] }
 0x2ba   :  { %4834 = vmatpush1.bf16.msra.mxu0 %v8445_v53  ;;  %4866 = vmatpush1.bf16.msra.mxu1 %v8446_v59  ;;  %v8456_v53 = vld [vmem:[#allocation54_spill] sm:$0xff]  ;;  %v8457_v59 = vld [vmem:[#allocation55_spill] sm:$0xff] }
 0x2bb   :  { %4836 = vmatprep.subr.bf16.mxu0 %v8447_v39  ;;  %4868 = vmatprep.subr.bf16.mxu1 %v8448_v36  ;;  %v8458_v39 = vld [vmem:[#allocation56_spill] sm:$0xff]  ;;  %v8459_v36 = vld [vmem:[#allocation57_spill] sm:$0xff] }
 0x2be   :  { %4838 = vmatpush1.bf16.msra.mxu0 %v8449_v1  ;;  %4870 = vmatpush1.bf16.msra.mxu1 %v8450_v24  ;;  %v8460_v1 = vld [vmem:[#allocation58_spill] sm:$0xff] }
 0x2bf   :  { %4840 = vmatprep.subr.bf16.mxu0 %v8451_v40  ;;  %4872 = vmatprep.subr.bf16.mxu1 %v8452_v27 }
 0x2c2   :  { %4842 = vmatpush1.bf16.msra.mxu0 %v8453_v41  ;;  %4874 = vmatpush1.bf16.msra.mxu1 %v8454_v32 }
 0x2c3   :  { %4844 = vmatprep.subr.bf16.mxu0 %v8455_v47  ;;  %4876 = vmatprep.subr.bf16.mxu1 %v8456_v53 }
 0x2c6   :  { %4846 = vmatpush1.bf16.msra.mxu0 %v8457_v59  ;;  %4878 = vmatpush1.bf16.msra.mxu1 %v8458_v39 }
 0x2c7   :  { %4880 = vmatprep.subr.bf16.mxu0 %v8459_v36  ;;  %4912 = vmatprep.subr.bf16.mxu1 %v8460_v1 }
 0x35c   :  { %v1139_v24 = vpop.f32.mrb[6].mxu0  ;;  %v1210_v40 = vpop.f32.mrb[6].mxu1 }
 0x35d   :  { %v5907_v27 = vadd.f32 %v1139_v24, %v8461_v10  ;;  %v1141_v31 = vpop.f32.mrb[7].mxu0  ;;  %v1212_v41 = vpop.f32.mrb[7].mxu1  ;;  %v5909_v39 = vadd.f32 %v1210_v40, %v7252_v19  ;;  %v4301_v40 = vld [vmem:[%s8139_s0 + $0x40] sm:$0xff] }
 0x35e   :  { %v5908_v32 = vadd.f32 %v1141_v31, %v7245_v6  ;;  %v5910_v59 = vadd.f32 %v1212_v41, %v7249_v21  ;;  %v4302_v41 = vld [vmem:[%s8139_s0 + $0x48] sm:$0xff] }
 0x35f   :  { %v4297_v7 = vmul.f32 -1.442695, %v5907_v27 }
 0x360   :  { %v4298_v47 = vmul.f32 -1.442695, %v5908_v32  ;;  %v4299_v53 = vmul.f32 -1.442695, %v5910_v59 }
 0x361   :  { %6016 = vpow2.f32 %v4297_v7 }
 0x362   :  { %6018 = vpow2.f32 %v4298_v47  ;;  %v8462_v47 = vld [vmem:[#allocation83_spill] sm:$0xff] }
 0x363   :  { %6020 = vpow2.f32 %v4299_v53 }
 0x364   :  { %6022 = vtanh.f32 %v5909_v39 }
 0x36b   :  { %v6017_v36 = vpop.eup %6016 }
 0x36c   :  { %v6019_v18 = vpop.eup %6018  ;;  %v1222_v1 = vadd.f32 1.0, %v6017_v36 }
 0x36d   :  { %v1228_v58 = vadd.f32 1.0, %v6019_v18  ;;  %v6021_v24 = vpop.eup %6020 }
 0x36e   :  { %6024 = vrcp.f32 %v1222_v1  ;;  %v6023_v10 = vpop.eup %6022  ;;  %v1235_v7 = vadd.f32 1.0, %v6021_v24 }
 0x36f   :  { %6026 = vrcp.f32 %v1228_v58 }
 0x370   :  { %6028 = vrcp.f32 %v1235_v7 }
 0x378   :  { %v6025_v31 = vpop.eup %6024 }
 0x379   :  { %v6027_v27 = vpop.eup %6026  ;;  %v1239_v32 = vmul.f32 %v6025_v31, %v6023_v10  ;;  %v4304_v31 = vld [vmem:[%s8139_s0 + $0x58] sm:$0xff] }
 0x37a   :  { %v1238_v6 = vmul.f32 %v6027_v27, %v8462_v47 }
 0x37c   :  { %v7396_v39 = vadd.f32 %v1239_v32, %v1238_v6  ;;  %v1320_v18 = vpop.f32.mrb[8].mxu0  ;;  %v1391_v58 = vpop.f32.mrb[8].mxu1  ;;  %v4303_v6 = vld [vmem:[%s8139_s0 + $0x50] sm:$0xff] }
 0x37d   :  { %v1396_v53 = vadd.f32 %v4301_v40, %v1320_v18  ;;  %v1322_v59 = vpop.f32.mrb[9].mxu0  ;;  %v1393_v1 = vpop.f32.mrb[9].mxu1  ;;  %v1398_v40 = vadd.f32 %v4303_v6, %v1391_v58 }
 0x37e   :  { %8463 = vst [vmem:[#allocation59_spill] sm:$0xff] %v7396_v39  ;;  %v1397_v10 = vadd.f32 %v4302_v41, %v1322_v59  ;;  %6030 = vtanh.f32 %v7396_v39  ;;  %v1399_v27 = vadd.f32 %v4304_v31, %v1393_v1  ;;  %v6029_v32 = vpop.eup %6028 }
 0x37f   :  { %v4305_v36 = vmul.f32 -1.442695, %v1396_v53 }
 0x380   :  { %v4306_v24 = vmul.f32 -1.442695, %v1397_v10  ;;  %v4307_v47 = vmul.f32 -1.442695, %v1399_v27 }
 0x381   :  { %6032 = vpow2.f32 %v4305_v36 }
 0x382   :  { %6034 = vpow2.f32 %v4306_v24 }
 0x383   :  { %6036 = vpow2.f32 %v4307_v47 }
 0x384   :  { %6038 = vtanh.f32 %v1398_v40  ;;  %v8466_v40 = vld [vmem:[#allocation65_spill] sm:$0xff] }
 0x388   :  { %v6031_v7 = vpop.eup %6030 }
 0x389   :  { %v1242_v41 = vmul.f32 %v6031_v7, %v6029_v32 }
 0x38b   :  { %v6033_v18 = vpop.eup %6032  ;;  %4300 = vst [vmem:[%s8141_s5 + $0x8] sm:$0xff] %v1242_v41 }
 0x38c   :  { %v6035_v53 = vpop.eup %6034  ;;  %v1403_v59 = vadd.f32 1.0, %v6033_v18  ;;  %v8467_v18 = vld [vmem:[#allocation66_spill] sm:$0xff] }
 0x38d   :  { %v1409_v10 = vadd.f32 1.0, %v6035_v53  ;;  %v6037_v1 = vpop.eup %6036  ;;  %v8468_v53 = vld [vmem:[#allocation67_spill] sm:$0xff] }
 0x38e   :  { %6040 = vrcp.f32 %v1403_v59  ;;  %v6039_v36 = vpop.eup %6038  ;;  %v1416_v27 = vadd.f32 1.0, %v6037_v1  ;;  %v8469_v59 = vld [vmem:[#allocation68_spill] sm:$0xff] }
 0x38f   :  { %6042 = vrcp.f32 %v1409_v10  ;;  %v8470_v10 = vld [vmem:[#allocation70_spill] sm:$0xff]  ;;  %v8472_v1 = vld [vmem:[#allocation16_spill] sm:$0xff] }
 0x390   :  { %6044 = vrcp.f32 %v1416_v27  ;;  %v8476_v27 = vld [vmem:[#allocation20_spill] sm:$0xff] }
 0x398   :  { %v6041_v24 = vpop.eup %6040 }
 0x399   :  { %v6043_v31 = vpop.eup %6042  ;;  %v1420_v39 = vmul.f32 %v6041_v24, %v6039_v36  ;;  %v8473_v36 = vld [vmem:[#allocation13_spill] sm:$0xff]  ;;  %v8474_v24 = vld [vmem:[#allocation19_spill] sm:$0xff] }
 0x39a   :  { %v1419_v58 = vmul.f32 %v6043_v31, %v7274_v28  ;;  %v6045_v32 = vpop.eup %6044  ;;  %v8464_v28 = vld [vmem:[#allocation63_spill] sm:$0xff]  ;;  %v8475_v31 = vld [vmem:[#allocation14_spill] sm:$0xff] }
 0x39c   :  { %v7409_v6 = vadd.f32 %v1420_v39, %v1419_v58  ;;  %v8465_v39 = vld [vmem:[#allocation64_spill] sm:$0xff]  ;;  %v8477_v58 = vld [vmem:[#allocation17_spill] sm:$0xff] }
 0x39e   :  { %6046 = vtanh.f32 %v7409_v6 }
 0x3a8   :  { %v6047_v7 = vpop.eup %6046 }
 0x3a9   :  { %v7412_v47 = vmul.f32 %v6047_v7, %v6045_v32  ;;  %v8478_v32 = vld [vmem:[#allocation22_spill] sm:$0xff] }
 0x3aa   :  { %v8479_v7 = vld [vmem:[#allocation18_spill] sm:$0xff] }
 0x3ab   :  { %1493 = vmatmul.mubr.f32.vlgmr.msra.gmra.mrb[10].mxu0 %v7412_v47  ;;  %1564 = vmatmul.mubr.f32.vlgmr.msra.gmra.mrb[10].mxu1 %v7412_v47 }
 0x3ac   :  { %4882 = vmatpush1.bf16.msra.mxu0 %v8408_v13  ;;  %4914 = vmatpush1.bf16.msra.mxu1 %v8409_v60 }
 0x3ad   :  { %4884 = vmatprep.subr.bf16.mxu0 %v8410_v63  ;;  %4916 = vmatprep.subr.bf16.mxu1 %v8464_v28 }
 0x3ae   :  { %1638 = vmatprep.mubr.f32.mxu0 %v8369_v35  ;;  %1709 = vmatprep.mubr.f32.mxu1 %v8369_v35 }
 0x3b0   :  { %4886 = vmatpush1.bf16.msra.mxu0 %v8465_v39  ;;  %4918 = vmatpush1.bf16.msra.mxu1 %v8466_v40 }
 0x3b1   :  { %4888 = vmatprep.subr.bf16.mxu0 %v8467_v18  ;;  %4920 = vmatprep.subr.bf16.mxu1 %v8468_v53 }
 0x3b4   :  { %4890 = vmatpush1.bf16.msra.mxu0 %v8469_v59  ;;  %4922 = vmatpush1.bf16.msra.mxu1 %v8417_v3 }
 0x3b5   :  { %4892 = vmatprep.subr.bf16.mxu0 %v8470_v10  ;;  %4924 = vmatprep.subr.bf16.mxu1 %v8419_v57 }
 0x3b8   :  { %4894 = vmatpush1.bf16.msra.mxu0 %v8420_v2  ;;  %4926 = vmatpush1.bf16.msra.mxu1 %v8421_v12 }
 0x3b9   :  { %4896 = vmatprep.subr.bf16.mxu0 %v8422_v61  ;;  %4928 = vmatprep.subr.bf16.mxu1 %v8423_v50 }
 0x3bc   :  { %4898 = vmatpush1.bf16.msra.mxu0 %v8424_v44  ;;  %4930 = vmatpush1.bf16.msra.mxu1 %v8425_v20 }
 0x3bd   :  { %4900 = vmatprep.subr.bf16.mxu0 %v8426_v49  ;;  %4932 = vmatprep.subr.bf16.mxu1 %v8427_v56 }
 0x3c0   :  { %4902 = vmatpush1.bf16.msra.mxu0 %v7098_v5  ;;  %4934 = vmatpush1.bf16.msra.mxu1 %v8428_v11 }
 0x3c1   :  { %4904 = vmatprep.subr.bf16.mxu0 %v7110_v43  ;;  %4936 = vmatprep.subr.bf16.mxu1 %v7112_v54 }
 0x3c4   :  { %4906 = vmatpush1.bf16.msra.mxu0 %v7134_v38  ;;  %4938 = vmatpush1.bf16.msra.mxu1 %v7136_v51 }
 0x3c5   :  { %4908 = vmatprep.subr.bf16.mxu0 %v7143_v29  ;;  %4940 = vmatprep.subr.bf16.mxu1 %v7145_v34 }
 0x3c8   :  { %4910 = vmatpush1.bf16.msra.mxu0 %v7158_v16  ;;  %4942 = vmatpush1.bf16.msra.mxu1 %v7160_v23 }
 0x3c9   :  { %4944 = vmatprep.subr.bf16.mxu0 %v6286_v4  ;;  %4976 = vmatprep.subr.bf16.mxu1 %v6338_v22 }
 0x3cb   :  { %1639 = vmatmul.mubr.f32.vlgmr.msra.gmra.mrb[10].mxu0 %v1242_v41  ;;  %1710 = vmatmul.mubr.f32.vlgmr.msra.gmra.mrb[10].mxu1 %v1242_v41  ;;  %v8471_v41 = vld [vmem:[#allocation10_spill] sm:$0xff] }
 0x3cc   :  { %4946 = vmatpush1.bf16.msra.mxu0 %v6297_v8  ;;  %4978 = vmatpush1.bf16.msra.mxu1 %v6346_v25 }
 0x3cd   :  { %4948 = vmatprep.subr.bf16.mxu0 %v6299_v9  ;;  %4980 = vmatprep.subr.bf16.mxu1 %v6371_v33 }
 0x3ce   :  { %1819 = vmatprep.mubr.f32.mxu0 %v8369_v35  ;;  %1890 = vmatprep.mubr.f32.mxu1 %v8369_v35 }
 0x3d0   :  { %4950 = vmatpush1.bf16.msra.mxu0 %v6315_v14  ;;  %4982 = vmatpush1.bf16.msra.mxu1 %v6382_v37 }
 0x3d1   :  { %4952 = vmatprep.subr.bf16.mxu0 %v6324_v17  ;;  %4984 = vmatprep.subr.bf16.mxu1 %v6406_v45 }
 0x3d4   :  { %4954 = vmatpush1.bf16.msra.mxu0 %v6349_v26  ;;  %4986 = vmatpush1.bf16.msra.mxu1 %v6415_v48 }
 0x3d5   :  { %4956 = vmatprep.subr.bf16.mxu0 %v6362_v30  ;;  %4988 = vmatprep.subr.bf16.mxu1 %v6427_v52 }
 0x3d8   :  { %4958 = vmatpush1.bf16.msra.mxu0 %v6398_v42  ;;  %4990 = vmatpush1.bf16.msra.mxu1 %v6457_v62 }
 0x3d9   :  { %4960 = vmatprep.subr.bf16.mxu0 %v6409_v46  ;;  %4992 = vmatprep.subr.bf16.mxu1 %v6463_v0  ;;  %v8518_v46 = vld [vmem:[#allocation82_spill] sm:$0xff] }
 0x3dc   :  { %4962 = vmatpush1.bf16.msra.mxu0 %v6436_v55  ;;  %4994 = vmatpush1.bf16.msra.mxu1 %v6493_v15  ;;  %v8480_v55 = vld [vmem:[#allocation23_spill] sm:$0xff]  ;;  %v8481_v15 = vld [vmem:[#allocation21_spill] sm:$0xff] }
 0x3dd   :  { %4964 = vmatprep.subr.bf16.mxu0 %v8471_v41  ;;  %4996 = vmatprep.subr.bf16.mxu1 %v8472_v1  ;;  %v8482_v41 = vld [vmem:[#allocation24_spill] sm:$0xff]  ;;  %v8483_v1 = vld [vmem:[#allocation25_spill] sm:$0xff] }
 0x3e0   :  { %4966 = vmatpush1.bf16.msra.mxu0 %v8473_v36  ;;  %4998 = vmatpush1.bf16.msra.mxu1 %v8474_v24  ;;  %v8484_v36 = vld [vmem:[#allocation26_spill] sm:$0xff]  ;;  %v8517_v24 = vld [vmem:[#allocation81_spill] sm:$0xff] }
 0x3e1   :  { %4968 = vmatprep.subr.bf16.mxu0 %v8475_v31  ;;  %5000 = vmatprep.subr.bf16.mxu1 %v8476_v27  ;;  %v8485_v27 = vld [vmem:[#allocation27_spill] sm:$0xff]  ;;  %v8499_v31 = vld [vmem:[#allocation41_spill] sm:$0xff] }
 0x3e4   :  { %4970 = vmatpush1.bf16.msra.mxu0 %v8477_v58  ;;  %5002 = vmatpush1.bf16.msra.mxu1 %v8478_v32  ;;  %v8486_v58 = vld [vmem:[#allocation28_spill] sm:$0xff]  ;;  %v8487_v32 = vld [vmem:[#allocation29_spill] sm:$0xff] }
 0x3e5   :  { %4972 = vmatprep.subr.bf16.mxu0 %v8479_v7  ;;  %5004 = vmatprep.subr.bf16.mxu1 %v8480_v55  ;;  %v8488_v7 = vld [vmem:[#allocation30_spill] sm:$0xff]  ;;  %v8498_v55 = vld [vmem:[#allocation40_spill] sm:$0xff] }
 0x3e8   :  { %4974 = vmatpush1.bf16.msra.mxu0 %v8481_v15  ;;  %5006 = vmatpush1.bf16.msra.mxu1 %v8482_v41  ;;  %v8489_v41 = vld [vmem:[#allocation31_spill] sm:$0xff]  ;;  %v8492_v15 = vld [vmem:[#allocation34_spill] sm:$0xff] }
 0x3e9   :  { %5008 = vmatprep.subr.bf16.mxu0 %v8483_v1  ;;  %5040 = vmatprep.subr.bf16.mxu1 %v8484_v36  ;;  %v8490_v1 = vld [vmem:[#allocation32_spill] sm:$0xff]  ;;  %v8491_v36 = vld [vmem:[#allocation33_spill] sm:$0xff] }
 0x3eb   :  { %1820 = vmatmul.mubr.f32.vlgmr.msra.gmra.mrb[12].mxu0 %v7412_v47  ;;  %1891 = vmatmul.mubr.f32.vlgmr.msra.gmra.mrb[12].mxu1 %v7412_v47  ;;  %v8493_v47 = vld [vmem:[#allocation35_spill] sm:$0xff] }
 0x3ec   :  { %5010 = vmatpush1.bf16.msra.mxu0 %v8485_v27  ;;  %5042 = vmatpush1.bf16.msra.mxu1 %v8486_v58  ;;  %v8494_v27 = vld [vmem:[#allocation36_spill] sm:$0xff]  ;;  %v8495_v58 = vld [vmem:[#allocation37_spill] sm:$0xff] }
 0x3ed   :  { %5012 = vmatprep.subr.bf16.mxu0 %v8487_v32  ;;  %5044 = vmatprep.subr.bf16.mxu1 %v8488_v7  ;;  %v8496_v32 = vld [vmem:[#allocation38_spill] sm:$0xff]  ;;  %v8497_v7 = vld [vmem:[#allocation39_spill] sm:$0xff] }
 0x3ee   :  { %1993 = vmatprep.mubr.f32.mxu0 %v8369_v35  ;;  %2064 = vmatprep.mubr.f32.mxu1 %v8369_v35 }
 0x3f0   :  { %5014 = vmatpush1.bf16.msra.mxu0 %v8489_v41  ;;  %5046 = vmatpush1.bf16.msra.mxu1 %v8490_v1  ;;  %v8500_v41 = vld [vmem:[#allocation42_spill] sm:$0xff]  ;;  %v8501_v1 = vld [vmem:[#allocation43_spill] sm:$0xff] }
 0x3f1   :  { %5016 = vmatprep.subr.bf16.mxu0 %v8491_v36  ;;  %5048 = vmatprep.subr.bf16.mxu1 %v8492_v15  ;;  %v8502_v36 = vld [vmem:[#allocation44_spill] sm:$0xff]  ;;  %v8503_v15 = vld [vmem:[#allocation45_spill] sm:$0xff] }
 0x3f4   :  { %5018 = vmatpush1.bf16.msra.mxu0 %v8493_v47  ;;  %5050 = vmatpush1.bf16.msra.mxu1 %v8494_v27  ;;  %v8504_v47 = vld [vmem:[#allocation46_spill] sm:$0xff]  ;;  %v8505_v27 = vld [vmem:[#allocation47_spill] sm:$0xff] }
 0x3f5   :  { %5020 = vmatprep.subr.bf16.mxu0 %v8495_v58  ;;  %5052 = vmatprep.subr.bf16.mxu1 %v8496_v32  ;;  %v8506_v58 = vld [vmem:[#allocation48_spill] sm:$0xff]  ;;  %v8507_v32 = vld [vmem:[#allocation49_spill] sm:$0xff] }
 0x3f8   :  { %5022 = vmatpush1.bf16.msra.mxu0 %v8497_v7  ;;  %5054 = vmatpush1.bf16.msra.mxu1 %v8498_v55  ;;  %v8508_v7 = vld [vmem:[#allocation50_spill] sm:$0xff]  ;;  %v8509_v55 = vld [vmem:[#allocation51_spill] sm:$0xff] }
 0x3f9   :  { %5024 = vmatprep.subr.bf16.mxu0 %v8499_v31  ;;  %5056 = vmatprep.subr.bf16.mxu1 %v8500_v41  ;;  %v8510_v31 = vld [vmem:[#allocation52_spill] sm:$0xff]  ;;  %v8511_v41 = vld [vmem:[#allocation53_spill] sm:$0xff] }
 0x3fc   :  { %5026 = vmatpush1.bf16.msra.mxu0 %v8501_v1  ;;  %5058 = vmatpush1.bf16.msra.mxu1 %v8502_v36  ;;  %v8512_v1 = vld [vmem:[#allocation54_spill] sm:$0xff]  ;;  %v8513_v36 = vld [vmem:[#allocation55_spill] sm:$0xff] }
 0x3fd   :  { %5028 = vmatprep.subr.bf16.mxu0 %v8503_v15  ;;  %5060 = vmatprep.subr.bf16.mxu1 %v8504_v47  ;;  %v8514_v15 = vld [vmem:[#allocation56_spill] sm:$0xff]  ;;  %v8515_v47 = vld [vmem:[#allocation57_spill] sm:$0xff] }
 0x400   :  { %5030 = vmatpush1.bf16.msra.mxu0 %v8505_v27  ;;  %5062 = vmatpush1.bf16.msra.mxu1 %v8506_v58  ;;  %v8516_v27 = vld [vmem:[#allocation58_spill] sm:$0xff] }
 0x401   :  { %5032 = vmatprep.subr.bf16.mxu0 %v8507_v32  ;;  %5064 = vmatprep.subr.bf16.mxu1 %v8508_v7 }
 0x404   :  { %5034 = vmatpush1.bf16.msra.mxu0 %v8509_v55  ;;  %5066 = vmatpush1.bf16.msra.mxu1 %v8510_v31 }
 0x405   :  { %5036 = vmatprep.subr.bf16.mxu0 %v8511_v41  ;;  %5068 = vmatprep.subr.bf16.mxu1 %v8512_v1 }
 0x408   :  { %5038 = vmatpush1.bf16.msra.mxu0 %v8513_v36  ;;  %5070 = vmatpush1.bf16.msra.mxu1 %v8514_v15 }
 0x409   :  { %5072 = vmatprep.subr.bf16.mxu0 %v8515_v47  ;;  %5104 = vmatprep.subr.bf16.mxu1 %v8516_v27 }
 0x49e   :  { %v1640_v58 = vpop.f32.mrb[10].mxu0  ;;  %v1711_v32 = vpop.f32.mrb[10].mxu1 }
 0x49f   :  { %v5911_v7 = vadd.f32 %v1640_v58, %v8517_v24  ;;  %v1642_v0 = vpop.f32.mrb[11].mxu0  ;;  %v1713_v55 = vpop.f32.mrb[11].mxu1  ;;  %v5913_v15 = vadd.f32 %v1711_v32, %v7252_v19 }
 0x4a0   :  { %v5912_v31 = vadd.f32 %v1642_v0, %v8518_v46  ;;  %v5914_v36 = vadd.f32 %v1713_v55, %v7249_v21  ;;  %v4312_v55 = vld [vmem:[%s8139_s0 + $0x60] sm:$0xff] }
 0x4a1   :  { %v4308_v62 = vmul.f32 -1.442695, %v5911_v7 }
 0x4a2   :  { %v4309_v41 = vmul.f32 -1.442695, %v5912_v31  ;;  %v4310_v1 = vmul.f32 -1.442695, %v5914_v36 }
 0x4a3   :  { %6048 = vpow2.f32 %v4308_v62 }
 0x4a4   :  { %6050 = vpow2.f32 %v4309_v41  ;;  %v8519_v41 = vld [vmem:[#allocation59_spill] sm:$0xff] }
 0x4a5   :  { %6052 = vpow2.f32 %v4310_v1  ;;  %v4313_v1 = vld [vmem:[%s8139_s0 + $0x68] sm:$0xff] }
 0x4a6   :  { %6054 = vtanh.f32 %v5913_v15 }
 0x4ad   :  { %v6049_v47 = vpop.eup %6048 }
 0x4ae   :  { %v6051_v42 = vpop.eup %6050  ;;  %v1723_v27 = vadd.f32 1.0, %v6049_v47 }
 0x4af   :  { %v1729_v52 = vadd.f32 1.0, %v6051_v42  ;;  %v6053_v58 = vpop.eup %6052 }
 0x4b0   :  { %6056 = vrcp.f32 %v1723_v27  ;;  %v6055_v24 = vpop.eup %6054  ;;  %v1736_v62 = vadd.f32 1.0, %v6053_v58 }
 0x4b1   :  { %6058 = vrcp.f32 %v1729_v52 }
 0x4b2   :  { %6060 = vrcp.f32 %v1736_v62 }
 0x4ba   :  { %v6057_v0 = vpop.eup %6056 }
 0x4bb   :  { %v6059_v7 = vpop.eup %6058  ;;  %v1740_v31 = vmul.f32 %v6057_v0, %v6055_v24  ;;  %v4315_v0 = vld [vmem:[%s8139_s0 + $0x78] sm:$0xff] }
 0x4bc   :  { %v1739_v46 = vmul.f32 %v6059_v7, %v8519_v41 }
 0x4be   :  { %v7531_v15 = vadd.f32 %v1740_v31, %v1739_v46  ;;  %v1821_v42 = vpop.f32.mrb[12].mxu0  ;;  %v1892_v52 = vpop.f32.mrb[12].mxu1  ;;  %v4314_v46 = vld [vmem:[%s8139_s0 + $0x70] sm:$0xff] }
 0x4bf   :  { %v1897_v36 = vadd.f32 %v4312_v55, %v1821_v42  ;;  %v1823_v27 = vpop.f32.mrb[13].mxu0  ;;  %v1894_v32 = vpop.f32.mrb[13].mxu1  ;;  %v1899_v55 = vadd.f32 %v4314_v46, %v1892_v52 }
 0x4c0   :  { %8520 = vst [vmem:[#allocation60_spill] sm:$0xff] %v7531_v15  ;;  %v1898_v24 = vadd.f32 %v4313_v1, %v1823_v27  ;;  %6062 = vtanh.f32 %v7531_v15  ;;  %v1900_v7 = vadd.f32 %v4315_v0, %v1894_v32  ;;  %v6061_v31 = vpop.eup %6060 }
 0x4c1   :  { %v4316_v47 = vmul.f32 -1.442695, %v1897_v36 }
 0x4c2   :  { %v4317_v58 = vmul.f32 -1.442695, %v1898_v24  ;;  %v4318_v41 = vmul.f32 -1.442695, %v1900_v7 }
 0x4c3   :  { %6064 = vpow2.f32 %v4316_v47 }
 0x4c4   :  { %6066 = vpow2.f32 %v4317_v58 }
 0x4c5   :  { %6068 = vpow2.f32 %v4318_v41 }
 0x4c6   :  { %6070 = vtanh.f32 %v1899_v55  ;;  %v8523_v55 = vld [vmem:[#allocation11_spill] sm:$0xff] }
 0x4ca   :  { %v6063_v62 = vpop.eup %6062 }
 0x4cb   :  { %v1743_v1 = vmul.f32 %v6063_v62, %v6061_v31 }
 0x4cd   :  { %v6065_v42 = vpop.eup %6064  ;;  %4311 = vst [vmem:[%s8141_s5 + $0x10] sm:$0xff] %v1743_v1 }
 0x4ce   :  { %v6067_v36 = vpop.eup %6066  ;;  %v1904_v27 = vadd.f32 1.0, %v6065_v42  ;;  %v8525_v42 = vld [vmem:[#allocation12_spill] sm:$0xff] }
 0x4cf   :  { %v1910_v24 = vadd.f32 1.0, %v6067_v36  ;;  %v6069_v32 = vpop.eup %6068  ;;  %v8526_v36 = vld [vmem:[#allocation9_spill] sm:$0xff] }
 0x4d0   :  { %6072 = vrcp.f32 %v1904_v27  ;;  %v6071_v47 = vpop.eup %6070  ;;  %v1917_v7 = vadd.f32 1.0, %v6069_v32  ;;  %v8527_v27 = vld [vmem:[#allocation15_spill] sm:$0xff]  ;;  %v8529_v32 = vld [vmem:[#allocation16_spill] sm:$0xff] }
 0x4d1   :  { %6074 = vrcp.f32 %v1910_v24  ;;  %v8528_v24 = vld [vmem:[#allocation10_spill] sm:$0xff] }
 0x4d2   :  { %6076 = vrcp.f32 %v1917_v7  ;;  %v8533_v7 = vld [vmem:[#allocation20_spill] sm:$0xff] }
 0x4da   :  { %v6073_v58 = vpop.eup %6072 }
 0x4db   :  { %v6075_v0 = vpop.eup %6074  ;;  %v1921_v15 = vmul.f32 %v6073_v58, %v6071_v47  ;;  %v8530_v47 = vld [vmem:[#allocation13_spill] sm:$0xff]  ;;  %v8531_v58 = vld [vmem:[#allocation19_spill] sm:$0xff] }
 0x4dc   :  { %v1920_v52 = vmul.f32 %v6075_v0, %v7409_v6  ;;  %v6077_v31 = vpop.eup %6076  ;;  %v8521_v6 = vld [vmem:[#allocation8_spill] sm:$0xff]  ;;  %v8532_v0 = vld [vmem:[#allocation14_spill] sm:$0xff] }
 0x4de   :  { %v7544_v46 = vadd.f32 %v1921_v15, %v1920_v52  ;;  %v8522_v15 = vld [vmem:[#allocation6_spill] sm:$0xff]  ;;  %v8534_v52 = vld [vmem:[#allocation17_spill] sm:$0xff] }
 0x4e0   :  { %6078 = vtanh.f32 %v7544_v46 }
 0x4ea   :  { %v6079_v62 = vpop.eup %6078 }
 0x4eb   :  { %v7547_v41 = vmul.f32 %v6079_v62, %v6077_v31  ;;  %v8535_v31 = vld [vmem:[#allocation22_spill] sm:$0xff] }
 0x4ec   :  { %v8536_v62 = vld [vmem:[#allocation18_spill] sm:$0xff] }
 0x4ed   :  { %1994 = vmatmul.mubr.f32.vlgmr.msra.gmra.mrb[14].mxu0 %v7547_v41  ;;  %2065 = vmatmul.mubr.f32.vlgmr.msra.gmra.mrb[14].mxu1 %v7547_v41 }
 0x4ee   :  { %5074 = vmatpush1.bf16.msra.mxu0 %v8408_v13  ;;  %5106 = vmatpush1.bf16.msra.mxu1 %v8409_v60 }
 0x4ef   :  { %5076 = vmatprep.subr.bf16.mxu0 %v8410_v63  ;;  %5108 = vmatprep.subr.bf16.mxu1 %v8464_v28 }
 0x4f0   :  { %2139 = vmatprep.mubr.f32.mxu0 %v8369_v35  ;;  %2210 = vmatprep.mubr.f32.mxu1 %v8369_v35 }
 0x4f2   :  { %5078 = vmatpush1.bf16.msra.mxu0 %v8465_v39  ;;  %5110 = vmatpush1.bf16.msra.mxu1 %v8466_v40 }
 0x4f3   :  { %5080 = vmatprep.subr.bf16.mxu0 %v8467_v18  ;;  %5112 = vmatprep.subr.bf16.mxu1 %v8468_v53 }
 0x4f6   :  { %5082 = vmatpush1.bf16.msra.mxu0 %v8469_v59  ;;  %5114 = vmatpush1.bf16.msra.mxu1 %v8417_v3 }
 0x4f7   :  { %5084 = vmatprep.subr.bf16.mxu0 %v8470_v10  ;;  %5116 = vmatprep.subr.bf16.mxu1 %v8419_v57 }
 0x4fa   :  { %5086 = vmatpush1.bf16.msra.mxu0 %v8420_v2  ;;  %5118 = vmatpush1.bf16.msra.mxu1 %v8421_v12 }
 0x4fb   :  { %5088 = vmatprep.subr.bf16.mxu0 %v8422_v61  ;;  %5120 = vmatprep.subr.bf16.mxu1 %v8423_v50 }
 0x4fe   :  { %5090 = vmatpush1.bf16.msra.mxu0 %v8424_v44  ;;  %5122 = vmatpush1.bf16.msra.mxu1 %v8425_v20 }
 0x4ff   :  { %5092 = vmatprep.subr.bf16.mxu0 %v8426_v49  ;;  %5124 = vmatprep.subr.bf16.mxu1 %v8427_v56 }
 0x502   :  { %5094 = vmatpush1.bf16.msra.mxu0 %v7098_v5  ;;  %5126 = vmatpush1.bf16.msra.mxu1 %v8428_v11 }
 0x503   :  { %5096 = vmatprep.subr.bf16.mxu0 %v7110_v43  ;;  %5128 = vmatprep.subr.bf16.mxu1 %v7112_v54 }
 0x506   :  { %5098 = vmatpush1.bf16.msra.mxu0 %v7134_v38  ;;  %5130 = vmatpush1.bf16.msra.mxu1 %v7136_v51 }
 0x507   :  { %5100 = vmatprep.subr.bf16.mxu0 %v7143_v29  ;;  %5132 = vmatprep.subr.bf16.mxu1 %v7145_v34 }
 0x50a   :  { %5102 = vmatpush1.bf16.msra.mxu0 %v7158_v16  ;;  %5134 = vmatpush1.bf16.msra.mxu1 %v7160_v23 }
 0x50b   :  { %5136 = vmatprep.subr.bf16.mxu0 %v6286_v4  ;;  %5168 = vmatprep.subr.bf16.mxu1 %v6338_v22 }
 0x50d   :  { %2140 = vmatmul.mubr.f32.vlgmr.msra.gmra.mrb[14].mxu0 %v1743_v1  ;;  %2211 = vmatmul.mubr.f32.vlgmr.msra.gmra.mrb[14].mxu1 %v1743_v1  ;;  %v8524_v1 = vld [vmem:[#allocation7_spill] sm:$0xff] }
 0x50e   :  { %5138 = vmatpush1.bf16.msra.mxu0 %v6297_v8  ;;  %5170 = vmatpush1.bf16.msra.mxu1 %v6346_v25 }
 0x50f   :  { %5140 = vmatprep.subr.bf16.mxu0 %v6299_v9  ;;  %5172 = vmatprep.subr.bf16.mxu1 %v6371_v33 }
 0x510   :  { %2320 = vmatprep.mubr.f32.mxu0 %v8369_v35  ;;  %2391 = vmatprep.mubr.f32.mxu1 %v8369_v35 }
 0x512   :  { %5142 = vmatpush1.bf16.msra.mxu0 %v6315_v14  ;;  %5174 = vmatpush1.bf16.msra.mxu1 %v6382_v37 }
 0x513   :  { %5144 = vmatprep.subr.bf16.mxu0 %v6324_v17  ;;  %5176 = vmatprep.subr.bf16.mxu1 %v6406_v45 }
 0x516   :  { %5146 = vmatpush1.bf16.msra.mxu0 %v6349_v26  ;;  %5178 = vmatpush1.bf16.msra.mxu1 %v6415_v48 }
 0x517   :  { %5148 = vmatprep.subr.bf16.mxu0 %v6362_v30  ;;  %5180 = vmatprep.subr.bf16.mxu1 %v8521_v6 }
 0x51a   :  { %5150 = vmatpush1.bf16.msra.mxu0 %v8522_v15  ;;  %5182 = vmatpush1.bf16.msra.mxu1 %v8523_v55 }
 0x51b   :  { %5152 = vmatprep.subr.bf16.mxu0 %v8524_v1  ;;  %5184 = vmatprep.subr.bf16.mxu1 %v8525_v42  ;;  %v8575_v1 = vld [vmem:[#allocation82_spill] sm:$0xff] }
 0x51e   :  { %5154 = vmatpush1.bf16.msra.mxu0 %v8526_v36  ;;  %5186 = vmatpush1.bf16.msra.mxu1 %v8527_v27  ;;  %v8537_v36 = vld [vmem:[#allocation23_spill] sm:$0xff]  ;;  %v8538_v27 = vld [vmem:[#allocation21_spill] sm:$0xff] }
 0x51f   :  { %5156 = vmatprep.subr.bf16.mxu0 %v8528_v24  ;;  %5188 = vmatprep.subr.bf16.mxu1 %v8529_v32  ;;  %v8539_v24 = vld [vmem:[#allocation24_spill] sm:$0xff]  ;;  %v8540_v32 = vld [vmem:[#allocation25_spill] sm:$0xff] }
 0x522   :  { %5158 = vmatpush1.bf16.msra.mxu0 %v8530_v47  ;;  %5190 = vmatpush1.bf16.msra.mxu1 %v8531_v58  ;;  %v8541_v47 = vld [vmem:[#allocation26_spill] sm:$0xff]  ;;  %v8574_v58 = vld [vmem:[#allocation81_spill] sm:$0xff] }
 0x523   :  { %5160 = vmatprep.subr.bf16.mxu0 %v8532_v0  ;;  %5192 = vmatprep.subr.bf16.mxu1 %v8533_v7  ;;  %v8542_v7 = vld [vmem:[#allocation27_spill] sm:$0xff]  ;;  %v8556_v0 = vld [vmem:[#allocation41_spill] sm:$0xff] }
 0x526   :  { %5162 = vmatpush1.bf16.msra.mxu0 %v8534_v52  ;;  %5194 = vmatpush1.bf16.msra.mxu1 %v8535_v31  ;;  %v8543_v52 = vld [vmem:[#allocation28_spill] sm:$0xff]  ;;  %v8544_v31 = vld [vmem:[#allocation29_spill] sm:$0xff] }
 0x527   :  { %5164 = vmatprep.subr.bf16.mxu0 %v8536_v62  ;;  %5196 = vmatprep.subr.bf16.mxu1 %v8537_v36  ;;  %v8545_v62 = vld [vmem:[#allocation30_spill] sm:$0xff]  ;;  %v8555_v36 = vld [vmem:[#allocation40_spill] sm:$0xff] }
 0x52a   :  { %5166 = vmatpush1.bf16.msra.mxu0 %v8538_v27  ;;  %5198 = vmatpush1.bf16.msra.mxu1 %v8539_v24  ;;  %v8546_v24 = vld [vmem:[#allocation31_spill] sm:$0xff]  ;;  %v8549_v27 = vld [vmem:[#allocation34_spill] sm:$0xff] }
 0x52b   :  { %5200 = vmatprep.subr.bf16.mxu0 %v8540_v32  ;;  %5232 = vmatprep.subr.bf16.mxu1 %v8541_v47  ;;  %v8547_v32 = vld [vmem:[#allocation32_spill] sm:$0xff]  ;;  %v8548_v47 = vld [vmem:[#allocation33_spill] sm:$0xff] }
 0x52d   :  { %2321 = vmatmul.mubr.f32.vlgmr.msra.gmra.mrb[16].mxu0 %v7547_v41  ;;  %2392 = vmatmul.mubr.f32.vlgmr.msra.gmra.mrb[16].mxu1 %v7547_v41  ;;  %v8550_v41 = vld [vmem:[#allocation35_spill] sm:$0xff] }
 0x52e   :  { %5202 = vmatpush1.bf16.msra.mxu0 %v8542_v7  ;;  %5234 = vmatpush1.bf16.msra.mxu1 %v8543_v52  ;;  %v8551_v7 = vld [vmem:[#allocation36_spill] sm:$0xff]  ;;  %v8552_v52 = vld [vmem:[#allocation37_spill] sm:$0xff] }
 0x52f   :  { %5204 = vmatprep.subr.bf16.mxu0 %v8544_v31  ;;  %5236 = vmatprep.subr.bf16.mxu1 %v8545_v62  ;;  %v8553_v31 = vld [vmem:[#allocation38_spill] sm:$0xff]  ;;  %v8554_v62 = vld [vmem:[#allocation39_spill] sm:$0xff] }
 0x530   :  { %2494 = vmatprep.mubr.f32.mxu0 %v8369_v35  ;;  %2565 = vmatprep.mubr.f32.mxu1 %v8369_v35 }
 0x532   :  { %5206 = vmatpush1.bf16.msra.mxu0 %v8546_v24  ;;  %5238 = vmatpush1.bf16.msra.mxu1 %v8547_v32  ;;  %v8557_v24 = vld [vmem:[#allocation42_spill] sm:$0xff]  ;;  %v8558_v32 = vld [vmem:[#allocation43_spill] sm:$0xff] }
 0x533   :  { %5208 = vmatprep.subr.bf16.mxu0 %v8548_v47  ;;  %5240 = vmatprep.subr.bf16.mxu1 %v8549_v27  ;;  %v8559_v47 = vld [vmem:[#allocation44_spill] sm:$0xff]  ;;  %v8560_v27 = vld [vmem:[#allocation45_spill] sm:$0xff] }
 0x536   :  { %5210 = vmatpush1.bf16.msra.mxu0 %v8550_v41  ;;  %5242 = vmatpush1.bf16.msra.mxu1 %v8551_v7  ;;  %v8561_v41 = vld [vmem:[#allocation46_spill] sm:$0xff]  ;;  %v8562_v7 = vld [vmem:[#allocation47_spill] sm:$0xff] }
 0x537   :  { %5212 = vmatprep.subr.bf16.mxu0 %v8552_v52  ;;  %5244 = vmatprep.subr.bf16.mxu1 %v8553_v31  ;;  %v8563_v52 = vld [vmem:[#allocation48_spill] sm:$0xff]  ;;  %v8564_v31 = vld [vmem:[#allocation49_spill] sm:$0xff] }
 0x53a   :  { %5214 = vmatpush1.bf16.msra.mxu0 %v8554_v62  ;;  %5246 = vmatpush1.bf16.msra.mxu1 %v8555_v36  ;;  %v8565_v62 = vld [vmem:[#allocation50_spill] sm:$0xff]  ;;  %v8566_v36 = vld [vmem:[#allocation51_spill] sm:$0xff] }
 0x53b   :  { %5216 = vmatprep.subr.bf16.mxu0 %v8556_v0  ;;  %5248 = vmatprep.subr.bf16.mxu1 %v8557_v24  ;;  %v8567_v0 = vld [vmem:[#allocation52_spill] sm:$0xff]  ;;  %v8568_v24 = vld [vmem:[#allocation53_spill] sm:$0xff] }
 0x53e   :  { %5218 = vmatpush1.bf16.msra.mxu0 %v8558_v32  ;;  %5250 = vmatpush1.bf16.msra.mxu1 %v8559_v47  ;;  %v8569_v32 = vld [vmem:[#allocation54_spill] sm:$0xff]  ;;  %v8570_v47 = vld [vmem:[#allocation55_spill] sm:$0xff] }
 0x53f   :  { %5220 = vmatprep.subr.bf16.mxu0 %v8560_v27  ;;  %5252 = vmatprep.subr.bf16.mxu1 %v8561_v41  ;;  %v8571_v27 = vld [vmem:[#allocation56_spill] sm:$0xff]  ;;  %v8572_v41 = vld [vmem:[#allocation57_spill] sm:$0xff] }
 0x542   :  { %5222 = vmatpush1.bf16.msra.mxu0 %v8562_v7  ;;  %5254 = vmatpush1.bf16.msra.mxu1 %v8563_v52  ;;  %v8573_v7 = vld [vmem:[#allocation58_spill] sm:$0xff] }
 0x543   :  { %5224 = vmatprep.subr.bf16.mxu0 %v8564_v31  ;;  %5256 = vmatprep.subr.bf16.mxu1 %v8565_v62 }
 0x546   :  { %5226 = vmatpush1.bf16.msra.mxu0 %v8566_v36  ;;  %5258 = vmatpush1.bf16.msra.mxu1 %v8567_v0 }
 0x547   :  { %5228 = vmatprep.subr.bf16.mxu0 %v8568_v24  ;;  %5260 = vmatprep.subr.bf16.mxu1 %v8569_v32 }
 0x54a   :  { %5230 = vmatpush1.bf16.msra.mxu0 %v8570_v47  ;;  %5262 = vmatpush1.bf16.msra.mxu1 %v8571_v27 }
 0x54b   :  { %5264 = vmatprep.subr.bf16.mxu0 %v8572_v41  ;;  %5296 = vmatprep.subr.bf16.mxu1 %v8573_v7 }
 0x5e0   :  { %v2141_v52 = vpop.f32.mrb[14].mxu0  ;;  %v2212_v31 = vpop.f32.mrb[14].mxu1 }
 0x5e1   :  { %v5915_v62 = vadd.f32 %v2141_v52, %v8574_v58  ;;  %v2143_v42 = vpop.f32.mrb[15].mxu0  ;;  %v2214_v36 = vpop.f32.mrb[15].mxu1  ;;  %v5917_v27 = vadd.f32 %v2212_v31, %v7252_v19 }
 0x5e2   :  { %v5916_v0 = vadd.f32 %v2143_v42, %v8575_v1  ;;  %v5918_v47 = vadd.f32 %v2214_v36, %v7249_v21  ;;  %v4323_v36 = vld [vmem:[%s8139_s0 + $0x80] sm:$0xff] }
 0x5e3   :  { %v4319_v55 = vmul.f32 -1.442695, %v5915_v62 }
 0x5e4   :  { %v4320_v24 = vmul.f32 -1.442695, %v5916_v0  ;;  %v4321_v32 = vmul.f32 -1.442695, %v5918_v47 }
 0x5e5   :  { %6080 = vpow2.f32 %v4319_v55 }
 0x5e6   :  { %6082 = vpow2.f32 %v4320_v24  ;;  %v8576_v24 = vld [vmem:[#allocation60_spill] sm:$0xff] }
 0x5e7   :  { %6084 = vpow2.f32 %v4321_v32  ;;  %v4324_v32 = vld [vmem:[%s8139_s0 + $0x88] sm:$0xff] }
 0x5e8   :  { %6086 = vtanh.f32 %v5917_v27 }
 0x5ef   :  { %v6081_v41 = vpop.eup %6080 }
 0x5f0   :  { %v6083_v15 = vpop.eup %6082  ;;  %v2224_v7 = vadd.f32 1.0, %v6081_v41 }
 0x5f1   :  { %v2230_v6 = vadd.f32 1.0, %v6083_v15  ;;  %v6085_v52 = vpop.eup %6084 }
 0x5f2   :  { %6088 = vrcp.f32 %v2224_v7  ;;  %v6087_v58 = vpop.eup %6086  ;;  %v2237_v55 = vadd.f32 1.0, %v6085_v52 }
 0x5f3   :  { %6090 = vrcp.f32 %v2230_v6 }
 0x5f4   :  { %6092 = vrcp.f32 %v2237_v55 }
 0x5fc   :  { %v6089_v42 = vpop.eup %6088 }
 0x5fd   :  { %v6091_v62 = vpop.eup %6090  ;;  %v2241_v0 = vmul.f32 %v6089_v42, %v6087_v58  ;;  %v4326_v42 = vld [vmem:[%s8139_s0 + $0x98] sm:$0xff] }
 0x5fe   :  { %v2240_v1 = vmul.f32 %v6091_v62, %v8576_v24 }
 0x600   :  { %v7666_v27 = vadd.f32 %v2241_v0, %v2240_v1  ;;  %v2322_v15 = vpop.f32.mrb[16].mxu0  ;;  %v2393_v6 = vpop.f32.mrb[16].mxu1  ;;  %v4325_v1 = vld [vmem:[%s8139_s0 + $0x90] sm:$0xff] }
 0x601   :  { %v2398_v47 = vadd.f32 %v4323_v36, %v2322_v15  ;;  %v2324_v7 = vpop.f32.mrb[17].mxu0  ;;  %v2395_v31 = vpop.f32.mrb[17].mxu1  ;;  %v2400_v36 = vadd.f32 %v4325_v1, %v2393_v6 }
 0x602   :  { %8577 = vst [vmem:[#allocation61_spill] sm:$0xff] %v7666_v27  ;;  %v2399_v58 = vadd.f32 %v4324_v32, %v2324_v7  ;;  %6094 = vtanh.f32 %v7666_v27  ;;  %v2401_v62 = vadd.f32 %v4326_v42, %v2395_v31  ;;  %v6093_v0 = vpop.eup %6092 }
 0x603   :  { %v4327_v41 = vmul.f32 -1.442695, %v2398_v47 }
 0x604   :  { %v4328_v52 = vmul.f32 -1.442695, %v2399_v58  ;;  %v4329_v24 = vmul.f32 -1.442695, %v2401_v62 }
 0x605   :  { %6096 = vpow2.f32 %v4327_v41 }
 0x606   :  { %6098 = vpow2.f32 %v4328_v52 }
 0x607   :  { %6100 = vpow2.f32 %v4329_v24 }
 0x608   :  { %6102 = vtanh.f32 %v2400_v36  ;;  %v8580_v36 = vld [vmem:[#allocation11_spill] sm:$0xff] }
 0x60c   :  { %v6095_v55 = vpop.eup %6094 }
 0x60d   :  { %v2244_v32 = vmul.f32 %v6095_v55, %v6093_v0 }
 0x60f   :  { %v6097_v15 = vpop.eup %6096  ;;  %4322 = vst [vmem:[%s8141_s5 + $0x18] sm:$0xff] %v2244_v32 }
 0x610   :  { %v6099_v47 = vpop.eup %6098  ;;  %v2405_v7 = vadd.f32 1.0, %v6097_v15  ;;  %v8582_v15 = vld [vmem:[#allocation12_spill] sm:$0xff] }
 0x611   :  { %v2411_v58 = vadd.f32 1.0, %v6099_v47  ;;  %v6101_v31 = vpop.eup %6100  ;;  %v8583_v47 = vld [vmem:[#allocation9_spill] sm:$0xff] }
 0x612   :  { %6104 = vrcp.f32 %v2405_v7  ;;  %v6103_v41 = vpop.eup %6102  ;;  %v2418_v62 = vadd.f32 1.0, %v6101_v31  ;;  %v8584_v7 = vld [vmem:[#allocation15_spill] sm:$0xff]  ;;  %v8586_v31 = vld [vmem:[#allocation16_spill] sm:$0xff] }
 0x613   :  { %6106 = vrcp.f32 %v2411_v58  ;;  %v8585_v58 = vld [vmem:[#allocation10_spill] sm:$0xff] }
 0x614   :  { %6108 = vrcp.f32 %v2418_v62  ;;  %v8590_v62 = vld [vmem:[#allocation20_spill] sm:$0xff] }
 0x61c   :  { %v6105_v52 = vpop.eup %6104 }
 0x61d   :  { %v6107_v42 = vpop.eup %6106  ;;  %v2422_v27 = vmul.f32 %v6105_v52, %v6103_v41  ;;  %v8587_v41 = vld [vmem:[#allocation13_spill] sm:$0xff]  ;;  %v8588_v52 = vld [vmem:[#allocation19_spill] sm:$0xff] }
 0x61e   :  { %v2421_v6 = vmul.f32 %v6107_v42, %v7544_v46  ;;  %v6109_v0 = vpop.eup %6108  ;;  %v8578_v46 = vld [vmem:[#allocation8_spill] sm:$0xff]  ;;  %v8589_v42 = vld [vmem:[#allocation14_spill] sm:$0xff] }
 0x620   :  { %v7679_v1 = vadd.f32 %v2422_v27, %v2421_v6  ;;  %v8579_v27 = vld [vmem:[#allocation6_spill] sm:$0xff]  ;;  %v8591_v6 = vld [vmem:[#allocation17_spill] sm:$0xff] }
 0x622   :  { %6110 = vtanh.f32 %v7679_v1 }
 0x62c   :  { %v6111_v55 = vpop.eup %6110 }
 0x62d   :  { %v7682_v24 = vmul.f32 %v6111_v55, %v6109_v0  ;;  %v8592_v0 = vld [vmem:[#allocation22_spill] sm:$0xff] }
 0x62e   :  { %v8593_v55 = vld [vmem:[#allocation18_spill] sm:$0xff] }
 0x62f   :  { %2495 = vmatmul.mubr.f32.vlgmr.msra.gmra.mrb[18].mxu0 %v7682_v24  ;;  %2566 = vmatmul.mubr.f32.vlgmr.msra.gmra.mrb[18].mxu1 %v7682_v24 }
 0x630   :  { %5266 = vmatpush1.bf16.msra.mxu0 %v8408_v13  ;;  %5298 = vmatpush1.bf16.msra.mxu1 %v8409_v60 }
 0x631   :  { %5268 = vmatprep.subr.bf16.mxu0 %v8410_v63  ;;  %5300 = vmatprep.subr.bf16.mxu1 %v8464_v28 }
 0x632   :  { %2640 = vmatprep.mubr.f32.mxu0 %v8369_v35  ;;  %2711 = vmatprep.mubr.f32.mxu1 %v8369_v35 }
 0x634   :  { %5270 = vmatpush1.bf16.msra.mxu0 %v8465_v39  ;;  %5302 = vmatpush1.bf16.msra.mxu1 %v8466_v40 }
 0x635   :  { %5272 = vmatprep.subr.bf16.mxu0 %v8467_v18  ;;  %5304 = vmatprep.subr.bf16.mxu1 %v8468_v53 }
 0x638   :  { %5274 = vmatpush1.bf16.msra.mxu0 %v8469_v59  ;;  %5306 = vmatpush1.bf16.msra.mxu1 %v8417_v3 }
 0x639   :  { %5276 = vmatprep.subr.bf16.mxu0 %v8470_v10  ;;  %5308 = vmatprep.subr.bf16.mxu1 %v8419_v57 }
 0x63c   :  { %5278 = vmatpush1.bf16.msra.mxu0 %v8420_v2  ;;  %5310 = vmatpush1.bf16.msra.mxu1 %v8421_v12 }
 0x63d   :  { %5280 = vmatprep.subr.bf16.mxu0 %v8422_v61  ;;  %5312 = vmatprep.subr.bf16.mxu1 %v8423_v50 }
 0x640   :  { %5282 = vmatpush1.bf16.msra.mxu0 %v8424_v44  ;;  %5314 = vmatpush1.bf16.msra.mxu1 %v8425_v20 }
 0x641   :  { %5284 = vmatprep.subr.bf16.mxu0 %v8426_v49  ;;  %5316 = vmatprep.subr.bf16.mxu1 %v8427_v56 }
 0x644   :  { %5286 = vmatpush1.bf16.msra.mxu0 %v7098_v5  ;;  %5318 = vmatpush1.bf16.msra.mxu1 %v8428_v11 }
 0x645   :  { %5288 = vmatprep.subr.bf16.mxu0 %v7110_v43  ;;  %5320 = vmatprep.subr.bf16.mxu1 %v7112_v54 }
 0x648   :  { %5290 = vmatpush1.bf16.msra.mxu0 %v7134_v38  ;;  %5322 = vmatpush1.bf16.msra.mxu1 %v7136_v51 }
 0x649   :  { %5292 = vmatprep.subr.bf16.mxu0 %v7143_v29  ;;  %5324 = vmatprep.subr.bf16.mxu1 %v7145_v34 }
 0x64c   :  { %5294 = vmatpush1.bf16.msra.mxu0 %v7158_v16  ;;  %5326 = vmatpush1.bf16.msra.mxu1 %v7160_v23 }
 0x64d   :  { %5328 = vmatprep.subr.bf16.mxu0 %v6286_v4  ;;  %5360 = vmatprep.subr.bf16.mxu1 %v6338_v22 }
 0x64f   :  { %2641 = vmatmul.mubr.f32.vlgmr.msra.gmra.mrb[18].mxu0 %v2244_v32  ;;  %2712 = vmatmul.mubr.f32.vlgmr.msra.gmra.mrb[18].mxu1 %v2244_v32  ;;  %v8581_v32 = vld [vmem:[#allocation7_spill] sm:$0xff] }
 0x650   :  { %5330 = vmatpush1.bf16.msra.mxu0 %v6297_v8  ;;  %5362 = vmatpush1.bf16.msra.mxu1 %v6346_v25 }
 0x651   :  { %5332 = vmatprep.subr.bf16.mxu0 %v6299_v9  ;;  %5364 = vmatprep.subr.bf16.mxu1 %v6371_v33 }
 0x652   :  { %2821 = vmatprep.mubr.f32.mxu0 %v8369_v35  ;;  %2892 = vmatprep.mubr.f32.mxu1 %v8369_v35 }
 0x654   :  { %5334 = vmatpush1.bf16.msra.mxu0 %v6315_v14  ;;  %5366 = vmatpush1.bf16.msra.mxu1 %v6382_v37 }
 0x655   :  { %5336 = vmatprep.subr.bf16.mxu0 %v6324_v17  ;;  %5368 = vmatprep.subr.bf16.mxu1 %v6406_v45 }
 0x658   :  { %5338 = vmatpush1.bf16.msra.mxu0 %v6349_v26  ;;  %5370 = vmatpush1.bf16.msra.mxu1 %v6415_v48 }
 0x659   :  { %5340 = vmatprep.subr.bf16.mxu0 %v6362_v30  ;;  %5372 = vmatprep.subr.bf16.mxu1 %v8578_v46 }
 0x65c   :  { %5342 = vmatpush1.bf16.msra.mxu0 %v8579_v27  ;;  %5374 = vmatpush1.bf16.msra.mxu1 %v8580_v36 }
 0x65d   :  { %5344 = vmatprep.subr.bf16.mxu0 %v8581_v32  ;;  %5376 = vmatprep.subr.bf16.mxu1 %v8582_v15  ;;  %v8632_v32 = vld [vmem:[#allocation82_spill] sm:$0xff] }
 0x660   :  { %5346 = vmatpush1.bf16.msra.mxu0 %v8583_v47  ;;  %5378 = vmatpush1.bf16.msra.mxu1 %v8584_v7  ;;  %v8594_v47 = vld [vmem:[#allocation23_spill] sm:$0xff]  ;;  %v8595_v7 = vld [vmem:[#allocation21_spill] sm:$0xff] }
 0x661   :  { %5348 = vmatprep.subr.bf16.mxu0 %v8585_v58  ;;  %5380 = vmatprep.subr.bf16.mxu1 %v8586_v31  ;;  %v8596_v58 = vld [vmem:[#allocation24_spill] sm:$0xff]  ;;  %v8597_v31 = vld [vmem:[#allocation25_spill] sm:$0xff] }
 0x664   :  { %5350 = vmatpush1.bf16.msra.mxu0 %v8587_v41  ;;  %5382 = vmatpush1.bf16.msra.mxu1 %v8588_v52  ;;  %v8598_v41 = vld [vmem:[#allocation26_spill] sm:$0xff]  ;;  %v8631_v52 = vld [vmem:[#allocation81_spill] sm:$0xff] }
 0x665   :  { %5352 = vmatprep.subr.bf16.mxu0 %v8589_v42  ;;  %5384 = vmatprep.subr.bf16.mxu1 %v8590_v62  ;;  %v8599_v62 = vld [vmem:[#allocation27_spill] sm:$0xff]  ;;  %v8613_v42 = vld [vmem:[#allocation41_spill] sm:$0xff] }
 0x668   :  { %5354 = vmatpush1.bf16.msra.mxu0 %v8591_v6  ;;  %5386 = vmatpush1.bf16.msra.mxu1 %v8592_v0  ;;  %v8600_v6 = vld [vmem:[#allocation28_spill] sm:$0xff]  ;;  %v8601_v0 = vld [vmem:[#allocation29_spill] sm:$0xff] }
 0x669   :  { %5356 = vmatprep.subr.bf16.mxu0 %v8593_v55  ;;  %5388 = vmatprep.subr.bf16.mxu1 %v8594_v47  ;;  %v8602_v55 = vld [vmem:[#allocation30_spill] sm:$0xff]  ;;  %v8612_v47 = vld [vmem:[#allocation40_spill] sm:$0xff] }
 0x66c   :  { %5358 = vmatpush1.bf16.msra.mxu0 %v8595_v7  ;;  %5390 = vmatpush1.bf16.msra.mxu1 %v8596_v58  ;;  %v8603_v58 = vld [vmem:[#allocation31_spill] sm:$0xff]  ;;  %v8606_v7 = vld [vmem:[#allocation34_spill] sm:$0xff] }
 0x66d   :  { %5392 = vmatprep.subr.bf16.mxu0 %v8597_v31  ;;  %5424 = vmatprep.subr.bf16.mxu1 %v8598_v41  ;;  %v8604_v31 = vld [vmem:[#allocation32_spill] sm:$0xff]  ;;  %v8605_v41 = vld [vmem:[#allocation33_spill] sm:$0xff] }
 0x66f   :  { %2822 = vmatmul.mubr.f32.vlgmr.msra.gmra.mrb[20].mxu0 %v7682_v24  ;;  %2893 = vmatmul.mubr.f32.vlgmr.msra.gmra.mrb[20].mxu1 %v7682_v24  ;;  %v8607_v24 = vld [vmem:[#allocation35_spill] sm:$0xff] }
 0x670   :  { %5394 = vmatpush1.bf16.msra.mxu0 %v8599_v62  ;;  %5426 = vmatpush1.bf16.msra.mxu1 %v8600_v6  ;;  %v8608_v62 = vld [vmem:[#allocation36_spill] sm:$0xff]  ;;  %v8609_v6 = vld [vmem:[#allocation37_spill] sm:$0xff] }
 0x671   :  { %5396 = vmatprep.subr.bf16.mxu0 %v8601_v0  ;;  %5428 = vmatprep.subr.bf16.mxu1 %v8602_v55  ;;  %v8610_v0 = vld [vmem:[#allocation38_spill] sm:$0xff]  ;;  %v8611_v55 = vld [vmem:[#allocation39_spill] sm:$0xff] }
 0x672   :  { %2995 = vmatprep.mubr.f32.mxu0 %v8369_v35  ;;  %3066 = vmatprep.mubr.f32.mxu1 %v8369_v35 }
 0x674   :  { %5398 = vmatpush1.bf16.msra.mxu0 %v8603_v58  ;;  %5430 = vmatpush1.bf16.msra.mxu1 %v8604_v31  ;;  %v8614_v58 = vld [vmem:[#allocation42_spill] sm:$0xff]  ;;  %v8615_v31 = vld [vmem:[#allocation43_spill] sm:$0xff] }
 0x675   :  { %5400 = vmatprep.subr.bf16.mxu0 %v8605_v41  ;;  %5432 = vmatprep.subr.bf16.mxu1 %v8606_v7  ;;  %v8616_v41 = vld [vmem:[#allocation44_spill] sm:$0xff]  ;;  %v8617_v7 = vld [vmem:[#allocation45_spill] sm:$0xff] }
 0x678   :  { %5402 = vmatpush1.bf16.msra.mxu0 %v8607_v24  ;;  %5434 = vmatpush1.bf16.msra.mxu1 %v8608_v62  ;;  %v8618_v24 = vld [vmem:[#allocation46_spill] sm:$0xff]  ;;  %v8619_v62 = vld [vmem:[#allocation47_spill] sm:$0xff] }
 0x679   :  { %5404 = vmatprep.subr.bf16.mxu0 %v8609_v6  ;;  %5436 = vmatprep.subr.bf16.mxu1 %v8610_v0  ;;  %v8620_v6 = vld [vmem:[#allocation48_spill] sm:$0xff]  ;;  %v8621_v0 = vld [vmem:[#allocation49_spill] sm:$0xff] }
 0x67c   :  { %5406 = vmatpush1.bf16.msra.mxu0 %v8611_v55  ;;  %5438 = vmatpush1.bf16.msra.mxu1 %v8612_v47  ;;  %v8622_v55 = vld [vmem:[#allocation50_spill] sm:$0xff]  ;;  %v8623_v47 = vld [vmem:[#allocation51_spill] sm:$0xff] }
 0x67d   :  { %5408 = vmatprep.subr.bf16.mxu0 %v8613_v42  ;;  %5440 = vmatprep.subr.bf16.mxu1 %v8614_v58  ;;  %v8624_v42 = vld [vmem:[#allocation52_spill] sm:$0xff]  ;;  %v8625_v58 = vld [vmem:[#allocation53_spill] sm:$0xff] }
 0x680   :  { %5410 = vmatpush1.bf16.msra.mxu0 %v8615_v31  ;;  %5442 = vmatpush1.bf16.msra.mxu1 %v8616_v41  ;;  %v8626_v31 = vld [vmem:[#allocation54_spill] sm:$0xff]  ;;  %v8627_v41 = vld [vmem:[#allocation55_spill] sm:$0xff] }
 0x681   :  { %5412 = vmatprep.subr.bf16.mxu0 %v8617_v7  ;;  %5444 = vmatprep.subr.bf16.mxu1 %v8618_v24  ;;  %v8628_v7 = vld [vmem:[#allocation56_spill] sm:$0xff]  ;;  %v8629_v24 = vld [vmem:[#allocation57_spill] sm:$0xff] }
 0x684   :  { %5414 = vmatpush1.bf16.msra.mxu0 %v8619_v62  ;;  %5446 = vmatpush1.bf16.msra.mxu1 %v8620_v6  ;;  %v8630_v62 = vld [vmem:[#allocation58_spill] sm:$0xff] }
 0x685   :  { %5416 = vmatprep.subr.bf16.mxu0 %v8621_v0  ;;  %5448 = vmatprep.subr.bf16.mxu1 %v8622_v55 }
 0x688   :  { %5418 = vmatpush1.bf16.msra.mxu0 %v8623_v47  ;;  %5450 = vmatpush1.bf16.msra.mxu1 %v8624_v42 }
 0x689   :  { %5420 = vmatprep.subr.bf16.mxu0 %v8625_v58  ;;  %5452 = vmatprep.subr.bf16.mxu1 %v8626_v31 }
 0x68c   :  { %5422 = vmatpush1.bf16.msra.mxu0 %v8627_v41  ;;  %5454 = vmatpush1.bf16.msra.mxu1 %v8628_v7 }
 0x68d   :  { %5456 = vmatprep.subr.bf16.mxu0 %v8629_v24  ;;  %5488 = vmatprep.subr.bf16.mxu1 %v8630_v62 }
 0x722   :  { %v2642_v6 = vpop.f32.mrb[18].mxu0  ;;  %v2713_v0 = vpop.f32.mrb[18].mxu1 }
 0x723   :  { %v5919_v55 = vadd.f32 %v2642_v6, %v8631_v52  ;;  %v2644_v15 = vpop.f32.mrb[19].mxu0  ;;  %v2715_v47 = vpop.f32.mrb[19].mxu1  ;;  %v5921_v7 = vadd.f32 %v2713_v0, %v7252_v19 }
 0x724   :  { %v5920_v42 = vadd.f32 %v2644_v15, %v8632_v32  ;;  %v5922_v41 = vadd.f32 %v2715_v47, %v7249_v21  ;;  %v4334_v47 = vld [vmem:[%s8139_s0 + $0xa0] sm:$0xff] }
 0x725   :  { %v4330_v36 = vmul.f32 -1.442695, %v5919_v55 }
 0x726   :  { %v4331_v58 = vmul.f32 -1.442695, %v5920_v42  ;;  %v4332_v31 = vmul.f32 -1.442695, %v5922_v41 }
 0x727   :  { %6112 = vpow2.f32 %v4330_v36 }
 0x728   :  { %6114 = vpow2.f32 %v4331_v58  ;;  %v8633_v58 = vld [vmem:[#allocation61_spill] sm:$0xff] }
 0x729   :  { %6116 = vpow2.f32 %v4332_v31  ;;  %v4335_v31 = vld [vmem:[%s8139_s0 + $0xa8] sm:$0xff] }
 0x72a   :  { %6118 = vtanh.f32 %v5921_v7 }
 0x731   :  { %v6113_v24 = vpop.eup %6112 }
 0x732   :  { %v6115_v27 = vpop.eup %6114  ;;  %v2725_v62 = vadd.f32 1.0, %v6113_v24 }
 0x733   :  { %v2731_v46 = vadd.f32 1.0, %v6115_v27  ;;  %v6117_v6 = vpop.eup %6116 }
 0x734   :  { %6120 = vrcp.f32 %v2725_v62  ;;  %v6119_v52 = vpop.eup %6118  ;;  %v2738_v36 = vadd.f32 1.0, %v6117_v6 }
 0x735   :  { %6122 = vrcp.f32 %v2731_v46 }
 0x736   :  { %6124 = vrcp.f32 %v2738_v36 }
 0x73e   :  { %v6121_v15 = vpop.eup %6120 }
 0x73f   :  { %v6123_v55 = vpop.eup %6122  ;;  %v2742_v42 = vmul.f32 %v6121_v15, %v6119_v52  ;;  %v4337_v15 = vld [vmem:[%s8139_s0 + $0xb8] sm:$0xff] }
 0x740   :  { %v2741_v32 = vmul.f32 %v6123_v55, %v8633_v58 }
 0x742   :  { %v7801_v7 = vadd.f32 %v2742_v42, %v2741_v32  ;;  %v2823_v27 = vpop.f32.mrb[20].mxu0  ;;  %v2894_v46 = vpop.f32.mrb[20].mxu1  ;;  %v4336_v32 = vld [vmem:[%s8139_s0 + $0xb0] sm:$0xff] }
 0x743   :  { %v2899_v41 = vadd.f32 %v4334_v47, %v2823_v27  ;;  %v2825_v62 = vpop.f32.mrb[21].mxu0  ;;  %v2896_v0 = vpop.f32.mrb[21].mxu1  ;;  %v2901_v47 = vadd.f32 %v4336_v32, %v2894_v46 }
 0x744   :  { %8634 = vst [vmem:[#allocation62_spill] sm:$0xff] %v7801_v7  ;;  %v2900_v52 = vadd.f32 %v4335_v31, %v2825_v62  ;;  %6126 = vtanh.f32 %v7801_v7  ;;  %v2902_v55 = vadd.f32 %v4337_v15, %v2896_v0  ;;  %v6125_v42 = vpop.eup %6124 }
 0x745   :  { %v4338_v24 = vmul.f32 -1.442695, %v2899_v41 }
 0x746   :  { %v4339_v6 = vmul.f32 -1.442695, %v2900_v52  ;;  %v4340_v58 = vmul.f32 -1.442695, %v2902_v55 }
 0x747   :  { %6128 = vpow2.f32 %v4338_v24 }
 0x748   :  { %6130 = vpow2.f32 %v4339_v6 }
 0x749   :  { %6132 = vpow2.f32 %v4340_v58 }
 0x74a   :  { %6134 = vtanh.f32 %v2901_v47  ;;  %v8637_v47 = vld [vmem:[#allocation11_spill] sm:$0xff] }
 0x74e   :  { %v6127_v36 = vpop.eup %6126 }
 0x74f   :  { %v2745_v31 = vmul.f32 %v6127_v36, %v6125_v42 }
 0x751   :  { %v6129_v27 = vpop.eup %6128  ;;  %4333 = vst [vmem:[%s8141_s5 + $0x20] sm:$0xff] %v2745_v31 }
 0x752   :  { %v6131_v41 = vpop.eup %6130  ;;  %v2906_v62 = vadd.f32 1.0, %v6129_v27  ;;  %v8639_v27 = vld [vmem:[#allocation12_spill] sm:$0xff] }
 0x753   :  { %v2912_v52 = vadd.f32 1.0, %v6131_v41  ;;  %v6133_v0 = vpop.eup %6132  ;;  %v8640_v41 = vld [vmem:[#allocation9_spill] sm:$0xff] }
 0x754   :  { %6136 = vrcp.f32 %v2906_v62  ;;  %v6135_v24 = vpop.eup %6134  ;;  %v2919_v55 = vadd.f32 1.0, %v6133_v0  ;;  %v8641_v62 = vld [vmem:[#allocation15_spill] sm:$0xff]  ;;  %v8643_v0 = vld [vmem:[#allocation16_spill] sm:$0xff] }
 0x755   :  { %6138 = vrcp.f32 %v2912_v52  ;;  %v8642_v52 = vld [vmem:[#allocation10_spill] sm:$0xff] }
 0x756   :  { %6140 = vrcp.f32 %v2919_v55  ;;  %v8647_v55 = vld [vmem:[#allocation20_spill] sm:$0xff] }
 0x75e   :  { %v6137_v6 = vpop.eup %6136 }
 0x75f   :  { %v6139_v15 = vpop.eup %6138  ;;  %v2923_v7 = vmul.f32 %v6137_v6, %v6135_v24  ;;  %v8644_v24 = vld [vmem:[#allocation13_spill] sm:$0xff]  ;;  %v8645_v6 = vld [vmem:[#allocation19_spill] sm:$0xff] }
 0x760   :  { %v2922_v46 = vmul.f32 %v6139_v15, %v7679_v1  ;;  %v6141_v42 = vpop.eup %6140  ;;  %v8635_v1 = vld [vmem:[#allocation8_spill] sm:$0xff]  ;;  %v8646_v15 = vld [vmem:[#allocation14_spill] sm:$0xff] }
 0x762   :  { %v7814_v32 = vadd.f32 %v2923_v7, %v2922_v46  ;;  %v8636_v7 = vld [vmem:[#allocation6_spill] sm:$0xff]  ;;  %v8648_v46 = vld [vmem:[#allocation17_spill] sm:$0xff] }
 0x764   :  { %6142 = vtanh.f32 %v7814_v32 }
 0x76e   :  { %v6143_v36 = vpop.eup %6142 }
 0x76f   :  { %v7817_v58 = vmul.f32 %v6143_v36, %v6141_v42  ;;  %v8649_v42 = vld [vmem:[#allocation22_spill] sm:$0xff] }
 0x770   :  { %v8650_v36 = vld [vmem:[#allocation18_spill] sm:$0xff] }
 0x771   :  { %2996 = vmatmul.mubr.f32.vlgmr.msra.gmra.mrb[22].mxu0 %v7817_v58  ;;  %3067 = vmatmul.mubr.f32.vlgmr.msra.gmra.mrb[22].mxu1 %v7817_v58 }
 0x772   :  { %5458 = vmatpush1.bf16.msra.mxu0 %v8408_v13  ;;  %5490 = vmatpush1.bf16.msra.mxu1 %v8409_v60 }
 0x773   :  { %5460 = vmatprep.subr.bf16.mxu0 %v8410_v63  ;;  %5492 = vmatprep.subr.bf16.mxu1 %v8464_v28 }
 0x774   :  { %3141 = vmatprep.mubr.f32.mxu0 %v8369_v35  ;;  %3212 = vmatprep.mubr.f32.mxu1 %v8369_v35 }
 0x776   :  { %5462 = vmatpush1.bf16.msra.mxu0 %v8465_v39  ;;  %5494 = vmatpush1.bf16.msra.mxu1 %v8466_v40 }
 0x777   :  { %5464 = vmatprep.subr.bf16.mxu0 %v8467_v18  ;;  %5496 = vmatprep.subr.bf16.mxu1 %v8468_v53 }
 0x77a   :  { %5466 = vmatpush1.bf16.msra.mxu0 %v8469_v59  ;;  %5498 = vmatpush1.bf16.msra.mxu1 %v8417_v3 }
 0x77b   :  { %5468 = vmatprep.subr.bf16.mxu0 %v8470_v10  ;;  %5500 = vmatprep.subr.bf16.mxu1 %v8419_v57 }
 0x77e   :  { %5470 = vmatpush1.bf16.msra.mxu0 %v8420_v2  ;;  %5502 = vmatpush1.bf16.msra.mxu1 %v8421_v12 }
 0x77f   :  { %5472 = vmatprep.subr.bf16.mxu0 %v8422_v61  ;;  %5504 = vmatprep.subr.bf16.mxu1 %v8423_v50 }
 0x782   :  { %5474 = vmatpush1.bf16.msra.mxu0 %v8424_v44  ;;  %5506 = vmatpush1.bf16.msra.mxu1 %v8425_v20 }
 0x783   :  { %5476 = vmatprep.subr.bf16.mxu0 %v8426_v49  ;;  %5508 = vmatprep.subr.bf16.mxu1 %v8427_v56 }
 0x786   :  { %5478 = vmatpush1.bf16.msra.mxu0 %v7098_v5  ;;  %5510 = vmatpush1.bf16.msra.mxu1 %v8428_v11 }
 0x787   :  { %5480 = vmatprep.subr.bf16.mxu0 %v7110_v43  ;;  %5512 = vmatprep.subr.bf16.mxu1 %v7112_v54 }
 0x78a   :  { %5482 = vmatpush1.bf16.msra.mxu0 %v7134_v38  ;;  %5514 = vmatpush1.bf16.msra.mxu1 %v7136_v51 }
 0x78b   :  { %5484 = vmatprep.subr.bf16.mxu0 %v7143_v29  ;;  %5516 = vmatprep.subr.bf16.mxu1 %v7145_v34 }
 0x78e   :  { %5486 = vmatpush1.bf16.msra.mxu0 %v7158_v16  ;;  %5518 = vmatpush1.bf16.msra.mxu1 %v7160_v23 }
 0x78f   :  { %5520 = vmatprep.subr.bf16.mxu0 %v6286_v4  ;;  %5552 = vmatprep.subr.bf16.mxu1 %v6338_v22 }
 0x791   :  { %3142 = vmatmul.mubr.f32.vlgmr.msra.gmra.mrb[22].mxu0 %v2745_v31  ;;  %3213 = vmatmul.mubr.f32.vlgmr.msra.gmra.mrb[22].mxu1 %v2745_v31  ;;  %v8638_v31 = vld [vmem:[#allocation7_spill] sm:$0xff] }
 0x792   :  { %5522 = vmatpush1.bf16.msra.mxu0 %v6297_v8  ;;  %5554 = vmatpush1.bf16.msra.mxu1 %v6346_v25 }
 0x793   :  { %5524 = vmatprep.subr.bf16.mxu0 %v6299_v9  ;;  %5556 = vmatprep.subr.bf16.mxu1 %v6371_v33 }
 0x794   :  { %3322 = vmatprep.mubr.f32.mxu0 %v8369_v35  ;;  %3393 = vmatprep.mubr.f32.mxu1 %v8369_v35 }
 0x796   :  { %5526 = vmatpush1.bf16.msra.mxu0 %v6315_v14  ;;  %5558 = vmatpush1.bf16.msra.mxu1 %v6382_v37 }
 0x797   :  { %5528 = vmatprep.subr.bf16.mxu0 %v6324_v17  ;;  %5560 = vmatprep.subr.bf16.mxu1 %v6406_v45 }
 0x79a   :  { %5530 = vmatpush1.bf16.msra.mxu0 %v6349_v26  ;;  %5562 = vmatpush1.bf16.msra.mxu1 %v6415_v48 }
 0x79b   :  { %5532 = vmatprep.subr.bf16.mxu0 %v6362_v30  ;;  %5564 = vmatprep.subr.bf16.mxu1 %v8635_v1 }
 0x79e   :  { %5534 = vmatpush1.bf16.msra.mxu0 %v8636_v7  ;;  %5566 = vmatpush1.bf16.msra.mxu1 %v8637_v47 }
 0x79f   :  { %5536 = vmatprep.subr.bf16.mxu0 %v8638_v31  ;;  %5568 = vmatprep.subr.bf16.mxu1 %v8639_v27  ;;  %v8689_v31 = vld [vmem:[#allocation82_spill] sm:$0xff] }
 0x7a2   :  { %5538 = vmatpush1.bf16.msra.mxu0 %v8640_v41  ;;  %5570 = vmatpush1.bf16.msra.mxu1 %v8641_v62  ;;  %v8651_v41 = vld [vmem:[#allocation23_spill] sm:$0xff]  ;;  %v8652_v62 = vld [vmem:[#allocation21_spill] sm:$0xff] }
 0x7a3   :  { %5540 = vmatprep.subr.bf16.mxu0 %v8642_v52  ;;  %5572 = vmatprep.subr.bf16.mxu1 %v8643_v0  ;;  %v8653_v52 = vld [vmem:[#allocation24_spill] sm:$0xff]  ;;  %v8654_v0 = vld [vmem:[#allocation25_spill] sm:$0xff] }
 0x7a6   :  { %5542 = vmatpush1.bf16.msra.mxu0 %v8644_v24  ;;  %5574 = vmatpush1.bf16.msra.mxu1 %v8645_v6  ;;  %v8655_v24 = vld [vmem:[#allocation26_spill] sm:$0xff]  ;;  %v8688_v6 = vld [vmem:[#allocation81_spill] sm:$0xff] }
 0x7a7   :  { %5544 = vmatprep.subr.bf16.mxu0 %v8646_v15  ;;  %5576 = vmatprep.subr.bf16.mxu1 %v8647_v55  ;;  %v8656_v55 = vld [vmem:[#allocation27_spill] sm:$0xff]  ;;  %v8670_v15 = vld [vmem:[#allocation41_spill] sm:$0xff] }
 0x7aa   :  { %5546 = vmatpush1.bf16.msra.mxu0 %v8648_v46  ;;  %5578 = vmatpush1.bf16.msra.mxu1 %v8649_v42  ;;  %v8657_v46 = vld [vmem:[#allocation28_spill] sm:$0xff]  ;;  %v8658_v42 = vld [vmem:[#allocation29_spill] sm:$0xff] }
 0x7ab   :  { %5548 = vmatprep.subr.bf16.mxu0 %v8650_v36  ;;  %5580 = vmatprep.subr.bf16.mxu1 %v8651_v41  ;;  %v8659_v36 = vld [vmem:[#allocation30_spill] sm:$0xff]  ;;  %v8669_v41 = vld [vmem:[#allocation40_spill] sm:$0xff] }
 0x7ae   :  { %5550 = vmatpush1.bf16.msra.mxu0 %v8652_v62  ;;  %5582 = vmatpush1.bf16.msra.mxu1 %v8653_v52  ;;  %v8660_v52 = vld [vmem:[#allocation31_spill] sm:$0xff]  ;;  %v8663_v62 = vld [vmem:[#allocation34_spill] sm:$0xff] }
 0x7af   :  { %5584 = vmatprep.subr.bf16.mxu0 %v8654_v0  ;;  %5616 = vmatprep.subr.bf16.mxu1 %v8655_v24  ;;  %v8661_v0 = vld [vmem:[#allocation32_spill] sm:$0xff]  ;;  %v8662_v24 = vld [vmem:[#allocation33_spill] sm:$0xff] }
 0x7b1   :  { %3323 = vmatmul.mubr.f32.vlgmr.msra.gmra.mrb[24].mxu0 %v7817_v58  ;;  %3394 = vmatmul.mubr.f32.vlgmr.msra.gmra.mrb[24].mxu1 %v7817_v58  ;;  %v8664_v58 = vld [vmem:[#allocation35_spill] sm:$0xff] }
 0x7b2   :  { %5586 = vmatpush1.bf16.msra.mxu0 %v8656_v55  ;;  %5618 = vmatpush1.bf16.msra.mxu1 %v8657_v46  ;;  %v8665_v55 = vld [vmem:[#allocation36_spill] sm:$0xff]  ;;  %v8666_v46 = vld [vmem:[#allocation37_spill] sm:$0xff] }
 0x7b3   :  { %5588 = vmatprep.subr.bf16.mxu0 %v8658_v42  ;;  %5620 = vmatprep.subr.bf16.mxu1 %v8659_v36  ;;  %v8667_v42 = vld [vmem:[#allocation38_spill] sm:$0xff]  ;;  %v8668_v36 = vld [vmem:[#allocation39_spill] sm:$0xff] }
 0x7b4   :  { %3496 = vmatprep.mubr.f32.mxu0 %v8369_v35  ;;  %3567 = vmatprep.mubr.f32.mxu1 %v8369_v35 }
 0x7b6   :  { %5590 = vmatpush1.bf16.msra.mxu0 %v8660_v52  ;;  %5622 = vmatpush1.bf16.msra.mxu1 %v8661_v0  ;;  %v8671_v52 = vld [vmem:[#allocation42_spill] sm:$0xff]  ;;  %v8672_v0 = vld [vmem:[#allocation43_spill] sm:$0xff] }
 0x7b7   :  { %5592 = vmatprep.subr.bf16.mxu0 %v8662_v24  ;;  %5624 = vmatprep.subr.bf16.mxu1 %v8663_v62  ;;  %v8673_v24 = vld [vmem:[#allocation44_spill] sm:$0xff]  ;;  %v8674_v62 = vld [vmem:[#allocation45_spill] sm:$0xff] }
 0x7ba   :  { %5594 = vmatpush1.bf16.msra.mxu0 %v8664_v58  ;;  %5626 = vmatpush1.bf16.msra.mxu1 %v8665_v55  ;;  %v8675_v58 = vld [vmem:[#allocation46_spill] sm:$0xff]  ;;  %v8676_v55 = vld [vmem:[#allocation47_spill] sm:$0xff] }
 0x7bb   :  { %5596 = vmatprep.subr.bf16.mxu0 %v8666_v46  ;;  %5628 = vmatprep.subr.bf16.mxu1 %v8667_v42  ;;  %v8677_v46 = vld [vmem:[#allocation48_spill] sm:$0xff]  ;;  %v8678_v42 = vld [vmem:[#allocation49_spill] sm:$0xff] }
 0x7be   :  { %5598 = vmatpush1.bf16.msra.mxu0 %v8668_v36  ;;  %5630 = vmatpush1.bf16.msra.mxu1 %v8669_v41  ;;  %v8679_v36 = vld [vmem:[#allocation50_spill] sm:$0xff]  ;;  %v8680_v41 = vld [vmem:[#allocation51_spill] sm:$0xff] }
 0x7bf   :  { %5600 = vmatprep.subr.bf16.mxu0 %v8670_v15  ;;  %5632 = vmatprep.subr.bf16.mxu1 %v8671_v52  ;;  %v8681_v15 = vld [vmem:[#allocation52_spill] sm:$0xff]  ;;  %v8682_v52 = vld [vmem:[#allocation53_spill] sm:$0xff] }
 0x7c2   :  { %5602 = vmatpush1.bf16.msra.mxu0 %v8672_v0  ;;  %5634 = vmatpush1.bf16.msra.mxu1 %v8673_v24  ;;  %v8683_v0 = vld [vmem:[#allocation54_spill] sm:$0xff]  ;;  %v8684_v24 = vld [vmem:[#allocation55_spill] sm:$0xff] }
 0x7c3   :  { %5604 = vmatprep.subr.bf16.mxu0 %v8674_v62  ;;  %5636 = vmatprep.subr.bf16.mxu1 %v8675_v58  ;;  %v8685_v62 = vld [vmem:[#allocation56_spill] sm:$0xff]  ;;  %v8686_v58 = vld [vmem:[#allocation57_spill] sm:$0xff] }
 0x7c6   :  { %5606 = vmatpush1.bf16.msra.mxu0 %v8676_v55  ;;  %5638 = vmatpush1.bf16.msra.mxu1 %v8677_v46  ;;  %v8687_v55 = vld [vmem:[#allocation58_spill] sm:$0xff] }
 0x7c7   :  { %5608 = vmatprep.subr.bf16.mxu0 %v8678_v42  ;;  %5640 = vmatprep.subr.bf16.mxu1 %v8679_v36 }
 0x7ca   :  { %5610 = vmatpush1.bf16.msra.mxu0 %v8680_v41  ;;  %5642 = vmatpush1.bf16.msra.mxu1 %v8681_v15 }
 0x7cb   :  { %5612 = vmatprep.subr.bf16.mxu0 %v8682_v52  ;;  %5644 = vmatprep.subr.bf16.mxu1 %v8683_v0 }
 0x7ce   :  { %5614 = vmatpush1.bf16.msra.mxu0 %v8684_v24  ;;  %5646 = vmatpush1.bf16.msra.mxu1 %v8685_v62 }
 0x7cf   :  { %5648 = vmatprep.subr.bf16.mxu0 %v8686_v58  ;;  %5680 = vmatprep.subr.bf16.mxu1 %v8687_v55 }
 0x864   :  { %v3143_v46 = vpop.f32.mrb[22].mxu0  ;;  %v3214_v42 = vpop.f32.mrb[22].mxu1 }
 0x865   :  { %v5923_v36 = vadd.f32 %v3143_v46, %v8688_v6  ;;  %v3145_v27 = vpop.f32.mrb[23].mxu0  ;;  %v3216_v41 = vpop.f32.mrb[23].mxu1  ;;  %v5925_v62 = vadd.f32 %v3214_v42, %v7252_v19 }
 0x866   :  { %v5924_v15 = vadd.f32 %v3145_v27, %v8689_v31  ;;  %v5926_v24 = vadd.f32 %v3216_v41, %v7249_v21  ;;  %v4345_v41 = vld [vmem:[%s8139_s0 + $0xc0] sm:$0xff] }
 0x867   :  { %v4341_v47 = vmul.f32 -1.442695, %v5923_v36 }
 0x868   :  { %v4342_v52 = vmul.f32 -1.442695, %v5924_v15  ;;  %v4343_v0 = vmul.f32 -1.442695, %v5926_v24 }
 0x869   :  { %6144 = vpow2.f32 %v4341_v47 }
 0x86a   :  { %6146 = vpow2.f32 %v4342_v52  ;;  %v8690_v52 = vld [vmem:[#allocation62_spill] sm:$0xff] }
 0x86b   :  { %6148 = vpow2.f32 %v4343_v0  ;;  %v4346_v0 = vld [vmem:[%s8139_s0 + $0xc8] sm:$0xff] }
 0x86c   :  { %6150 = vtanh.f32 %v5925_v62 }
 0x873   :  { %v6145_v58 = vpop.eup %6144 }
 0x874   :  { %v6147_v7 = vpop.eup %6146  ;;  %v3226_v55 = vadd.f32 1.0, %v6145_v58 }
 0x875   :  { %v3232_v1 = vadd.f32 1.0, %v6147_v7  ;;  %v6149_v46 = vpop.eup %6148 }
 0x876   :  { %6152 = vrcp.f32 %v3226_v55  ;;  %v6151_v6 = vpop.eup %6150  ;;  %v3239_v47 = vadd.f32 1.0, %v6149_v46 }
 0x877   :  { %6154 = vrcp.f32 %v3232_v1 }
 0x878   :  { %6156 = vrcp.f32 %v3239_v47 }
 0x880   :  { %v6153_v27 = vpop.eup %6152 }
 0x881   :  { %v6155_v36 = vpop.eup %6154  ;;  %v3243_v15 = vmul.f32 %v6153_v27, %v6151_v6  ;;  %v4348_v27 = vld [vmem:[%s8139_s0 + $0xd8] sm:$0xff] }
 0x882   :  { %v3242_v31 = vmul.f32 %v6155_v36, %v8690_v52 }
 0x884   :  { %v7936_v62 = vadd.f32 %v3243_v15, %v3242_v31  ;;  %v3324_v7 = vpop.f32.mrb[24].mxu0  ;;  %v3395_v1 = vpop.f32.mrb[24].mxu1  ;;  %v4347_v31 = vld [vmem:[%s8139_s0 + $0xd0] sm:$0xff] }
 0x885   :  { %v3400_v24 = vadd.f32 %v4345_v41, %v3324_v7  ;;  %v3326_v55 = vpop.f32.mrb[25].mxu0  ;;  %v3397_v42 = vpop.f32.mrb[25].mxu1  ;;  %v3402_v41 = vadd.f32 %v4347_v31, %v3395_v1 }
 0x886   :  { %8691 = vst [vmem:[#allocation69_spill] sm:$0xff] %v7936_v62  ;;  %v3401_v6 = vadd.f32 %v4346_v0, %v3326_v55  ;;  %6158 = vtanh.f32 %v7936_v62  ;;  %v3403_v36 = vadd.f32 %v4348_v27, %v3397_v42  ;;  %v6157_v15 = vpop.eup %6156 }
 0x887   :  { %v4349_v58 = vmul.f32 -1.442695, %v3400_v24 }
 0x888   :  { %v4350_v46 = vmul.f32 -1.442695, %v3401_v6  ;;  %v4351_v52 = vmul.f32 -1.442695, %v3403_v36 }
 0x889   :  { %6160 = vpow2.f32 %v4349_v58 }
 0x88a   :  { %6162 = vpow2.f32 %v4350_v46 }
 0x88b   :  { %6164 = vpow2.f32 %v4351_v52 }
 0x88c   :  { %6166 = vtanh.f32 %v3402_v41  ;;  %v8707_v41 = vld [vmem:[#allocation18_spill] sm:$0xff] }
 0x890   :  { %v6159_v47 = vpop.eup %6158 }
 0x891   :  { %v3246_v0 = vmul.f32 %v6159_v47, %v6157_v15 }
 0x893   :  { %v6161_v7 = vpop.eup %6160  ;;  %4344 = vst [vmem:[%s8141_s5 + $0x28] sm:$0xff] %v3246_v0 }
 0x894   :  { %v6163_v24 = vpop.eup %6162  ;;  %v3407_v55 = vadd.f32 1.0, %v6161_v7  ;;  %v8709_v7 = vld [vmem:[#allocation21_spill] sm:$0xff] }
 0x895   :  { %v3413_v6 = vadd.f32 1.0, %v6163_v24  ;;  %v6165_v42 = vpop.eup %6164  ;;  %v8710_v24 = vld [vmem:[#allocation24_spill] sm:$0xff] }
 0x896   :  { %6168 = vrcp.f32 %v3407_v55  ;;  %v6167_v58 = vpop.eup %6166  ;;  %v3420_v36 = vadd.f32 1.0, %v6165_v42  ;;  %v8711_v55 = vld [vmem:[#allocation25_spill] sm:$0xff]  ;;  %v8713_v42 = vld [vmem:[#allocation27_spill] sm:$0xff] }
 0x897   :  { %6170 = vrcp.f32 %v3413_v6  ;;  %v8712_v6 = vld [vmem:[#allocation26_spill] sm:$0xff] }
 0x898   :  { %6172 = vrcp.f32 %v3420_v36  ;;  %v8717_v36 = vld [vmem:[#allocation31_spill] sm:$0xff] }
 0x8a0   :  { %v6169_v46 = vpop.eup %6168 }
 0x8a1   :  { %v6171_v27 = vpop.eup %6170  ;;  %v3424_v62 = vmul.f32 %v6169_v46, %v6167_v58  ;;  %v8714_v58 = vld [vmem:[#allocation28_spill] sm:$0xff]  ;;  %v8715_v46 = vld [vmem:[#allocation29_spill] sm:$0xff] }
 0x8a2   :  { %v3423_v1 = vmul.f32 %v6171_v27, %v7814_v32  ;;  %v6173_v15 = vpop.eup %6172  ;;  %v8705_v32 = vld [vmem:[#allocation17_spill] sm:$0xff]  ;;  %v8716_v27 = vld [vmem:[#allocation30_spill] sm:$0xff] }
 0x8a4   :  { %v7949_v31 = vadd.f32 %v3424_v62, %v3423_v1  ;;  %v8706_v62 = vld [vmem:[#allocation22_spill] sm:$0xff]  ;;  %v8718_v1 = vld [vmem:[#allocation32_spill] sm:$0xff] }
 0x8a6   :  { %6174 = vtanh.f32 %v7949_v31 }
 0x8b0   :  { %v6175_v47 = vpop.eup %6174 }
 0x8b1   :  { %v7952_v52 = vmul.f32 %v6175_v47, %v6173_v15  ;;  %v8719_v15 = vld [vmem:[#allocation33_spill] sm:$0xff]  ;;  %v8720_v47 = vld [vmem:[#allocation34_spill] sm:$0xff] }
 0x8b3   :  { %3497 = vmatmul.mubr.f32.vlgmr.msra.gmra.mrb[26].mxu0 %v7952_v52  ;;  %3568 = vmatmul.mubr.f32.vlgmr.msra.gmra.mrb[26].mxu1 %v7952_v52 }
 0x8b4   :  { %5650 = vmatpush1.bf16.msra.mxu0 %v8408_v13  ;;  %5682 = vmatpush1.bf16.msra.mxu1 %v8409_v60 }
 0x8b5   :  { %5652 = vmatprep.subr.bf16.mxu0 %v8410_v63  ;;  %5684 = vmatprep.subr.bf16.mxu1 %v8464_v28 }
 0x8b6   :  { %3642 = vmatprep.mubr.f32.mxu0 %v8369_v35  ;;  %3713 = vmatprep.mubr.f32.mxu1 %v8369_v35 }
 0x8b8   :  { %5654 = vmatpush1.bf16.msra.mxu0 %v8465_v39  ;;  %5686 = vmatpush1.bf16.msra.mxu1 %v8466_v40 }
 0x8b9   :  { %5656 = vmatprep.subr.bf16.mxu0 %v8467_v18  ;;  %5688 = vmatprep.subr.bf16.mxu1 %v8468_v53 }
 0x8bc   :  { %5658 = vmatpush1.bf16.msra.mxu0 %v8469_v59  ;;  %5690 = vmatpush1.bf16.msra.mxu1 %v8417_v3 }
 0x8bd   :  { %5660 = vmatprep.subr.bf16.mxu0 %v8470_v10  ;;  %5692 = vmatprep.subr.bf16.mxu1 %v8419_v57 }
 0x8c0   :  { %5662 = vmatpush1.bf16.msra.mxu0 %v8420_v2  ;;  %5694 = vmatpush1.bf16.msra.mxu1 %v8421_v12 }
 0x8c1   :  { %5664 = vmatprep.subr.bf16.mxu0 %v8422_v61  ;;  %5696 = vmatprep.subr.bf16.mxu1 %v8423_v50 }
 0x8c4   :  { %5666 = vmatpush1.bf16.msra.mxu0 %v8424_v44  ;;  %5698 = vmatpush1.bf16.msra.mxu1 %v8425_v20 }
 0x8c5   :  { %5668 = vmatprep.subr.bf16.mxu0 %v8426_v49  ;;  %5700 = vmatprep.subr.bf16.mxu1 %v8427_v56 }
 0x8c8   :  { %5670 = vmatpush1.bf16.msra.mxu0 %v7098_v5  ;;  %5702 = vmatpush1.bf16.msra.mxu1 %v8428_v11 }
 0x8c9   :  { %5672 = vmatprep.subr.bf16.mxu0 %v7110_v43  ;;  %5704 = vmatprep.subr.bf16.mxu1 %v7112_v54 }
 0x8cc   :  { %5674 = vmatpush1.bf16.msra.mxu0 %v7134_v38  ;;  %5706 = vmatpush1.bf16.msra.mxu1 %v7136_v51 }
 0x8cd   :  { %5676 = vmatprep.subr.bf16.mxu0 %v7143_v29  ;;  %5708 = vmatprep.subr.bf16.mxu1 %v7145_v34 }
 0x8d0   :  { %5678 = vmatpush1.bf16.msra.mxu0 %v7158_v16  ;;  %5710 = vmatpush1.bf16.msra.mxu1 %v7160_v23 }
 0x8d1   :  { %5712 = vmatprep.subr.bf16.mxu0 %v6286_v4  ;;  %5744 = vmatprep.subr.bf16.mxu1 %v6338_v22  ;;  %v8692_v4 = vld [vmem:[#allocation8_spill] sm:$0xff]  ;;  %v8695_v22 = vld [vmem:[#allocation7_spill] sm:$0xff] }
 0x8d3   :  { %3643 = vmatmul.mubr.f32.vlgmr.msra.gmra.mrb[26].mxu0 %v3246_v0  ;;  %3714 = vmatmul.mubr.f32.vlgmr.msra.gmra.mrb[26].mxu1 %v3246_v0  ;;  %v8708_v0 = vld [vmem:[#allocation23_spill] sm:$0xff] }
 0x8d4   :  { %5714 = vmatpush1.bf16.msra.mxu0 %v6297_v8  ;;  %5746 = vmatpush1.bf16.msra.mxu1 %v6346_v25  ;;  %v8693_v8 = vld [vmem:[#allocation6_spill] sm:$0xff]  ;;  %v8697_v25 = vld [vmem:[#allocation9_spill] sm:$0xff] }
 0x8d5   :  { %5716 = vmatprep.subr.bf16.mxu0 %v6299_v9  ;;  %5748 = vmatprep.subr.bf16.mxu1 %v6371_v33  ;;  %v8694_v9 = vld [vmem:[#allocation11_spill] sm:$0xff]  ;;  %v8699_v33 = vld [vmem:[#allocation10_spill] sm:$0xff] }
 0x8d6   :  { %3823 = vmatprep.mubr.f32.mxu0 %v8369_v35  ;;  %3894 = vmatprep.mubr.f32.mxu1 %v8369_v35 }
 0x8d8   :  { %5718 = vmatpush1.bf16.msra.mxu0 %v6315_v14  ;;  %5750 = vmatpush1.bf16.msra.mxu1 %v6382_v37  ;;  %v8696_v14 = vld [vmem:[#allocation12_spill] sm:$0xff]  ;;  %v8701_v37 = vld [vmem:[#allocation13_spill] sm:$0xff] }
 0x8d9   :  { %5720 = vmatprep.subr.bf16.mxu0 %v6324_v17  ;;  %5752 = vmatprep.subr.bf16.mxu1 %v6406_v45  ;;  %v8698_v17 = vld [vmem:[#allocation15_spill] sm:$0xff]  ;;  %v8703_v45 = vld [vmem:[#allocation14_spill] sm:$0xff] }
 0x8dc   :  { %5722 = vmatpush1.bf16.msra.mxu0 %v6349_v26  ;;  %5754 = vmatpush1.bf16.msra.mxu1 %v6415_v48  ;;  %v8700_v26 = vld [vmem:[#allocation16_spill] sm:$0xff] }
 0x8dd   :  { %5724 = vmatprep.subr.bf16.mxu0 %v6362_v30  ;;  %5756 = vmatprep.subr.bf16.mxu1 %v8692_v4  ;;  %v8702_v30 = vld [vmem:[#allocation19_spill] sm:$0xff]  ;;  %v8704_v48 = vld [vmem:[#allocation20_spill] sm:$0xff] }
 0x8de   :  { %v8722_v4 = vld [vmem:[#allocation36_spill] sm:$0xff] }
 0x8e0   :  { %5726 = vmatpush1.bf16.msra.mxu0 %v8693_v8  ;;  %5758 = vmatpush1.bf16.msra.mxu1 %v8694_v9  ;;  %v8723_v8 = vld [vmem:[#allocation37_spill] sm:$0xff]  ;;  %v8724_v9 = vld [vmem:[#allocation38_spill] sm:$0xff] }
 0x8e1   :  { %5728 = vmatprep.subr.bf16.mxu0 %v8695_v22  ;;  %5760 = vmatprep.subr.bf16.mxu1 %v8696_v14  ;;  %v8725_v22 = vld [vmem:[#allocation39_spill] sm:$0xff]  ;;  %v8726_v14 = vld [vmem:[#allocation40_spill] sm:$0xff] }
 0x8e4   :  { %5730 = vmatpush1.bf16.msra.mxu0 %v8697_v25  ;;  %5762 = vmatpush1.bf16.msra.mxu1 %v8698_v17  ;;  %v8727_v25 = vld [vmem:[#allocation41_spill] sm:$0xff]  ;;  %v8728_v17 = vld [vmem:[#allocation42_spill] sm:$0xff] }
 0x8e5   :  { %5732 = vmatprep.subr.bf16.mxu0 %v8699_v33  ;;  %5764 = vmatprep.subr.bf16.mxu1 %v8700_v26  ;;  %v8729_v33 = vld [vmem:[#allocation43_spill] sm:$0xff]  ;;  %v8730_v26 = vld [vmem:[#allocation44_spill] sm:$0xff] }
 0x8e8   :  { %5734 = vmatpush1.bf16.msra.mxu0 %v8701_v37  ;;  %5766 = vmatpush1.bf16.msra.mxu1 %v8702_v30  ;;  %v8731_v37 = vld [vmem:[#allocation45_spill] sm:$0xff]  ;;  %v8732_v30 = vld [vmem:[#allocation46_spill] sm:$0xff] }
 0x8e9   :  { %5736 = vmatprep.subr.bf16.mxu0 %v8703_v45  ;;  %5768 = vmatprep.subr.bf16.mxu1 %v8704_v48  ;;  %v8733_v45 = vld [vmem:[#allocation47_spill] sm:$0xff]  ;;  %v8734_v48 = vld [vmem:[#allocation48_spill] sm:$0xff] }
 0x8ec   :  { %5738 = vmatpush1.bf16.msra.mxu0 %v8705_v32  ;;  %5770 = vmatpush1.bf16.msra.mxu1 %v8706_v62  ;;  %v8735_v32 = vld [vmem:[#allocation49_spill] sm:$0xff]  ;;  %v8736_v62 = vld [vmem:[#allocation50_spill] sm:$0xff] }
 0x8ed   :  { %5740 = vmatprep.subr.bf16.mxu0 %v8707_v41  ;;  %5772 = vmatprep.subr.bf16.mxu1 %v8708_v0  ;;  %v8737_v41 = vld [vmem:[#allocation51_spill] sm:$0xff]  ;;  %v8738_v0 = vld [vmem:[#allocation52_spill] sm:$0xff] }
 0x8f0   :  { %5742 = vmatpush1.bf16.msra.mxu0 %v8709_v7  ;;  %5774 = vmatpush1.bf16.msra.mxu1 %v8710_v24  ;;  %v8739_v7 = vld [vmem:[#allocation53_spill] sm:$0xff]  ;;  %v8740_v24 = vld [vmem:[#allocation54_spill] sm:$0xff] }
 0x8f1   :  { %5776 = vmatprep.subr.bf16.mxu0 %v8711_v55  ;;  %5808 = vmatprep.subr.bf16.mxu1 %v8712_v6  ;;  %v8741_v55 = vld [vmem:[#allocation55_spill] sm:$0xff]  ;;  %v8742_v6 = vld [vmem:[#allocation56_spill] sm:$0xff] }
 0x8f3   :  { %3824 = vmatmul.mubr.f32.vlgmr.msra.gmra.mrb[28].mxu0 %v7952_v52  ;;  %3895 = vmatmul.mubr.f32.vlgmr.msra.gmra.mrb[28].mxu1 %v7952_v52  ;;  %v8721_v52 = vld [vmem:[#allocation35_spill] sm:$0xff] }
 0x8f4   :  { %5778 = vmatpush1.bf16.msra.mxu0 %v8713_v42  ;;  %5810 = vmatpush1.bf16.msra.mxu1 %v8714_v58  ;;  %v8743_v42 = vld [vmem:[#allocation57_spill] sm:$0xff]  ;;  %v8744_v58 = vld [vmem:[#allocation58_spill] sm:$0xff] }
 0x8f5   :  { %5780 = vmatprep.subr.bf16.mxu0 %v8715_v46  ;;  %5812 = vmatprep.subr.bf16.mxu1 %v8716_v27 }
 0x8f6   :  { %3997 = vmatprep.mubr.f32.mxu0 %v8369_v35  ;;  %4068 = vmatprep.mubr.f32.mxu1 %v8369_v35 }
 0x8f8   :  { %5782 = vmatpush1.bf16.msra.mxu0 %v8717_v36  ;;  %5814 = vmatpush1.bf16.msra.mxu1 %v8718_v1  ;;  %v8745_v36 = vld [vmem:[#allocation81_spill] sm:$0xff] }
 0x8f9   :  { %5784 = vmatprep.subr.bf16.mxu0 %v8719_v15  ;;  %5816 = vmatprep.subr.bf16.mxu1 %v8720_v47 }
 0x8fc   :  { %5786 = vmatpush1.bf16.msra.mxu0 %v8721_v52  ;;  %5818 = vmatpush1.bf16.msra.mxu1 %v8722_v4  ;;  %v8746_v52 = vld [vmem:[#allocation82_spill] sm:$0xff] }
 0x8fd   :  { %5788 = vmatprep.subr.bf16.mxu0 %v8723_v8  ;;  %5820 = vmatprep.subr.bf16.mxu1 %v8724_v9 }
 0x900   :  { %5790 = vmatpush1.bf16.msra.mxu0 %v8725_v22  ;;  %5822 = vmatpush1.bf16.msra.mxu1 %v8726_v14 }
 0x901   :  { %5792 = vmatprep.subr.bf16.mxu0 %v8727_v25  ;;  %5824 = vmatprep.subr.bf16.mxu1 %v8728_v17 }
 0x904   :  { %5794 = vmatpush1.bf16.msra.mxu0 %v8729_v33  ;;  %5826 = vmatpush1.bf16.msra.mxu1 %v8730_v26 }
 0x905   :  { %5796 = vmatprep.subr.bf16.mxu0 %v8731_v37  ;;  %5828 = vmatprep.subr.bf16.mxu1 %v8732_v30 }
 0x908   :  { %5798 = vmatpush1.bf16.msra.mxu0 %v8733_v45  ;;  %5830 = vmatpush1.bf16.msra.mxu1 %v8734_v48 }
 0x909   :  { %5800 = vmatprep.subr.bf16.mxu0 %v8735_v32  ;;  %5832 = vmatprep.subr.bf16.mxu1 %v8736_v62 }
 0x90c   :  { %5802 = vmatpush1.bf16.msra.mxu0 %v8737_v41  ;;  %5834 = vmatpush1.bf16.msra.mxu1 %v8738_v0  ;;  %v8747_v0 = vld [vmem:[#allocation69_spill] sm:$0xff] }
 0x90d   :  { %5804 = vmatprep.subr.bf16.mxu0 %v8739_v7  ;;  %5836 = vmatprep.subr.bf16.mxu1 %v8740_v24  ;;  %v4356_v24 = vld [vmem:[%s8139_s0 + $0xe0] sm:$0xff] }
 0x910   :  { %5806 = vmatpush1.bf16.msra.mxu0 %v8741_v55  ;;  %5838 = vmatpush1.bf16.msra.mxu1 %v8742_v6  ;;  %v4357_v55 = vld [vmem:[%s8139_s0 + $0xe8] sm:$0xff] }
 0x911   :  { %5840 = vmatprep.subr.bf16.mxu0 %v8743_v42  ;;  %5872 = vmatprep.subr.bf16.mxu1 %v8744_v58 }
 0x9a6   :  { %v3644_v46 = vpop.f32.mrb[26].mxu0  ;;  %v3715_v27 = vpop.f32.mrb[26].mxu1 }
 0x9a7   :  { %v5927_v1 = vadd.f32 %v3644_v46, %v8745_v36  ;;  %v3646_v15 = vpop.f32.mrb[27].mxu0  ;;  %v3717_v47 = vpop.f32.mrb[27].mxu1  ;;  %v5929_v25 = vadd.f32 %v3715_v27, %v7252_v19 }
 0x9a8   :  { %v5928_v4 = vadd.f32 %v3646_v15, %v8746_v52  ;;  %v5930_v22 = vadd.f32 %v3717_v47, %v7249_v21 }
 0x9a9   :  { %v4352_v8 = vmul.f32 -1.442695, %v5927_v1 }
 0x9aa   :  { %v4353_v9 = vmul.f32 -1.442695, %v5928_v4  ;;  %v4354_v14 = vmul.f32 -1.442695, %v5930_v22  ;;  %v4358_v22 = vld [vmem:[%s8139_s0 + $0xf0] sm:$0xff] }
 0x9ab   :  { %6176 = vpow2.f32 %v4352_v8  ;;  %v4359_v8 = vld [vmem:[%s8139_s0 + $0xf8] sm:$0xff] }
 0x9ac   :  { %6178 = vpow2.f32 %v4353_v9 }
 0x9ad   :  { %6180 = vpow2.f32 %v4354_v14 }
 0x9ae   :  { %6182 = vtanh.f32 %v5929_v25 }
 0x9b5   :  { %v6177_v17 = vpop.eup %6176 }
 0x9b6   :  { %v6179_v33 = vpop.eup %6178  ;;  %v3727_v26 = vadd.f32 1.0, %v6177_v17 }
 0x9b7   :  { %v3733_v37 = vadd.f32 1.0, %v6179_v33  ;;  %v6181_v30 = vpop.eup %6180 }
 0x9b8   :  { %6184 = vrcp.f32 %v3727_v26  ;;  %v6183_v45 = vpop.eup %6182  ;;  %v3740_v41 = vadd.f32 1.0, %v6181_v30 }
 0x9b9   :  { %6186 = vrcp.f32 %v3733_v37 }
 0x9ba   :  { %6188 = vrcp.f32 %v3740_v41 }
 0x9c2   :  { %v6185_v48 = vpop.eup %6184 }
 0x9c3   :  { %v6187_v32 = vpop.eup %6186  ;;  %v3744_v62 = vmul.f32 %v6185_v48, %v6183_v45 }
 0x9c4   :  { %v3743_v7 = vmul.f32 %v6187_v32, %v8747_v0  ;;  %v6189_v14 = vpop.eup %6188 }
 0x9c6   :  { %v8071_v6 = vadd.f32 %v3744_v62, %v3743_v7  ;;  %v3825_v42 = vpop.f32.mrb[28].mxu0  ;;  %v3896_v58 = vpop.f32.mrb[28].mxu1 }
 0x9c7   :  { %v3901_v46 = vadd.f32 %v4356_v24, %v3825_v42  ;;  %v3827_v27 = vpop.f32.mrb[29].mxu0  ;;  %v3898_v1 = vpop.f32.mrb[29].mxu1  ;;  %v3903_v33 = vadd.f32 %v4358_v22, %v3896_v58 }
 0x9c8   :  { %v3902_v15 = vadd.f32 %v4357_v55, %v3827_v27  ;;  %6190 = vtanh.f32 %v8071_v6  ;;  %v3904_v9 = vadd.f32 %v4359_v8, %v3898_v1 }
 0x9c9   :  { %v4360_v47 = vmul.f32 -1.442695, %v3901_v46 }
 0x9ca   :  { %v4361_v4 = vmul.f32 -1.442695, %v3902_v15  ;;  %v4362_v17 = vmul.f32 -1.442695, %v3904_v9 }
 0x9cb   :  { %6192 = vpow2.f32 %v4360_v47 }
 0x9cc   :  { %6194 = vpow2.f32 %v4361_v4 }
 0x9cd   :  { %6196 = vpow2.f32 %v4362_v17 }
 0x9ce   :  { %6198 = vtanh.f32 %v3903_v33 }
 0x9d2   :  { %v6191_v25 = vpop.eup %6190 }
 0x9d3   :  { %v3747_v26 = vmul.f32 %v6191_v25, %v6189_v14 }
 0x9d5   :  { %v6193_v37 = vpop.eup %6192  ;;  %4355 = vst [vmem:[%s8141_s5 + $0x30] sm:$0xff] %v3747_v26 }
 0x9d6   :  { %v6195_v30 = vpop.eup %6194  ;;  %v3908_v45 = vadd.f32 1.0, %v6193_v37 }
 0x9d7   :  { %v3914_v48 = vadd.f32 1.0, %v6195_v30  ;;  %v6197_v32 = vpop.eup %6196 }
 0x9d8   :  { %6200 = vrcp.f32 %v3908_v45  ;;  %v6199_v62 = vpop.eup %6198  ;;  %v3921_v24 = vadd.f32 1.0, %v6197_v32 }
 0x9d9   :  { %6202 = vrcp.f32 %v3914_v48 }
 0x9da   :  { %6204 = vrcp.f32 %v3921_v24 }
 0x9e2   :  { %v6201_v41 = vpop.eup %6200 }
 0x9e3   :  { %v6203_v0 = vpop.eup %6202  ;;  %v3925_v7 = vmul.f32 %v6201_v41, %v6199_v62 }
 0x9e4   :  { %v3924_v55 = vmul.f32 %v6203_v0, %v7949_v31  ;;  %v6205_v58 = vpop.eup %6204 }
 0x9e6   :  { %v3926_v42 = vadd.f32 %v3925_v7, %v3924_v55 }
 0x9e8   :  { %4259 = vst [vmem:[%s8142_s7] sm:$0xff] %v3926_v42  ;;  %6206 = vtanh.f32 %v3926_v42 }
 0x9f2   :  { %v6207_v46 = vpop.eup %6206 }
 0x9f3   :  { %v3928_v27 = vmul.f32 %v6207_v46, %v6205_v58 }
 0x9f5   :  { %3998 = vmatmul.mubr.f32.vlgmr.msra.gmra.mrb[30].mxu0 %v3928_v27  ;;  %4257 = vst [vmem:[%s8143_s6] sm:$0xff] %v3928_v27  ;;  %4069 = vmatmul.mubr.f32.vlgmr.msra.gmra.mrb[30].mxu1 %v3928_v27 }
 0x9f6   :  { %5842 = vmatpush1.bf16.msra.mxu0 %v8408_v13  ;;  %5874 = vmatpush1.bf16.msra.mxu1 %v8409_v60 }
 0x9f7   :  { %5844 = vmatprep.subr.bf16.mxu0 %v8410_v63  ;;  %5876 = vmatprep.subr.bf16.mxu1 %v8464_v28 }
 0x9f8   :  { %4143 = vmatprep.mubr.f32.mxu0 %v8369_v35  ;;  %4214 = vmatprep.mubr.f32.mxu1 %v8369_v35 }
 0x9fa   :  { %5846 = vmatpush1.bf16.msra.mxu0 %v8465_v39  ;;  %5878 = vmatpush1.bf16.msra.mxu1 %v8466_v40 }
 0x9fb   :  { %5848 = vmatprep.subr.bf16.mxu0 %v8467_v18  ;;  %5880 = vmatprep.subr.bf16.mxu1 %v8468_v53 }
 0x9fe   :  { %5850 = vmatpush1.bf16.msra.mxu0 %v8469_v59  ;;  %5882 = vmatpush1.bf16.msra.mxu1 %v8417_v3 }
 0x9ff   :  { %5852 = vmatprep.subr.bf16.mxu0 %v8470_v10  ;;  %5884 = vmatprep.subr.bf16.mxu1 %v8419_v57 }
 0xa02   :  { %5854 = vmatpush1.bf16.msra.mxu0 %v8420_v2  ;;  %5886 = vmatpush1.bf16.msra.mxu1 %v8421_v12 }
 0xa03   :  { %5856 = vmatprep.subr.bf16.mxu0 %v8422_v61  ;;  %5888 = vmatprep.subr.bf16.mxu1 %v8423_v50 }
 0xa06   :  { %5858 = vmatpush1.bf16.msra.mxu0 %v8424_v44  ;;  %5890 = vmatpush1.bf16.msra.mxu1 %v8425_v20 }
 0xa07   :  { %5860 = vmatprep.subr.bf16.mxu0 %v8426_v49  ;;  %5892 = vmatprep.subr.bf16.mxu1 %v8427_v56 }
 0xa0a   :  { %5862 = vmatpush1.bf16.msra.mxu0 %v7098_v5  ;;  %5894 = vmatpush1.bf16.msra.mxu1 %v8428_v11 }
 0xa0b   :  { %5864 = vmatprep.subr.bf16.mxu0 %v7110_v43  ;;  %5896 = vmatprep.subr.bf16.mxu1 %v7112_v54 }
 0xa0e   :  { %5866 = vmatpush1.bf16.msra.mxu0 %v7134_v38  ;;  %5898 = vmatpush1.bf16.msra.mxu1 %v7136_v51 }
 0xa0f   :  { %5868 = vmatprep.subr.bf16.mxu0 %v7143_v29  ;;  %5900 = vmatprep.subr.bf16.mxu1 %v7145_v34 }
 0xa12   :  { %5870 = vmatpush1.bf16.msra.mxu0 %v7158_v16  ;;  %5902 = vmatpush1.bf16.msra.mxu1 %v7160_v23 }
 0xa15   :  { %4144 = vmatmul.mubr.f32.vlgmr.msra.gmra.mrb[30].mxu0 %v3747_v26  ;;  %4215 = vmatmul.mubr.f32.vlgmr.msra.gmra.mrb[30].mxu1 %v3747_v26 }
 0xae8   :  { %v4145_v35 = vpop.f32.mrb[30].mxu0  ;;  %v4216_v5 = vpop.f32.mrb[30].mxu1 }
 0xae9   :  { %v5931_v43 = vadd.f32 %v4145_v35, %v8745_v36  ;;  %v4147_v13 = vpop.f32.mrb[31].mxu0  ;;  %v4218_v54 = vpop.f32.mrb[31].mxu1  ;;  %v5933_v16 = vadd.f32 %v4216_v5, %v7252_v19 }
 0xaea   :  { %v5932_v38 = vadd.f32 %v4147_v13, %v8746_v52  ;;  %v5934_v29 = vadd.f32 %v4218_v54, %v7249_v21 }
 0xaeb   :  { %v4363_v60 = vmul.f32 -1.442695, %v5931_v43 }
 0xaec   :  { %v4364_v51 = vmul.f32 -1.442695, %v5932_v38  ;;  %v4365_v34 = vmul.f32 -1.442695, %v5934_v29 }
 0xaed   :  { %6208 = vpow2.f32 %v4363_v60 }
 0xaee   :  { %6210 = vpow2.f32 %v4364_v51 }
 0xaef   :  { %6212 = vpow2.f32 %v4365_v34 }
 0xaf0   :  { %6214 = vtanh.f32 %v5933_v16 }
 0xaf7   :  { %v6209_v23 = vpop.eup %6208 }
 0xaf8   :  { %v6211_v63 = vpop.eup %6210  ;;  %v4228_v61 = vadd.f32 1.0, %v6209_v23 }
 0xaf9   :  { %v4234_v50 = vadd.f32 1.0, %v6211_v63  ;;  %v6213_v44 = vpop.eup %6212 }
 0xafa   :  { %6216 = vrcp.f32 %v4228_v61  ;;  %v6215_v20 = vpop.eup %6214  ;;  %v4241_v11 = vadd.f32 1.0, %v6213_v44 }
 0xafb   :  { %6218 = vrcp.f32 %v4234_v50 }
 0xafc   :  { %6220 = vrcp.f32 %v4241_v11 }
 0xb04   :  { %v6217_v49 = vpop.eup %6216 }
 0xb05   :  { %v6219_v56 = vpop.eup %6218  ;;  %v4245_v3 = vmul.f32 %v6217_v49, %v6215_v20 }
 0xb06   :  { %v4244_v57 = vmul.f32 %v6219_v56, %v8071_v6  ;;  %v6221_v19 = vpop.eup %6220 }
 0xb08   :  { %v4246_v21 = vadd.f32 %v4245_v3, %v4244_v57 }
 0xb0a   :  { %6222 = vtanh.f32 %v4246_v21  ;;  %4263 = vst [vmem:[%s8144_s9] sm:$0xff] %v4246_v21 }
 0xb14   :  { %v6223_v2 = vpop.eup %6222 }
 0xb15   :  { %v4248_v12 = vmul.f32 %v6223_v2, %v6221_v19 }
 0xb17   :  { %4366 = vst [vmem:[%s8141_s5 + $0x38] sm:$0xff] %v4248_v12  ;;  %4261 = vst [vmem:[%s8145_s8] sm:$0xff] %v4248_v12 }

</bundles_post_ra>
